<compile_context>
chip_gen: v6e
topology: v6e:2x2x1
jax: 0.10.0
libtpu: 0.0.40
codegen_flags: <defaults>
</compile_context>

<pallas_src>
import functools

import jax
import jax.numpy as jnp
from jax.experimental import pallas as pl
from jax.experimental.pallas import tpu as pltpu


def lstm_classifier_kernel(xtm_ref, idx_ref, tab_ref, whh_ref, wfc_ref, bfc_ref,
                           out_ref, gates_s):
    T, N = xtm_ref.shape            # seq length, batch block (multiple of 8)
    V, G4 = tab_ref.shape           # vocab, 4 * padded hidden
    Hp = whh_ref.shape[0]           # padded hidden size (128)

    # ---- Embedding + input projection + bias, all folded into one table on the
    # wrapper side. The lookup is a one-hot matmul on the MXU (exact: each row
    # has a single 1.0), done once for ALL timesteps.
    # TODO(synk): for large vocabularies keep the table in HBM and replace the
    # one-hot matmul with a scalar-prefetched DMA row gather.
    ids = xtm_ref[...]                                                # [T, N] int32
    iota_v = jax.lax.broadcasted_iota(jnp.int32, (T, N, V), 2)
    onehot = (ids[:, :, None] == iota_v).astype(jnp.bfloat16)         # [T, N, V]
    gates = jnp.dot(onehot.reshape(T * N, V), tab_ref[...],
                    preferred_element_type=jnp.float32)               # [T*N, 4Hp] f32
    gates_s[...] = gates.reshape(T, N, G4).astype(jnp.bfloat16)

    # ---- GetIndex result (last valid step per row), computed on the wrapper;
    # broadcast hoisted out of the recurrence. ----
    idx_b = jnp.broadcast_to(idx_ref[...], (N, Hp))                   # [N, Hp] int32

    # Hoist the recurrent weight load out of the unrolled loop (bf16 MXU operand).
    whh = whh_ref[...]                                                # [Hp, 4Hp] bf16

    # ---- LSTM (batch_first, h0 = c0 = 0), gate order i, f, g, o.
    # h / c / sel are loop-carried vregs; one bf16 MXU dot per step. ----
    def step(t, carry):
        h, c, sel = carry
        g = gates_s[t].astype(jnp.float32) + jnp.dot(
            h.astype(jnp.bfloat16), whh, preferred_element_type=jnp.float32)  # [N, 4Hp]
        i_g = jax.nn.sigmoid(g[:, 0 * Hp:1 * Hp])
        f_g = jax.nn.sigmoid(g[:, 1 * Hp:2 * Hp])
        g_g = jnp.tanh(g[:, 2 * Hp:3 * Hp])
        o_g = jax.nn.sigmoid(g[:, 3 * Hp:4 * Hp])
        c_new = f_g * c + i_g * g_g
        h_new = o_g * jnp.tanh(c_new)
        # torch.gather(lstm_out, dim=1, index=o2): keep h at the last valid step.
        # Rows with no token > 0 have idx = -1 and keep sel = 0 (padding rows).
        sel = jnp.where(idx_b == t, h_new, sel)
        return (h_new, c_new, sel)

    zeros = jnp.zeros((N, Hp), jnp.float32)
    _, _, sel = jax.lax.fori_loop(0, T, step, (zeros, zeros, zeros), unroll=True)

    # ---- fc + log_softmax (tiny; kept in f32) ----
    logits = (jnp.dot(sel, wfc_ref[...], preferred_element_type=jnp.float32)
              + bfc_ref[...])                                         # [N, 2]
    m = jnp.max(logits, axis=-1, keepdims=True)
    lse = m + jnp.log(jnp.sum(jnp.exp(logits - m), axis=-1, keepdims=True))
    out_ref[...] = logits - lse


@functools.partial(jax.jit, static_argnames=("block_n",))
def _run(xtm, idx, tab, whh, wfc, bfc, *, block_n):
    T, Np = xtm.shape
    V, G4 = tab.shape
    Hp = whh.shape[0]
    C = wfc.shape[1]
    grid = (Np // block_n,)
    return pl.pallas_call(
        lstm_classifier_kernel,
        out_shape=jax.ShapeDtypeStruct((Np, C), jnp.float32),
        grid_spec=pltpu.PrefetchScalarGridSpec(
            num_scalar_prefetch=0,
            grid=grid,
            in_specs=[
                pl.BlockSpec((T, block_n), lambda b: (0, b)),    # token ids (time-major)
                pl.BlockSpec((block_n, 1), lambda b: (b, 0)),    # last-valid index per row
                pl.BlockSpec((V, G4), lambda b: (0, 0)),         # folded emb@W_ih+b table
                pl.BlockSpec((Hp, G4), lambda b: (0, 0)),        # W_hh (gate-concatenated)
                pl.BlockSpec((Hp, C), lambda b: (0, 0)),         # fc weight
                pl.BlockSpec((1, C), lambda b: (0, 0)),          # fc bias
            ],
            out_specs=pl.BlockSpec((block_n, C), lambda b: (b, 0)),
            scratch_shapes=[
                pltpu.VMEM((T, block_n, G4), jnp.bfloat16),      # hoisted gate pre-acts
            ],
        ),
        compiler_params=pltpu.CompilerParams(
            dimension_semantics=("parallel",),          # megacore: split batch blocks
            vmem_limit_bytes=32 * 1024 * 1024,          # explicit; fits v5e/v6e/v7x
        ),
    )(xtm, idx, tab, whh, wfc, bfc)


def text_classifier_forward(x, params, *, block_n=256):
    """x: [N, T] int token ids. params use H=50-sized weights, gate order i,f,g,o,
    with W_ih/W_hh pre-transposed to [H, 4H] and b = b_ih + b_hh folded to [1, 4H]."""
    x = x.astype(jnp.int32)
    N, T = x.shape
    V, H = params["emb"].shape
    C = params["wfc"].shape[1]

    f32, bf16 = jnp.float32, jnp.bfloat16
    Hp = -(-H // 128) * 128                       # lane-pad hidden 50 -> 128 per gate
    bn = min(block_n, max(8, -(-N // 8) * 8))     # batch block, multiple of 8
    bn = max(8, (bn // 8) * 8)
    Np = -(-N // bn) * bn                         # sublane-pad batch to block multiple

    # ---- wrapper-side prep (runs once in XLA, outside the kernel) ----
    x_p = jnp.zeros((Np, T), jnp.int32).at[:N].set(x)        # padded rows: all-zero ids
    xtm = jnp.transpose(x_p)                                  # [T, Np] time-major
    idx = jnp.sum((x_p > 0).astype(jnp.int32), axis=1, keepdims=True) - 1   # [Np, 1]

    # Fold embedding table, input projection and bias: tab[v] = emb[v] @ W_ih + b.
    # Exact fold (each one-hot row selects a single table row). Gate k gets its
    # own 128-lane-aligned block so in-kernel gate slices are vreg-aligned.
    g_full = (params["emb"].astype(f32) @ params["wih"].astype(f32)
              + params["b"].astype(f32))                      # [V, 4H]
    tab = jnp.zeros((V, 4 * Hp), f32)
    whh_p = jnp.zeros((Hp, 4 * Hp), f32)
    for k in range(4):
        tab = tab.at[:, k * Hp:k * Hp + H].set(g_full[:, k * H:(k + 1) * H])
        whh_p = whh_p.at[:H, k * Hp:k * Hp + H].set(
            params["whh"][:, k * H:(k + 1) * H].astype(f32))
    tab = tab.astype(bf16)                                    # bf16 MXU operands
    whh_p = whh_p.astype(bf16)
    wfc_p = jnp.zeros((Hp, C), f32).at[:H].set(params["wfc"].astype(f32))
    bfc = params["bfc"].astype(f32)

    out = _run(xtm, idx, tab, whh_p, wfc_p, bfc, block_n=bn)
    return out[:N]


def reference_forward(x, params):
    """Pure-JAX f32 reference mirroring the PyTorch forward (unpadded)."""
    N, T = x.shape
    H = params["emb"].shape[1]
    emb = params["emb"][x]                               # [N, T, H]
    idx = jnp.sum(x > 0, axis=1) - 1                     # [N]

    def step(carry, x_t):
        h, c = carry
        g = x_t @ params["wih"] + h @ params["whh"] + params["b"]    # [N, 4H]
        i = jax.nn.sigmoid(g[:, 0:H])
        f = jax.nn.sigmoid(g[:, H:2 * H])
        gg = jnp.tanh(g[:, 2 * H:3 * H])
        o = jax.nn.sigmoid(g[:, 3 * H:4 * H])
        c = f * c + i * gg
        h = o * jnp.tanh(c)
        return (h, c), h

    init = (jnp.zeros((N, H), jnp.float32), jnp.zeros((N, H), jnp.float32))
    _, hs = jax.lax.scan(step, init, jnp.transpose(emb, (1, 0, 2)))  # [T, N, H]
    sel = hs[idx, jnp.arange(N), :]                                  # [N, H]
    logits = sel @ params["wfc"] + params["bfc"]
    return jax.nn.log_softmax(logits, axis=-1)


if __name__ == "__main__":
    N, T, H, V = 2, 20, 50, 128   # batch, seq (fixed 20), hidden (fixed 50), vocab
    key = jax.random.PRNGKey(0)
    k_emb, k_wih, k_whh, k_b, k_wfc, k_bfc, k_tok = jax.random.split(key, 7)
    s = float(1.0 / jnp.sqrt(H))

    # deterministic synthetic parameters (gate order i, f, g, o; weights stored
    # pre-transposed and gate-concatenated so x @ W works; b = b_ih + b_hh folded)
    params = dict(
        emb=jax.random.normal(k_emb, (V, H), jnp.float32) * 0.1,
        wih=jax.random.uniform(k_wih, (H, 4 * H), jnp.float32, -s, s),
        whh=jax.random.uniform(k_whh, (H, 4 * H), jnp.float32, -s, s),
        b=jax.random.uniform(k_b, (1, 4 * H), jnp.float32, -s, s),
        wfc=jax.random.uniform(k_wfc, (H, 2), jnp.float32, -s, s),
        bfc=jax.random.uniform(k_bfc, (1, 2), jnp.float32, -s, s),
    )

    # token ids: positive prefix of varying length, zero padding after
    tokens = jax.random.randint(k_tok, (N, T), 1, V)
    lengths = jnp.array([13, 7])
    pos = jnp.arange(T)[None, :]
    x = jnp.where(pos < lengths[:, None], tokens, 0).astype(jnp.int32)

    out = text_classifier_forward(x, params)
    out = jax.block_until_ready(out)

    ref = reference_forward(x, params)
    assert out.shape == (N, 2)
    # bf16 MXU operands (review-recommended) vs. f32 reference -> slightly looser tol.
    assert jnp.allclose(out, ref, atol=1e-2, rtol=1e-2), (out, ref)
    print("KERNEL_OK")
</pallas_src>

<mosaic_0001>
module attributes {stable_mosaic.version = 11 : i64} {
  func.func @lstm_classifier_kernel(%arg0: i32, %arg1: memref<20x8xi32, #tpu.memory_space<vmem>>, %arg2: memref<8x1xi32, #tpu.memory_space<vmem>>, %arg3: memref<128x512xbf16, #tpu.memory_space<vmem>>, %arg4: memref<128x512xbf16, #tpu.memory_space<vmem>>, %arg5: memref<128x2xf32, #tpu.memory_space<vmem>>, %arg6: memref<1x2xf32, #tpu.memory_space<vmem>>, %arg7: memref<8x2xf32, #tpu.memory_space<vmem>>, %arg8: memref<20x8x512xbf16, #tpu.memory_space<vmem>>) attributes {dimension_semantics = [#tpu.dimension_semantics<parallel>], iteration_bounds = array<i64: 1>, scalar_prefetch = 0 : i64, scratch_operands = 1 : i64, tpu.core_type = #tpu.core_type<tc>, window_params = [{transform_indices = @transform_0, window_bounds = array<i64: 20, 8>}, {transform_indices = @transform_1, window_bounds = array<i64: 8, 1>}, {pipeline_mode = #tpu.pipeline_mode<synchronous>, transform_indices = @transform_2, window_bounds = array<i64: 128, 512>}, {pipeline_mode = #tpu.pipeline_mode<synchronous>, transform_indices = @transform_3, window_bounds = array<i64: 128, 512>}, {pipeline_mode = #tpu.pipeline_mode<synchronous>, transform_indices = @transform_4, window_bounds = array<i64: 128, 2>}, {pipeline_mode = #tpu.pipeline_mode<synchronous>, transform_indices = @transform_5, window_bounds = array<i64: 1, 2>}, {transform_indices = @transform_6, window_bounds = array<i64: 8, 2>}]} {
    %c0 = arith.constant 0 : index
    %c0_0 = arith.constant 0 : index
    %0 = vector.load %arg1[%c0, %c0_0] : memref<20x8xi32, #tpu.memory_space<vmem>>, vector<20x8xi32>
    %1 = tpu.iota {dimensions = array<i32: 2>} : vector<20x8x128xi32>
    %2 = vector.shape_cast %0 : vector<20x8xi32> to vector<20x8x1xi32>
    %3 = vector.broadcast %2 : vector<20x8x1xi32> to vector<20x8x128xi32>
    %4 = arith.cmpi eq, %3, %1 : vector<20x8x128xi32>
    %5 = arith.extui %4 : vector<20x8x128xi1> to vector<20x8x128xi32>
    %6 = arith.sitofp %5 : vector<20x8x128xi32> to vector<20x8x128xf32>
    %7 = arith.truncf %6 : vector<20x8x128xf32> to vector<20x8x128xbf16>
    %8 = vector.shape_cast %7 : vector<20x8x128xbf16> to vector<160x128xbf16>
    %c0_1 = arith.constant 0 : index
    %c0_2 = arith.constant 0 : index
    %9 = vector.load %arg3[%c0_1, %c0_2] : memref<128x512xbf16, #tpu.memory_space<vmem>>, vector<128x512xbf16>
    %cst = arith.constant dense<0.000000e+00> : vector<160x512xf32>
    %10 = tpu.matmul %8, %9, %cst {dimension_numbers = #tpu.dot_dimension_numbers<[1], [0], [0], [1], [0, 0, 1, 1], [], []>} : vector<160x128xbf16>, vector<128x512xbf16>, vector<160x512xf32> -> vector<160x512xf32>
    %11 = vector.shape_cast %10 : vector<160x512xf32> to vector<20x8x512xf32>
    %12 = arith.truncf %11 : vector<20x8x512xf32> to vector<20x8x512xbf16>
    %c0_3 = arith.constant 0 : index
    %c0_4 = arith.constant 0 : index
    %c0_5 = arith.constant 0 : index
    %13 = vector.load %arg8[%c0_3, %c0_4, %c0_5] : memref<20x8x512xbf16, #tpu.memory_space<vmem>>, vector<20x8x512xbf16>
    tpu.vector_store %arg8[%c0_3, %c0_4, %c0_5], %12 {strides = array<i32>} : memref<20x8x512xbf16, #tpu.memory_space<vmem>>, vector<20x8x512xbf16>,
    %c0_6 = arith.constant 0 : index
    %c0_7 = arith.constant 0 : index
    %14 = vector.load %arg2[%c0_6, %c0_7] : memref<8x1xi32, #tpu.memory_space<vmem>>, vector<8x1xi32>
    %15 = vector.shape_cast %14 : vector<8x1xi32> to vector<8x1xi32>
    %16 = vector.broadcast %15 : vector<8x1xi32> to vector<8x128xi32>
    %c0_8 = arith.constant 0 : index
    %c0_9 = arith.constant 0 : index
    %17 = vector.load %arg4[%c0_8, %c0_9] : memref<128x512xbf16, #tpu.memory_space<vmem>>, vector<128x512xbf16>
    %cst_10 = arith.constant 0.000000e+00 : f32
    %18 = vector.broadcast %cst_10 : f32 to vector<8x128xf32>
    %c0_i32 = arith.constant 0 : i32
    %19 = arith.index_cast %c0_i32 : i32 to index
    %c0_11 = arith.constant 0 : index
    %c0_12 = arith.constant 0 : index
    %20 = vector.load %arg8[%19, %c0_11, %c0_12] : memref<20x8x512xbf16, #tpu.memory_space<vmem>>, vector<1x8x512xbf16>
    %21 = vector.shape_cast %20 : vector<1x8x512xbf16> to vector<8x512xbf16>
    %22 = arith.extf %21 : vector<8x512xbf16> to vector<8x512xf32>
    %23 = arith.truncf %18 : vector<8x128xf32> to vector<8x128xbf16>
    %cst_13 = arith.constant dense<0.000000e+00> : vector<8x512xf32>
    %24 = tpu.matmul %23, %17, %cst_13 {dimension_numbers = #tpu.dot_dimension_numbers<[1], [0], [0], [1], [0, 0, 1, 1], [], []>} : vector<8x128xbf16>, vector<128x512xbf16>, vector<8x512xf32> -> vector<8x512xf32>
    %25 = arith.addf %22, %24 : vector<8x512xf32>
    %26 = vector.extract_strided_slice %25 {offsets = [0, 0], sizes = [8, 128], strides = [1, 1]} : vector<8x512xf32> to vector<8x128xf32>
    %27 = arith.negf %26 : vector<8x128xf32>
    %28 = math.exp %27 : vector<8x128xf32>
    %cst_14 = arith.constant 1.000000e+00 : f32
    %29 = vector.broadcast %cst_14 : f32 to vector<8x128xf32>
    %30 = arith.addf %29, %28 : vector<8x128xf32>
    %31 = arith.divf %29, %30 : vector<8x128xf32>
    %32 = vector.extract_strided_slice %25 {offsets = [0, 128], sizes = [8, 128], strides = [1, 1]} : vector<8x512xf32> to vector<8x128xf32>
    %33 = arith.negf %32 : vector<8x128xf32>
    %34 = math.exp %33 : vector<8x128xf32>
    %cst_15 = arith.constant 1.000000e+00 : f32
    %35 = vector.broadcast %cst_15 : f32 to vector<8x128xf32>
    %36 = arith.addf %35, %34 : vector<8x128xf32>
    %37 = arith.divf %35, %36 : vector<8x128xf32>
    %38 = vector.extract_strided_slice %25 {offsets = [0, 256], sizes = [8, 128], strides = [1, 1]} : vector<8x512xf32> to vector<8x128xf32>
    %39 = math.tanh %38 : vector<8x128xf32>
    %40 = vector.extract_strided_slice %25 {offsets = [0, 384], sizes = [8, 128], strides = [1, 1]} : vector<8x512xf32> to vector<8x128xf32>
    %41 = arith.negf %40 : vector<8x128xf32>
    %42 = math.exp %41 : vector<8x128xf32>
    %cst_16 = arith.constant 1.000000e+00 : f32
    %43 = vector.broadcast %cst_16 : f32 to vector<8x128xf32>
    %44 = arith.addf %43, %42 : vector<8x128xf32>
    %45 = arith.divf %43, %44 : vector<8x128xf32>
    %46 = arith.mulf %37, %18 : vector<8x128xf32>
    %47 = arith.mulf %31, %39 : vector<8x128xf32>
    %48 = arith.addf %46, %47 : vector<8x128xf32>
    %49 = math.tanh %48 : vector<8x128xf32>
    %50 = arith.mulf %45, %49 : vector<8x128xf32>
    %51 = vector.broadcast %c0_i32 : i32 to vector<8x128xi32>
    %52 = arith.cmpi eq, %16, %51 : vector<8x128xi32>
    %53 = arith.select %52, %50, %18 : vector<8x128xi1>, vector<8x128xf32>
    %c1_i32 = arith.constant 1 : i32
    %54 = arith.index_cast %c1_i32 : i32 to index
    %c0_17 = arith.constant 0 : index
    %c0_18 = arith.constant 0 : index
    %55 = vector.load %arg8[%54, %c0_17, %c0_18] : memref<20x8x512xbf16, #tpu.memory_space<vmem>>, vector<1x8x512xbf16>
    %56 = vector.shape_cast %55 : vector<1x8x512xbf16> to vector<8x512xbf16>
    %57 = arith.extf %56 : vector<8x512xbf16> to vector<8x512xf32>
    %58 = arith.truncf %50 : vector<8x128xf32> to vector<8x128xbf16>
    %cst_19 = arith.constant dense<0.000000e+00> : vector<8x512xf32>
    %59 = tpu.matmul %58, %17, %cst_19 {dimension_numbers = #tpu.dot_dimension_numbers<[1], [0], [0], [1], [0, 0, 1, 1], [], []>} : vector<8x128xbf16>, vector<128x512xbf16>, vector<8x512xf32> -> vector<8x512xf32>
    %60 = arith.addf %57, %59 : vector<8x512xf32>
    %61 = vector.extract_strided_slice %60 {offsets = [0, 0], sizes = [8, 128], strides = [1, 1]} : vector<8x512xf32> to vector<8x128xf32>
    %62 = arith.negf %61 : vector<8x128xf32>
    %63 = math.exp %62 : vector<8x128xf32>
    %cst_20 = arith.constant 1.000000e+00 : f32
    %64 = vector.broadcast %cst_20 : f32 to vector<8x128xf32>
    %65 = arith.addf %64, %63 : vector<8x128xf32>
    %66 = arith.divf %64, %65 : vector<8x128xf32>
    %67 = vector.extract_strided_slice %60 {offsets = [0, 128], sizes = [8, 128], strides = [1, 1]} : vector<8x512xf32> to vector<8x128xf32>
    %68 = arith.negf %67 : vector<8x128xf32>
    %69 = math.exp %68 : vector<8x128xf32>
    %cst_21 = arith.constant 1.000000e+00 : f32
    %70 = vector.broadcast %cst_21 : f32 to vector<8x128xf32>
    %71 = arith.addf %70, %69 : vector<8x128xf32>
    %72 = arith.divf %70, %71 : vector<8x128xf32>
    %73 = vector.extract_strided_slice %60 {offsets = [0, 256], sizes = [8, 128], strides = [1, 1]} : vector<8x512xf32> to vector<8x128xf32>
    %74 = math.tanh %73 : vector<8x128xf32>
    %75 = vector.extract_strided_slice %60 {offsets = [0, 384], sizes = [8, 128], strides = [1, 1]} : vector<8x512xf32> to vector<8x128xf32>
    %76 = arith.negf %75 : vector<8x128xf32>
    %77 = math.exp %76 : vector<8x128xf32>
    %cst_22 = arith.constant 1.000000e+00 : f32
    %78 = vector.broadcast %cst_22 : f32 to vector<8x128xf32>
    %79 = arith.addf %78, %77 : vector<8x128xf32>
    %80 = arith.divf %78, %79 : vector<8x128xf32>
    %81 = arith.mulf %72, %48 : vector<8x128xf32>
    %82 = arith.mulf %66, %74 : vector<8x128xf32>
    %83 = arith.addf %81, %82 : vector<8x128xf32>
    %84 = math.tanh %83 : vector<8x128xf32>
    %85 = arith.mulf %80, %84 : vector<8x128xf32>
    %86 = vector.broadcast %c1_i32 : i32 to vector<8x128xi32>
    %87 = arith.cmpi eq, %16, %86 : vector<8x128xi32>
    %88 = arith.select %87, %85, %53 : vector<8x128xi1>, vector<8x128xf32>
    %c2_i32 = arith.constant 2 : i32
    %89 = arith.index_cast %c2_i32 : i32 to index
    %c0_23 = arith.constant 0 : index
    %c0_24 = arith.constant 0 : index
    %90 = vector.load %arg8[%89, %c0_23, %c0_24] : memref<20x8x512xbf16, #tpu.memory_space<vmem>>, vector<1x8x512xbf16>
    %91 = vector.shape_cast %90 : vector<1x8x512xbf16> to vector<8x512xbf16>
    %92 = arith.extf %91 : vector<8x512xbf16> to vector<8x512xf32>
    %93 = arith.truncf %85 : vector<8x128xf32> to vector<8x128xbf16>
    %cst_25 = arith.constant dense<0.000000e+00> : vector<8x512xf32>
    %94 = tpu.matmul %93, %17, %cst_25 {dimension_numbers = #tpu.dot_dimension_numbers<[1], [0], [0], [1], [0, 0, 1, 1], [], []>} : vector<8x128xbf16>, vector<128x512xbf16>, vector<8x512xf32> -> vector<8x512xf32>
    %95 = arith.addf %92, %94 : vector<8x512xf32>
    %96 = vector.extract_strided_slice %95 {offsets = [0, 0], sizes = [8, 128], strides = [1, 1]} : vector<8x512xf32> to vector<8x128xf32>
    %97 = arith.negf %96 : vector<8x128xf32>
    %98 = math.exp %97 : vector<8x128xf32>
    %cst_26 = arith.constant 1.000000e+00 : f32
    %99 = vector.broadcast %cst_26 : f32 to vector<8x128xf32>
    %100 = arith.addf %99, %98 : vector<8x128xf32>
    %101 = arith.divf %99, %100 : vector<8x128xf32>
    %102 = vector.extract_strided_slice %95 {offsets = [0, 128], sizes = [8, 128], strides = [1, 1]} : vector<8x512xf32> to vector<8x128xf32>
    %103 = arith.negf %102 : vector<8x128xf32>
    %104 = math.exp %103 : vector<8x128xf32>
    %cst_27 = arith.constant 1.000000e+00 : f32
    %105 = vector.broadcast %cst_27 : f32 to vector<8x128xf32>
    %106 = arith.addf %105, %104 : vector<8x128xf32>
    %107 = arith.divf %105, %106 : vector<8x128xf32>
    %108 = vector.extract_strided_slice %95 {offsets = [0, 256], sizes = [8, 128], strides = [1, 1]} : vector<8x512xf32> to vector<8x128xf32>
    %109 = math.tanh %108 : vector<8x128xf32>
    %110 = vector.extract_strided_slice %95 {offsets = [0, 384], sizes = [8, 128], strides = [1, 1]} : vector<8x512xf32> to vector<8x128xf32>
    %111 = arith.negf %110 : vector<8x128xf32>
    %112 = math.exp %111 : vector<8x128xf32>
    %cst_28 = arith.constant 1.000000e+00 : f32
    %113 = vector.broadcast %cst_28 : f32 to vector<8x128xf32>
    %114 = arith.addf %113, %112 : vector<8x128xf32>
    %115 = arith.divf %113, %114 : vector<8x128xf32>
    %116 = arith.mulf %107, %83 : vector<8x128xf32>
    %117 = arith.mulf %101, %109 : vector<8x128xf32>
    %118 = arith.addf %116, %117 : vector<8x128xf32>
    %119 = math.tanh %118 : vector<8x128xf32>
    %120 = arith.mulf %115, %119 : vector<8x128xf32>
    %121 = vector.broadcast %c2_i32 : i32 to vector<8x128xi32>
    %122 = arith.cmpi eq, %16, %121 : vector<8x128xi32>
    %123 = arith.select %122, %120, %88 : vector<8x128xi1>, vector<8x128xf32>
    %c3_i32 = arith.constant 3 : i32
    %124 = arith.index_cast %c3_i32 : i32 to index
    %c0_29 = arith.constant 0 : index
    %c0_30 = arith.constant 0 : index
    %125 = vector.load %arg8[%124, %c0_29, %c0_30] : memref<20x8x512xbf16, #tpu.memory_space<vmem>>, vector<1x8x512xbf16>
    %126 = vector.shape_cast %125 : vector<1x8x512xbf16> to vector<8x512xbf16>
    %127 = arith.extf %126 : vector<8x512xbf16> to vector<8x512xf32>
    %128 = arith.truncf %120 : vector<8x128xf32> to vector<8x128xbf16>
    %cst_31 = arith.constant dense<0.000000e+00> : vector<8x512xf32>
    %129 = tpu.matmul %128, %17, %cst_31 {dimension_numbers = #tpu.dot_dimension_numbers<[1], [0], [0], [1], [0, 0, 1, 1], [], []>} : vector<8x128xbf16>, vector<128x512xbf16>, vector<8x512xf32> -> vector<8x512xf32>
    %130 = arith.addf %127, %129 : vector<8x512xf32>
    %131 = vector.extract_strided_slice %130 {offsets = [0, 0], sizes = [8, 128], strides = [1, 1]} : vector<8x512xf32> to vector<8x128xf32>
    %132 = arith.negf %131 : vector<8x128xf32>
    %133 = math.exp %132 : vector<8x128xf32>
    %cst_32 = arith.constant 1.000000e+00 : f32
    %134 = vector.broadcast %cst_32 : f32 to vector<8x128xf32>
    %135 = arith.addf %134, %133 : vector<8x128xf32>
    %136 = arith.divf %134, %135 : vector<8x128xf32>
    %137 = vector.extract_strided_slice %130 {offsets = [0, 128], sizes = [8, 128], strides = [1, 1]} : vector<8x512xf32> to vector<8x128xf32>
    %138 = arith.negf %137 : vector<8x128xf32>
    %139 = math.exp %138 : vector<8x128xf32>
    %cst_33 = arith.constant 1.000000e+00 : f32
    %140 = vector.broadcast %cst_33 : f32 to vector<8x128xf32>
    %141 = arith.addf %140, %139 : vector<8x128xf32>
    %142 = arith.divf %140, %141 : vector<8x128xf32>
    %143 = vector.extract_strided_slice %130 {offsets = [0, 256], sizes = [8, 128], strides = [1, 1]} : vector<8x512xf32> to vector<8x128xf32>
    %144 = math.tanh %143 : vector<8x128xf32>
    %145 = vector.extract_strided_slice %130 {offsets = [0, 384], sizes = [8, 128], strides = [1, 1]} : vector<8x512xf32> to vector<8x128xf32>
    %146 = arith.negf %145 : vector<8x128xf32>
    %147 = math.exp %146 : vector<8x128xf32>
    %cst_34 = arith.constant 1.000000e+00 : f32
    %148 = vector.broadcast %cst_34 : f32 to vector<8x128xf32>
    %149 = arith.addf %148, %147 : vector<8x128xf32>
    %150 = arith.divf %148, %149 : vector<8x128xf32>
    %151 = arith.mulf %142, %118 : vector<8x128xf32>
    %152 = arith.mulf %136, %144 : vector<8x128xf32>
    %153 = arith.addf %151, %152 : vector<8x128xf32>
    %154 = math.tanh %153 : vector<8x128xf32>
    %155 = arith.mulf %150, %154 : vector<8x128xf32>
    %156 = vector.broadcast %c3_i32 : i32 to vector<8x128xi32>
    %157 = arith.cmpi eq, %16, %156 : vector<8x128xi32>
    %158 = arith.select %157, %155, %123 : vector<8x128xi1>, vector<8x128xf32>
    %c4_i32 = arith.constant 4 : i32
    %159 = arith.index_cast %c4_i32 : i32 to index
    %c0_35 = arith.constant 0 : index
    %c0_36 = arith.constant 0 : index
    %160 = vector.load %arg8[%159, %c0_35, %c0_36] : memref<20x8x512xbf16, #tpu.memory_space<vmem>>, vector<1x8x512xbf16>
    %161 = vector.shape_cast %160 : vector<1x8x512xbf16> to vector<8x512xbf16>
    %162 = arith.extf %161 : vector<8x512xbf16> to vector<8x512xf32>
    %163 = arith.truncf %155 : vector<8x128xf32> to vector<8x128xbf16>
    %cst_37 = arith.constant dense<0.000000e+00> : vector<8x512xf32>
    %164 = tpu.matmul %163, %17, %cst_37 {dimension_numbers = #tpu.dot_dimension_numbers<[1], [0], [0], [1], [0, 0, 1, 1], [], []>} : vector<8x128xbf16>, vector<128x512xbf16>, vector<8x512xf32> -> vector<8x512xf32>
    %165 = arith.addf %162, %164 : vector<8x512xf32>
    %166 = vector.extract_strided_slice %165 {offsets = [0, 0], sizes = [8, 128], strides = [1, 1]} : vector<8x512xf32> to vector<8x128xf32>
    %167 = arith.negf %166 : vector<8x128xf32>
    %168 = math.exp %167 : vector<8x128xf32>
    %cst_38 = arith.constant 1.000000e+00 : f32
    %169 = vector.broadcast %cst_38 : f32 to vector<8x128xf32>
    %170 = arith.addf %169, %168 : vector<8x128xf32>
    %171 = arith.divf %169, %170 : vector<8x128xf32>
    %172 = vector.extract_strided_slice %165 {offsets = [0, 128], sizes = [8, 128], strides = [1, 1]} : vector<8x512xf32> to vector<8x128xf32>
    %173 = arith.negf %172 : vector<8x128xf32>
    %174 = math.exp %173 : vector<8x128xf32>
    %cst_39 = arith.constant 1.000000e+00 : f32
    %175 = vector.broadcast %cst_39 : f32 to vector<8x128xf32>
    %176 = arith.addf %175, %174 : vector<8x128xf32>
    %177 = arith.divf %175, %176 : vector<8x128xf32>
    %178 = vector.extract_strided_slice %165 {offsets = [0, 256], sizes = [8, 128], strides = [1, 1]} : vector<8x512xf32> to vector<8x128xf32>
    %179 = math.tanh %178 : vector<8x128xf32>
    %180 = vector.extract_strided_slice %165 {offsets = [0, 384], sizes = [8, 128], strides = [1, 1]} : vector<8x512xf32> to vector<8x128xf32>
    %181 = arith.negf %180 : vector<8x128xf32>
    %182 = math.exp %181 : vector<8x128xf32>
    %cst_40 = arith.constant 1.000000e+00 : f32
    %183 = vector.broadcast %cst_40 : f32 to vector<8x128xf32>
    %184 = arith.addf %183, %182 : vector<8x128xf32>
    %185 = arith.divf %183, %184 : vector<8x128xf32>
    %186 = arith.mulf %177, %153 : vector<8x128xf32>
    %187 = arith.mulf %171, %179 : vector<8x128xf32>
    %188 = arith.addf %186, %187 : vector<8x128xf32>
    %189 = math.tanh %188 : vector<8x128xf32>
    %190 = arith.mulf %185, %189 : vector<8x128xf32>
    %191 = vector.broadcast %c4_i32 : i32 to vector<8x128xi32>
    %192 = arith.cmpi eq, %16, %191 : vector<8x128xi32>
    %193 = arith.select %192, %190, %158 : vector<8x128xi1>, vector<8x128xf32>
    %c5_i32 = arith.constant 5 : i32
    %194 = arith.index_cast %c5_i32 : i32 to index
    %c0_41 = arith.constant 0 : index
    %c0_42 = arith.constant 0 : index
    %195 = vector.load %arg8[%194, %c0_41, %c0_42] : memref<20x8x512xbf16, #tpu.memory_space<vmem>>, vector<1x8x512xbf16>
    %196 = vector.shape_cast %195 : vector<1x8x512xbf16> to vector<8x512xbf16>
    %197 = arith.extf %196 : vector<8x512xbf16> to vector<8x512xf32>
    %198 = arith.truncf %190 : vector<8x128xf32> to vector<8x128xbf16>
    %cst_43 = arith.constant dense<0.000000e+00> : vector<8x512xf32>
    %199 = tpu.matmul %198, %17, %cst_43 {dimension_numbers = #tpu.dot_dimension_numbers<[1], [0], [0], [1], [0, 0, 1, 1], [], []>} : vector<8x128xbf16>, vector<128x512xbf16>, vector<8x512xf32> -> vector<8x512xf32>
    %200 = arith.addf %197, %199 : vector<8x512xf32>
    %201 = vector.extract_strided_slice %200 {offsets = [0, 0], sizes = [8, 128], strides = [1, 1]} : vector<8x512xf32> to vector<8x128xf32>
    %202 = arith.negf %201 : vector<8x128xf32>
    %203 = math.exp %202 : vector<8x128xf32>
    %cst_44 = arith.constant 1.000000e+00 : f32
    %204 = vector.broadcast %cst_44 : f32 to vector<8x128xf32>
    %205 = arith.addf %204, %203 : vector<8x128xf32>
    %206 = arith.divf %204, %205 : vector<8x128xf32>
    %207 = vector.extract_strided_slice %200 {offsets = [0, 128], sizes = [8, 128], strides = [1, 1]} : vector<8x512xf32> to vector<8x128xf32>
    %208 = arith.negf %207 : vector<8x128xf32>
    %209 = math.exp %208 : vector<8x128xf32>
    %cst_45 = arith.constant 1.000000e+00 : f32
    %210 = vector.broadcast %cst_45 : f32 to vector<8x128xf32>
    %211 = arith.addf %210, %209 : vector<8x128xf32>
    %212 = arith.divf %210, %211 : vector<8x128xf32>
    %213 = vector.extract_strided_slice %200 {offsets = [0, 256], sizes = [8, 128], strides = [1, 1]} : vector<8x512xf32> to vector<8x128xf32>
    %214 = math.tanh %213 : vector<8x128xf32>
    %215 = vector.extract_strided_slice %200 {offsets = [0, 384], sizes = [8, 128], strides = [1, 1]} : vector<8x512xf32> to vector<8x128xf32>
    %216 = arith.negf %215 : vector<8x128xf32>
    %217 = math.exp %216 : vector<8x128xf32>
    %cst_46 = arith.constant 1.000000e+00 : f32
    %218 = vector.broadcast %cst_46 : f32 to vector<8x128xf32>
    %219 = arith.addf %218, %217 : vector<8x128xf32>
    %220 = arith.divf %218, %219 : vector<8x128xf32>
    %221 = arith.mulf %212, %188 : vector<8x128xf32>
    %222 = arith.mulf %206, %214 : vector<8x128xf32>
    %223 = arith.addf %221, %222 : vector<8x128xf32>
    %224 = math.tanh %223 : vector<8x128xf32>
    %225 = arith.mulf %220, %224 : vector<8x128xf32>
    %226 = vector.broadcast %c5_i32 : i32 to vector<8x128xi32>
    %227 = arith.cmpi eq, %16, %226 : vector<8x128xi32>
    %228 = arith.select %227, %225, %193 : vector<8x128xi1>, vector<8x128xf32>
    %c6_i32 = arith.constant 6 : i32
    %229 = arith.index_cast %c6_i32 : i32 to index
    %c0_47 = arith.constant 0 : index
    %c0_48 = arith.constant 0 : index
    %230 = vector.load %arg8[%229, %c0_47, %c0_48] : memref<20x8x512xbf16, #tpu.memory_space<vmem>>, vector<1x8x512xbf16>
    %231 = vector.shape_cast %230 : vector<1x8x512xbf16> to vector<8x512xbf16>
    %232 = arith.extf %231 : vector<8x512xbf16> to vector<8x512xf32>
    %233 = arith.truncf %225 : vector<8x128xf32> to vector<8x128xbf16>
    %cst_49 = arith.constant dense<0.000000e+00> : vector<8x512xf32>
    %234 = tpu.matmul %233, %17, %cst_49 {dimension_numbers = #tpu.dot_dimension_numbers<[1], [0], [0], [1], [0, 0, 1, 1], [], []>} : vector<8x128xbf16>, vector<128x512xbf16>, vector<8x512xf32> -> vector<8x512xf32>
    %235 = arith.addf %232, %234 : vector<8x512xf32>
    %236 = vector.extract_strided_slice %235 {offsets = [0, 0], sizes = [8, 128], strides = [1, 1]} : vector<8x512xf32> to vector<8x128xf32>
    %237 = arith.negf %236 : vector<8x128xf32>
    %238 = math.exp %237 : vector<8x128xf32>
    %cst_50 = arith.constant 1.000000e+00 : f32
    %239 = vector.broadcast %cst_50 : f32 to vector<8x128xf32>
    %240 = arith.addf %239, %238 : vector<8x128xf32>
    %241 = arith.divf %239, %240 : vector<8x128xf32>
    %242 = vector.extract_strided_slice %235 {offsets = [0, 128], sizes = [8, 128], strides = [1, 1]} : vector<8x512xf32> to vector<8x128xf32>
    %243 = arith.negf %242 : vector<8x128xf32>
    %244 = math.exp %243 : vector<8x128xf32>
    %cst_51 = arith.constant 1.000000e+00 : f32
    %245 = vector.broadcast %cst_51 : f32 to vector<8x128xf32>
    %246 = arith.addf %245, %244 : vector<8x128xf32>
    %247 = arith.divf %245, %246 : vector<8x128xf32>
    %248 = vector.extract_strided_slice %235 {offsets = [0, 256], sizes = [8, 128], strides = [1, 1]} : vector<8x512xf32> to vector<8x128xf32>
    %249 = math.tanh %248 : vector<8x128xf32>
    %250 = vector.extract_strided_slice %235 {offsets = [0, 384], sizes = [8, 128], strides = [1, 1]} : vector<8x512xf32> to vector<8x128xf32>
    %251 = arith.negf %250 : vector<8x128xf32>
    %252 = math.exp %251 : vector<8x128xf32>
    %cst_52 = arith.constant 1.000000e+00 : f32
    %253 = vector.broadcast %cst_52 : f32 to vector<8x128xf32>
    %254 = arith.addf %253, %252 : vector<8x128xf32>
    %255 = arith.divf %253, %254 : vector<8x128xf32>
    %256 = arith.mulf %247, %223 : vector<8x128xf32>
    %257 = arith.mulf %241, %249 : vector<8x128xf32>
    %258 = arith.addf %256, %257 : vector<8x128xf32>
    %259 = math.tanh %258 : vector<8x128xf32>
    %260 = arith.mulf %255, %259 : vector<8x128xf32>
    %261 = vector.broadcast %c6_i32 : i32 to vector<8x128xi32>
    %262 = arith.cmpi eq, %16, %261 : vector<8x128xi32>
    %263 = arith.select %262, %260, %228 : vector<8x128xi1>, vector<8x128xf32>
    %c7_i32 = arith.constant 7 : i32
    %264 = arith.index_cast %c7_i32 : i32 to index
    %c0_53 = arith.constant 0 : index
    %c0_54 = arith.constant 0 : index
    %265 = vector.load %arg8[%264, %c0_53, %c0_54] : memref<20x8x512xbf16, #tpu.memory_space<vmem>>, vector<1x8x512xbf16>
    %266 = vector.shape_cast %265 : vector<1x8x512xbf16> to vector<8x512xbf16>
    %267 = arith.extf %266 : vector<8x512xbf16> to vector<8x512xf32>
    %268 = arith.truncf %260 : vector<8x128xf32> to vector<8x128xbf16>
    %cst_55 = arith.constant dense<0.000000e+00> : vector<8x512xf32>
    %269 = tpu.matmul %268, %17, %cst_55 {dimension_numbers = #tpu.dot_dimension_numbers<[1], [0], [0], [1], [0, 0, 1, 1], [], []>} : vector<8x128xbf16>, vector<128x512xbf16>, vector<8x512xf32> -> vector<8x512xf32>
    %270 = arith.addf %267, %269 : vector<8x512xf32>
    %271 = vector.extract_strided_slice %270 {offsets = [0, 0], sizes = [8, 128], strides = [1, 1]} : vector<8x512xf32> to vector<8x128xf32>
    %272 = arith.negf %271 : vector<8x128xf32>
    %273 = math.exp %272 : vector<8x128xf32>
    %cst_56 = arith.constant 1.000000e+00 : f32
    %274 = vector.broadcast %cst_56 : f32 to vector<8x128xf32>
    %275 = arith.addf %274, %273 : vector<8x128xf32>
    %276 = arith.divf %274, %275 : vector<8x128xf32>
    %277 = vector.extract_strided_slice %270 {offsets = [0, 128], sizes = [8, 128], strides = [1, 1]} : vector<8x512xf32> to vector<8x128xf32>
    %278 = arith.negf %277 : vector<8x128xf32>
    %279 = math.exp %278 : vector<8x128xf32>
    %cst_57 = arith.constant 1.000000e+00 : f32
    %280 = vector.broadcast %cst_57 : f32 to vector<8x128xf32>
    %281 = arith.addf %280, %279 : vector<8x128xf32>
    %282 = arith.divf %280, %281 : vector<8x128xf32>
    %283 = vector.extract_strided_slice %270 {offsets = [0, 256], sizes = [8, 128], strides = [1, 1]} : vector<8x512xf32> to vector<8x128xf32>
    %284 = math.tanh %283 : vector<8x128xf32>
    %285 = vector.extract_strided_slice %270 {offsets = [0, 384], sizes = [8, 128], strides = [1, 1]} : vector<8x512xf32> to vector<8x128xf32>
    %286 = arith.negf %285 : vector<8x128xf32>
    %287 = math.exp %286 : vector<8x128xf32>
    %cst_58 = arith.constant 1.000000e+00 : f32
    %288 = vector.broadcast %cst_58 : f32 to vector<8x128xf32>
    %289 = arith.addf %288, %287 : vector<8x128xf32>
    %290 = arith.divf %288, %289 : vector<8x128xf32>
    %291 = arith.mulf %282, %258 : vector<8x128xf32>
    %292 = arith.mulf %276, %284 : vector<8x128xf32>
    %293 = arith.addf %291, %292 : vector<8x128xf32>
    %294 = math.tanh %293 : vector<8x128xf32>
    %295 = arith.mulf %290, %294 : vector<8x128xf32>
    %296 = vector.broadcast %c7_i32 : i32 to vector<8x128xi32>
    %297 = arith.cmpi eq, %16, %296 : vector<8x128xi32>
    %298 = arith.select %297, %295, %263 : vector<8x128xi1>, vector<8x128xf32>
    %c8_i32 = arith.constant 8 : i32
    %299 = arith.index_cast %c8_i32 : i32 to index
    %c0_59 = arith.constant 0 : index
    %c0_60 = arith.constant 0 : index
    %300 = vector.load %arg8[%299, %c0_59, %c0_60] : memref<20x8x512xbf16, #tpu.memory_space<vmem>>, vector<1x8x512xbf16>
    %301 = vector.shape_cast %300 : vector<1x8x512xbf16> to vector<8x512xbf16>
    %302 = arith.extf %301 : vector<8x512xbf16> to vector<8x512xf32>
    %303 = arith.truncf %295 : vector<8x128xf32> to vector<8x128xbf16>
    %cst_61 = arith.constant dense<0.000000e+00> : vector<8x512xf32>
    %304 = tpu.matmul %303, %17, %cst_61 {dimension_numbers = #tpu.dot_dimension_numbers<[1], [0], [0], [1], [0, 0, 1, 1], [], []>} : vector<8x128xbf16>, vector<128x512xbf16>, vector<8x512xf32> -> vector<8x512xf32>
    %305 = arith.addf %302, %304 : vector<8x512xf32>
    %306 = vector.extract_strided_slice %305 {offsets = [0, 0], sizes = [8, 128], strides = [1, 1]} : vector<8x512xf32> to vector<8x128xf32>
    %307 = arith.negf %306 : vector<8x128xf32>
    %308 = math.exp %307 : vector<8x128xf32>
    %cst_62 = arith.constant 1.000000e+00 : f32
    %309 = vector.broadcast %cst_62 : f32 to vector<8x128xf32>
    %310 = arith.addf %309, %308 : vector<8x128xf32>
    %311 = arith.divf %309, %310 : vector<8x128xf32>
    %312 = vector.extract_strided_slice %305 {offsets = [0, 128], sizes = [8, 128], strides = [1, 1]} : vector<8x512xf32> to vector<8x128xf32>
    %313 = arith.negf %312 : vector<8x128xf32>
    %314 = math.exp %313 : vector<8x128xf32>
    %cst_63 = arith.constant 1.000000e+00 : f32
    %315 = vector.broadcast %cst_63 : f32 to vector<8x128xf32>
    %316 = arith.addf %315, %314 : vector<8x128xf32>
    %317 = arith.divf %315, %316 : vector<8x128xf32>
    %318 = vector.extract_strided_slice %305 {offsets = [0, 256], sizes = [8, 128], strides = [1, 1]} : vector<8x512xf32> to vector<8x128xf32>
    %319 = math.tanh %318 : vector<8x128xf32>
    %320 = vector.extract_strided_slice %305 {offsets = [0, 384], sizes = [8, 128], strides = [1, 1]} : vector<8x512xf32> to vector<8x128xf32>
    %321 = arith.negf %320 : vector<8x128xf32>
    %322 = math.exp %321 : vector<8x128xf32>
    %cst_64 = arith.constant 1.000000e+00 : f32
    %323 = vector.broadcast %cst_64 : f32 to vector<8x128xf32>
    %324 = arith.addf %323, %322 : vector<8x128xf32>
    %325 = arith.divf %323, %324 : vector<8x128xf32>
    %326 = arith.mulf %317, %293 : vector<8x128xf32>
    %327 = arith.mulf %311, %319 : vector<8x128xf32>
    %328 = arith.addf %326, %327 : vector<8x128xf32>
    %329 = math.tanh %328 : vector<8x128xf32>
    %330 = arith.mulf %325, %329 : vector<8x128xf32>
    %331 = vector.broadcast %c8_i32 : i32 to vector<8x128xi32>
    %332 = arith.cmpi eq, %16, %331 : vector<8x128xi32>
    %333 = arith.select %332, %330, %298 : vector<8x128xi1>, vector<8x128xf32>
    %c9_i32 = arith.constant 9 : i32
    %334 = arith.index_cast %c9_i32 : i32 to index
    %c0_65 = arith.constant 0 : index
    %c0_66 = arith.constant 0 : index
    %335 = vector.load %arg8[%334, %c0_65, %c0_66] : memref<20x8x512xbf16, #tpu.memory_space<vmem>>, vector<1x8x512xbf16>
    %336 = vector.shape_cast %335 : vector<1x8x512xbf16> to vector<8x512xbf16>
    %337 = arith.extf %336 : vector<8x512xbf16> to vector<8x512xf32>
    %338 = arith.truncf %330 : vector<8x128xf32> to vector<8x128xbf16>
    %cst_67 = arith.constant dense<0.000000e+00> : vector<8x512xf32>
    %339 = tpu.matmul %338, %17, %cst_67 {dimension_numbers = #tpu.dot_dimension_numbers<[1], [0], [0], [1], [0, 0, 1, 1], [], []>} : vector<8x128xbf16>, vector<128x512xbf16>, vector<8x512xf32> -> vector<8x512xf32>
    %340 = arith.addf %337, %339 : vector<8x512xf32>
    %341 = vector.extract_strided_slice %340 {offsets = [0, 0], sizes = [8, 128], strides = [1, 1]} : vector<8x512xf32> to vector<8x128xf32>
    %342 = arith.negf %341 : vector<8x128xf32>
    %343 = math.exp %342 : vector<8x128xf32>
    %cst_68 = arith.constant 1.000000e+00 : f32
    %344 = vector.broadcast %cst_68 : f32 to vector<8x128xf32>
    %345 = arith.addf %344, %343 : vector<8x128xf32>
    %346 = arith.divf %344, %345 : vector<8x128xf32>
    %347 = vector.extract_strided_slice %340 {offsets = [0, 128], sizes = [8, 128], strides = [1, 1]} : vector<8x512xf32> to vector<8x128xf32>
    %348 = arith.negf %347 : vector<8x128xf32>
    %349 = math.exp %348 : vector<8x128xf32>
    %cst_69 = arith.constant 1.000000e+00 : f32
    %350 = vector.broadcast %cst_69 : f32 to vector<8x128xf32>
    %351 = arith.addf %350, %349 : vector<8x128xf32>
    %352 = arith.divf %350, %351 : vector<8x128xf32>
    %353 = vector.extract_strided_slice %340 {offsets = [0, 256], sizes = [8, 128], strides = [1, 1]} : vector<8x512xf32> to vector<8x128xf32>
    %354 = math.tanh %353 : vector<8x128xf32>
    %355 = vector.extract_strided_slice %340 {offsets = [0, 384], sizes = [8, 128], strides = [1, 1]} : vector<8x512xf32> to vector<8x128xf32>
    %356 = arith.negf %355 : vector<8x128xf32>
    %357 = math.exp %356 : vector<8x128xf32>
    %cst_70 = arith.constant 1.000000e+00 : f32
    %358 = vector.broadcast %cst_70 : f32 to vector<8x128xf32>
    %359 = arith.addf %358, %357 : vector<8x128xf32>
    %360 = arith.divf %358, %359 : vector<8x128xf32>
    %361 = arith.mulf %352, %328 : vector<8x128xf32>
    %362 = arith.mulf %346, %354 : vector<8x128xf32>
    %363 = arith.addf %361, %362 : vector<8x128xf32>
    %364 = math.tanh %363 : vector<8x128xf32>
    %365 = arith.mulf %360, %364 : vector<8x128xf32>
    %366 = vector.broadcast %c9_i32 : i32 to vector<8x128xi32>
    %367 = arith.cmpi eq, %16, %366 : vector<8x128xi32>
    %368 = arith.select %367, %365, %333 : vector<8x128xi1>, vector<8x128xf32>
    %c10_i32 = arith.constant 10 : i32
    %369 = arith.index_cast %c10_i32 : i32 to index
    %c0_71 = arith.constant 0 : index
    %c0_72 = arith.constant 0 : index
    %370 = vector.load %arg8[%369, %c0_71, %c0_72] : memref<20x8x512xbf16, #tpu.memory_space<vmem>>, vector<1x8x512xbf16>
    %371 = vector.shape_cast %370 : vector<1x8x512xbf16> to vector<8x512xbf16>
    %372 = arith.extf %371 : vector<8x512xbf16> to vector<8x512xf32>
    %373 = arith.truncf %365 : vector<8x128xf32> to vector<8x128xbf16>
    %cst_73 = arith.constant dense<0.000000e+00> : vector<8x512xf32>
    %374 = tpu.matmul %373, %17, %cst_73 {dimension_numbers = #tpu.dot_dimension_numbers<[1], [0], [0], [1], [0, 0, 1, 1], [], []>} : vector<8x128xbf16>, vector<128x512xbf16>, vector<8x512xf32> -> vector<8x512xf32>
    %375 = arith.addf %372, %374 : vector<8x512xf32>
    %376 = vector.extract_strided_slice %375 {offsets = [0, 0], sizes = [8, 128], strides = [1, 1]} : vector<8x512xf32> to vector<8x128xf32>
    %377 = arith.negf %376 : vector<8x128xf32>
    %378 = math.exp %377 : vector<8x128xf32>
    %cst_74 = arith.constant 1.000000e+00 : f32
    %379 = vector.broadcast %cst_74 : f32 to vector<8x128xf32>
    %380 = arith.addf %379, %378 : vector<8x128xf32>
    %381 = arith.divf %379, %380 : vector<8x128xf32>
    %382 = vector.extract_strided_slice %375 {offsets = [0, 128], sizes = [8, 128], strides = [1, 1]} : vector<8x512xf32> to vector<8x128xf32>
    %383 = arith.negf %382 : vector<8x128xf32>
    %384 = math.exp %383 : vector<8x128xf32>
    %cst_75 = arith.constant 1.000000e+00 : f32
    %385 = vector.broadcast %cst_75 : f32 to vector<8x128xf32>
    %386 = arith.addf %385, %384 : vector<8x128xf32>
    %387 = arith.divf %385, %386 : vector<8x128xf32>
    %388 = vector.extract_strided_slice %375 {offsets = [0, 256], sizes = [8, 128], strides = [1, 1]} : vector<8x512xf32> to vector<8x128xf32>
    %389 = math.tanh %388 : vector<8x128xf32>
    %390 = vector.extract_strided_slice %375 {offsets = [0, 384], sizes = [8, 128], strides = [1, 1]} : vector<8x512xf32> to vector<8x128xf32>
    %391 = arith.negf %390 : vector<8x128xf32>
    %392 = math.exp %391 : vector<8x128xf32>
    %cst_76 = arith.constant 1.000000e+00 : f32
    %393 = vector.broadcast %cst_76 : f32 to vector<8x128xf32>
    %394 = arith.addf %393, %392 : vector<8x128xf32>
    %395 = arith.divf %393, %394 : vector<8x128xf32>
    %396 = arith.mulf %387, %363 : vector<8x128xf32>
    %397 = arith.mulf %381, %389 : vector<8x128xf32>
    %398 = arith.addf %396, %397 : vector<8x128xf32>
    %399 = math.tanh %398 : vector<8x128xf32>
    %400 = arith.mulf %395, %399 : vector<8x128xf32>
    %401 = vector.broadcast %c10_i32 : i32 to vector<8x128xi32>
    %402 = arith.cmpi eq, %16, %401 : vector<8x128xi32>
    %403 = arith.select %402, %400, %368 : vector<8x128xi1>, vector<8x128xf32>
    %c11_i32 = arith.constant 11 : i32
    %404 = arith.index_cast %c11_i32 : i32 to index
    %c0_77 = arith.constant 0 : index
    %c0_78 = arith.constant 0 : index
    %405 = vector.load %arg8[%404, %c0_77, %c0_78] : memref<20x8x512xbf16, #tpu.memory_space<vmem>>, vector<1x8x512xbf16>
    %406 = vector.shape_cast %405 : vector<1x8x512xbf16> to vector<8x512xbf16>
    %407 = arith.extf %406 : vector<8x512xbf16> to vector<8x512xf32>
    %408 = arith.truncf %400 : vector<8x128xf32> to vector<8x128xbf16>
    %cst_79 = arith.constant dense<0.000000e+00> : vector<8x512xf32>
    %409 = tpu.matmul %408, %17, %cst_79 {dimension_numbers = #tpu.dot_dimension_numbers<[1], [0], [0], [1], [0, 0, 1, 1], [], []>} : vector<8x128xbf16>, vector<128x512xbf16>, vector<8x512xf32> -> vector<8x512xf32>
    %410 = arith.addf %407, %409 : vector<8x512xf32>
    %411 = vector.extract_strided_slice %410 {offsets = [0, 0], sizes = [8, 128], strides = [1, 1]} : vector<8x512xf32> to vector<8x128xf32>
    %412 = arith.negf %411 : vector<8x128xf32>
    %413 = math.exp %412 : vector<8x128xf32>
    %cst_80 = arith.constant 1.000000e+00 : f32
    %414 = vector.broadcast %cst_80 : f32 to vector<8x128xf32>
    %415 = arith.addf %414, %413 : vector<8x128xf32>
    %416 = arith.divf %414, %415 : vector<8x128xf32>
    %417 = vector.extract_strided_slice %410 {offsets = [0, 128], sizes = [8, 128], strides = [1, 1]} : vector<8x512xf32> to vector<8x128xf32>
    %418 = arith.negf %417 : vector<8x128xf32>
    %419 = math.exp %418 : vector<8x128xf32>
    %cst_81 = arith.constant 1.000000e+00 : f32
    %420 = vector.broadcast %cst_81 : f32 to vector<8x128xf32>
    %421 = arith.addf %420, %419 : vector<8x128xf32>
    %422 = arith.divf %420, %421 : vector<8x128xf32>
    %423 = vector.extract_strided_slice %410 {offsets = [0, 256], sizes = [8, 128], strides = [1, 1]} : vector<8x512xf32> to vector<8x128xf32>
    %424 = math.tanh %423 : vector<8x128xf32>
    %425 = vector.extract_strided_slice %410 {offsets = [0, 384], sizes = [8, 128], strides = [1, 1]} : vector<8x512xf32> to vector<8x128xf32>
    %426 = arith.negf %425 : vector<8x128xf32>
    %427 = math.exp %426 : vector<8x128xf32>
    %cst_82 = arith.constant 1.000000e+00 : f32
    %428 = vector.broadcast %cst_82 : f32 to vector<8x128xf32>
    %429 = arith.addf %428, %427 : vector<8x128xf32>
    %430 = arith.divf %428, %429 : vector<8x128xf32>
    %431 = arith.mulf %422, %398 : vector<8x128xf32>
    %432 = arith.mulf %416, %424 : vector<8x128xf32>
    %433 = arith.addf %431, %432 : vector<8x128xf32>
    %434 = math.tanh %433 : vector<8x128xf32>
    %435 = arith.mulf %430, %434 : vector<8x128xf32>
    %436 = vector.broadcast %c11_i32 : i32 to vector<8x128xi32>
    %437 = arith.cmpi eq, %16, %436 : vector<8x128xi32>
    %438 = arith.select %437, %435, %403 : vector<8x128xi1>, vector<8x128xf32>
    %c12_i32 = arith.constant 12 : i32
    %439 = arith.index_cast %c12_i32 : i32 to index
    %c0_83 = arith.constant 0 : index
    %c0_84 = arith.constant 0 : index
    %440 = vector.load %arg8[%439, %c0_83, %c0_84] : memref<20x8x512xbf16, #tpu.memory_space<vmem>>, vector<1x8x512xbf16>
    %441 = vector.shape_cast %440 : vector<1x8x512xbf16> to vector<8x512xbf16>
    %442 = arith.extf %441 : vector<8x512xbf16> to vector<8x512xf32>
    %443 = arith.truncf %435 : vector<8x128xf32> to vector<8x128xbf16>
    %cst_85 = arith.constant dense<0.000000e+00> : vector<8x512xf32>
    %444 = tpu.matmul %443, %17, %cst_85 {dimension_numbers = #tpu.dot_dimension_numbers<[1], [0], [0], [1], [0, 0, 1, 1], [], []>} : vector<8x128xbf16>, vector<128x512xbf16>, vector<8x512xf32> -> vector<8x512xf32>
    %445 = arith.addf %442, %444 : vector<8x512xf32>
    %446 = vector.extract_strided_slice %445 {offsets = [0, 0], sizes = [8, 128], strides = [1, 1]} : vector<8x512xf32> to vector<8x128xf32>
    %447 = arith.negf %446 : vector<8x128xf32>
    %448 = math.exp %447 : vector<8x128xf32>
    %cst_86 = arith.constant 1.000000e+00 : f32
    %449 = vector.broadcast %cst_86 : f32 to vector<8x128xf32>
    %450 = arith.addf %449, %448 : vector<8x128xf32>
    %451 = arith.divf %449, %450 : vector<8x128xf32>
    %452 = vector.extract_strided_slice %445 {offsets = [0, 128], sizes = [8, 128], strides = [1, 1]} : vector<8x512xf32> to vector<8x128xf32>
    %453 = arith.negf %452 : vector<8x128xf32>
    %454 = math.exp %453 : vector<8x128xf32>
    %cst_87 = arith.constant 1.000000e+00 : f32
    %455 = vector.broadcast %cst_87 : f32 to vector<8x128xf32>
    %456 = arith.addf %455, %454 : vector<8x128xf32>
    %457 = arith.divf %455, %456 : vector<8x128xf32>
    %458 = vector.extract_strided_slice %445 {offsets = [0, 256], sizes = [8, 128], strides = [1, 1]} : vector<8x512xf32> to vector<8x128xf32>
    %459 = math.tanh %458 : vector<8x128xf32>
    %460 = vector.extract_strided_slice %445 {offsets = [0, 384], sizes = [8, 128], strides = [1, 1]} : vector<8x512xf32> to vector<8x128xf32>
    %461 = arith.negf %460 : vector<8x128xf32>
    %462 = math.exp %461 : vector<8x128xf32>
    %cst_88 = arith.constant 1.000000e+00 : f32
    %463 = vector.broadcast %cst_88 : f32 to vector<8x128xf32>
    %464 = arith.addf %463, %462 : vector<8x128xf32>
    %465 = arith.divf %463, %464 : vector<8x128xf32>
    %466 = arith.mulf %457, %433 : vector<8x128xf32>
    %467 = arith.mulf %451, %459 : vector<8x128xf32>
    %468 = arith.addf %466, %467 : vector<8x128xf32>
    %469 = math.tanh %468 : vector<8x128xf32>
    %470 = arith.mulf %465, %469 : vector<8x128xf32>
    %471 = vector.broadcast %c12_i32 : i32 to vector<8x128xi32>
    %472 = arith.cmpi eq, %16, %471 : vector<8x128xi32>
    %473 = arith.select %472, %470, %438 : vector<8x128xi1>, vector<8x128xf32>
    %c13_i32 = arith.constant 13 : i32
    %474 = arith.index_cast %c13_i32 : i32 to index
    %c0_89 = arith.constant 0 : index
    %c0_90 = arith.constant 0 : index
    %475 = vector.load %arg8[%474, %c0_89, %c0_90] : memref<20x8x512xbf16, #tpu.memory_space<vmem>>, vector<1x8x512xbf16>
    %476 = vector.shape_cast %475 : vector<1x8x512xbf16> to vector<8x512xbf16>
    %477 = arith.extf %476 : vector<8x512xbf16> to vector<8x512xf32>
    %478 = arith.truncf %470 : vector<8x128xf32> to vector<8x128xbf16>
    %cst_91 = arith.constant dense<0.000000e+00> : vector<8x512xf32>
    %479 = tpu.matmul %478, %17, %cst_91 {dimension_numbers = #tpu.dot_dimension_numbers<[1], [0], [0], [1], [0, 0, 1, 1], [], []>} : vector<8x128xbf16>, vector<128x512xbf16>, vector<8x512xf32> -> vector<8x512xf32>
    %480 = arith.addf %477, %479 : vector<8x512xf32>
    %481 = vector.extract_strided_slice %480 {offsets = [0, 0], sizes = [8, 128], strides = [1, 1]} : vector<8x512xf32> to vector<8x128xf32>
    %482 = arith.negf %481 : vector<8x128xf32>
    %483 = math.exp %482 : vector<8x128xf32>
    %cst_92 = arith.constant 1.000000e+00 : f32
    %484 = vector.broadcast %cst_92 : f32 to vector<8x128xf32>
    %485 = arith.addf %484, %483 : vector<8x128xf32>
    %486 = arith.divf %484, %485 : vector<8x128xf32>
    %487 = vector.extract_strided_slice %480 {offsets = [0, 128], sizes = [8, 128], strides = [1, 1]} : vector<8x512xf32> to vector<8x128xf32>
    %488 = arith.negf %487 : vector<8x128xf32>
    %489 = math.exp %488 : vector<8x128xf32>
    %cst_93 = arith.constant 1.000000e+00 : f32
    %490 = vector.broadcast %cst_93 : f32 to vector<8x128xf32>
    %491 = arith.addf %490, %489 : vector<8x128xf32>
    %492 = arith.divf %490, %491 : vector<8x128xf32>
    %493 = vector.extract_strided_slice %480 {offsets = [0, 256], sizes = [8, 128], strides = [1, 1]} : vector<8x512xf32> to vector<8x128xf32>
    %494 = math.tanh %493 : vector<8x128xf32>
    %495 = vector.extract_strided_slice %480 {offsets = [0, 384], sizes = [8, 128], strides = [1, 1]} : vector<8x512xf32> to vector<8x128xf32>
    %496 = arith.negf %495 : vector<8x128xf32>
    %497 = math.exp %496 : vector<8x128xf32>
    %cst_94 = arith.constant 1.000000e+00 : f32
    %498 = vector.broadcast %cst_94 : f32 to vector<8x128xf32>
    %499 = arith.addf %498, %497 : vector<8x128xf32>
    %500 = arith.divf %498, %499 : vector<8x128xf32>
    %501 = arith.mulf %492, %468 : vector<8x128xf32>
    %502 = arith.mulf %486, %494 : vector<8x128xf32>
    %503 = arith.addf %501, %502 : vector<8x128xf32>
    %504 = math.tanh %503 : vector<8x128xf32>
    %505 = arith.mulf %500, %504 : vector<8x128xf32>
    %506 = vector.broadcast %c13_i32 : i32 to vector<8x128xi32>
    %507 = arith.cmpi eq, %16, %506 : vector<8x128xi32>
    %508 = arith.select %507, %505, %473 : vector<8x128xi1>, vector<8x128xf32>
    %c14_i32 = arith.constant 14 : i32
    %509 = arith.index_cast %c14_i32 : i32 to index
    %c0_95 = arith.constant 0 : index
    %c0_96 = arith.constant 0 : index
    %510 = vector.load %arg8[%509, %c0_95, %c0_96] : memref<20x8x512xbf16, #tpu.memory_space<vmem>>, vector<1x8x512xbf16>
    %511 = vector.shape_cast %510 : vector<1x8x512xbf16> to vector<8x512xbf16>
    %512 = arith.extf %511 : vector<8x512xbf16> to vector<8x512xf32>
    %513 = arith.truncf %505 : vector<8x128xf32> to vector<8x128xbf16>
    %cst_97 = arith.constant dense<0.000000e+00> : vector<8x512xf32>
    %514 = tpu.matmul %513, %17, %cst_97 {dimension_numbers = #tpu.dot_dimension_numbers<[1], [0], [0], [1], [0, 0, 1, 1], [], []>} : vector<8x128xbf16>, vector<128x512xbf16>, vector<8x512xf32> -> vector<8x512xf32>
    %515 = arith.addf %512, %514 : vector<8x512xf32>
    %516 = vector.extract_strided_slice %515 {offsets = [0, 0], sizes = [8, 128], strides = [1, 1]} : vector<8x512xf32> to vector<8x128xf32>
    %517 = arith.negf %516 : vector<8x128xf32>
    %518 = math.exp %517 : vector<8x128xf32>
    %cst_98 = arith.constant 1.000000e+00 : f32
    %519 = vector.broadcast %cst_98 : f32 to vector<8x128xf32>
    %520 = arith.addf %519, %518 : vector<8x128xf32>
    %521 = arith.divf %519, %520 : vector<8x128xf32>
    %522 = vector.extract_strided_slice %515 {offsets = [0, 128], sizes = [8, 128], strides = [1, 1]} : vector<8x512xf32> to vector<8x128xf32>
    %523 = arith.negf %522 : vector<8x128xf32>
    %524 = math.exp %523 : vector<8x128xf32>
    %cst_99 = arith.constant 1.000000e+00 : f32
    %525 = vector.broadcast %cst_99 : f32 to vector<8x128xf32>
    %526 = arith.addf %525, %524 : vector<8x128xf32>
    %527 = arith.divf %525, %526 : vector<8x128xf32>
    %528 = vector.extract_strided_slice %515 {offsets = [0, 256], sizes = [8, 128], strides = [1, 1]} : vector<8x512xf32> to vector<8x128xf32>
    %529 = math.tanh %528 : vector<8x128xf32>
    %530 = vector.extract_strided_slice %515 {offsets = [0, 384], sizes = [8, 128], strides = [1, 1]} : vector<8x512xf32> to vector<8x128xf32>
    %531 = arith.negf %530 : vector<8x128xf32>
    %532 = math.exp %531 : vector<8x128xf32>
    %cst_100 = arith.constant 1.000000e+00 : f32
    %533 = vector.broadcast %cst_100 : f32 to vector<8x128xf32>
    %534 = arith.addf %533, %532 : vector<8x128xf32>
    %535 = arith.divf %533, %534 : vector<8x128xf32>
    %536 = arith.mulf %527, %503 : vector<8x128xf32>
    %537 = arith.mulf %521, %529 : vector<8x128xf32>
    %538 = arith.addf %536, %537 : vector<8x128xf32>
    %539 = math.tanh %538 : vector<8x128xf32>
    %540 = arith.mulf %535, %539 : vector<8x128xf32>
    %541 = vector.broadcast %c14_i32 : i32 to vector<8x128xi32>
    %542 = arith.cmpi eq, %16, %541 : vector<8x128xi32>
    %543 = arith.select %542, %540, %508 : vector<8x128xi1>, vector<8x128xf32>
    %c15_i32 = arith.constant 15 : i32
    %544 = arith.index_cast %c15_i32 : i32 to index
    %c0_101 = arith.constant 0 : index
    %c0_102 = arith.constant 0 : index
    %545 = vector.load %arg8[%544, %c0_101, %c0_102] : memref<20x8x512xbf16, #tpu.memory_space<vmem>>, vector<1x8x512xbf16>
    %546 = vector.shape_cast %545 : vector<1x8x512xbf16> to vector<8x512xbf16>
    %547 = arith.extf %546 : vector<8x512xbf16> to vector<8x512xf32>
    %548 = arith.truncf %540 : vector<8x128xf32> to vector<8x128xbf16>
    %cst_103 = arith.constant dense<0.000000e+00> : vector<8x512xf32>
    %549 = tpu.matmul %548, %17, %cst_103 {dimension_numbers = #tpu.dot_dimension_numbers<[1], [0], [0], [1], [0, 0, 1, 1], [], []>} : vector<8x128xbf16>, vector<128x512xbf16>, vector<8x512xf32> -> vector<8x512xf32>
    %550 = arith.addf %547, %549 : vector<8x512xf32>
    %551 = vector.extract_strided_slice %550 {offsets = [0, 0], sizes = [8, 128], strides = [1, 1]} : vector<8x512xf32> to vector<8x128xf32>
    %552 = arith.negf %551 : vector<8x128xf32>
    %553 = math.exp %552 : vector<8x128xf32>
    %cst_104 = arith.constant 1.000000e+00 : f32
    %554 = vector.broadcast %cst_104 : f32 to vector<8x128xf32>
    %555 = arith.addf %554, %553 : vector<8x128xf32>
    %556 = arith.divf %554, %555 : vector<8x128xf32>
    %557 = vector.extract_strided_slice %550 {offsets = [0, 128], sizes = [8, 128], strides = [1, 1]} : vector<8x512xf32> to vector<8x128xf32>
    %558 = arith.negf %557 : vector<8x128xf32>
    %559 = math.exp %558 : vector<8x128xf32>
    %cst_105 = arith.constant 1.000000e+00 : f32
    %560 = vector.broadcast %cst_105 : f32 to vector<8x128xf32>
    %561 = arith.addf %560, %559 : vector<8x128xf32>
    %562 = arith.divf %560, %561 : vector<8x128xf32>
    %563 = vector.extract_strided_slice %550 {offsets = [0, 256], sizes = [8, 128], strides = [1, 1]} : vector<8x512xf32> to vector<8x128xf32>
    %564 = math.tanh %563 : vector<8x128xf32>
    %565 = vector.extract_strided_slice %550 {offsets = [0, 384], sizes = [8, 128], strides = [1, 1]} : vector<8x512xf32> to vector<8x128xf32>
    %566 = arith.negf %565 : vector<8x128xf32>
    %567 = math.exp %566 : vector<8x128xf32>
    %cst_106 = arith.constant 1.000000e+00 : f32
    %568 = vector.broadcast %cst_106 : f32 to vector<8x128xf32>
    %569 = arith.addf %568, %567 : vector<8x128xf32>
    %570 = arith.divf %568, %569 : vector<8x128xf32>
    %571 = arith.mulf %562, %538 : vector<8x128xf32>
    %572 = arith.mulf %556, %564 : vector<8x128xf32>
    %573 = arith.addf %571, %572 : vector<8x128xf32>
    %574 = math.tanh %573 : vector<8x128xf32>
    %575 = arith.mulf %570, %574 : vector<8x128xf32>
    %576 = vector.broadcast %c15_i32 : i32 to vector<8x128xi32>
    %577 = arith.cmpi eq, %16, %576 : vector<8x128xi32>
    %578 = arith.select %577, %575, %543 : vector<8x128xi1>, vector<8x128xf32>
    %c16_i32 = arith.constant 16 : i32
    %579 = arith.index_cast %c16_i32 : i32 to index
    %c0_107 = arith.constant 0 : index
    %c0_108 = arith.constant 0 : index
    %580 = vector.load %arg8[%579, %c0_107, %c0_108] : memref<20x8x512xbf16, #tpu.memory_space<vmem>>, vector<1x8x512xbf16>
    %581 = vector.shape_cast %580 : vector<1x8x512xbf16> to vector<8x512xbf16>
    %582 = arith.extf %581 : vector<8x512xbf16> to vector<8x512xf32>
    %583 = arith.truncf %575 : vector<8x128xf32> to vector<8x128xbf16>
    %cst_109 = arith.constant dense<0.000000e+00> : vector<8x512xf32>
    %584 = tpu.matmul %583, %17, %cst_109 {dimension_numbers = #tpu.dot_dimension_numbers<[1], [0], [0], [1], [0, 0, 1, 1], [], []>} : vector<8x128xbf16>, vector<128x512xbf16>, vector<8x512xf32> -> vector<8x512xf32>
    %585 = arith.addf %582, %584 : vector<8x512xf32>
    %586 = vector.extract_strided_slice %585 {offsets = [0, 0], sizes = [8, 128], strides = [1, 1]} : vector<8x512xf32> to vector<8x128xf32>
    %587 = arith.negf %586 : vector<8x128xf32>
    %588 = math.exp %587 : vector<8x128xf32>
    %cst_110 = arith.constant 1.000000e+00 : f32
    %589 = vector.broadcast %cst_110 : f32 to vector<8x128xf32>
    %590 = arith.addf %589, %588 : vector<8x128xf32>
    %591 = arith.divf %589, %590 : vector<8x128xf32>
    %592 = vector.extract_strided_slice %585 {offsets = [0, 128], sizes = [8, 128], strides = [1, 1]} : vector<8x512xf32> to vector<8x128xf32>
    %593 = arith.negf %592 : vector<8x128xf32>
    %594 = math.exp %593 : vector<8x128xf32>
    %cst_111 = arith.constant 1.000000e+00 : f32
    %595 = vector.broadcast %cst_111 : f32 to vector<8x128xf32>
    %596 = arith.addf %595, %594 : vector<8x128xf32>
    %597 = arith.divf %595, %596 : vector<8x128xf32>
    %598 = vector.extract_strided_slice %585 {offsets = [0, 256], sizes = [8, 128], strides = [1, 1]} : vector<8x512xf32> to vector<8x128xf32>
    %599 = math.tanh %598 : vector<8x128xf32>
    %600 = vector.extract_strided_slice %585 {offsets = [0, 384], sizes = [8, 128], strides = [1, 1]} : vector<8x512xf32> to vector<8x128xf32>
    %601 = arith.negf %600 : vector<8x128xf32>
    %602 = math.exp %601 : vector<8x128xf32>
    %cst_112 = arith.constant 1.000000e+00 : f32
    %603 = vector.broadcast %cst_112 : f32 to vector<8x128xf32>
    %604 = arith.addf %603, %602 : vector<8x128xf32>
    %605 = arith.divf %603, %604 : vector<8x128xf32>
    %606 = arith.mulf %597, %573 : vector<8x128xf32>
    %607 = arith.mulf %591, %599 : vector<8x128xf32>
    %608 = arith.addf %606, %607 : vector<8x128xf32>
    %609 = math.tanh %608 : vector<8x128xf32>
    %610 = arith.mulf %605, %609 : vector<8x128xf32>
    %611 = vector.broadcast %c16_i32 : i32 to vector<8x128xi32>
    %612 = arith.cmpi eq, %16, %611 : vector<8x128xi32>
    %613 = arith.select %612, %610, %578 : vector<8x128xi1>, vector<8x128xf32>
    %c17_i32 = arith.constant 17 : i32
    %614 = arith.index_cast %c17_i32 : i32 to index
    %c0_113 = arith.constant 0 : index
    %c0_114 = arith.constant 0 : index
    %615 = vector.load %arg8[%614, %c0_113, %c0_114] : memref<20x8x512xbf16, #tpu.memory_space<vmem>>, vector<1x8x512xbf16>
    %616 = vector.shape_cast %615 : vector<1x8x512xbf16> to vector<8x512xbf16>
    %617 = arith.extf %616 : vector<8x512xbf16> to vector<8x512xf32>
    %618 = arith.truncf %610 : vector<8x128xf32> to vector<8x128xbf16>
    %cst_115 = arith.constant dense<0.000000e+00> : vector<8x512xf32>
    %619 = tpu.matmul %618, %17, %cst_115 {dimension_numbers = #tpu.dot_dimension_numbers<[1], [0], [0], [1], [0, 0, 1, 1], [], []>} : vector<8x128xbf16>, vector<128x512xbf16>, vector<8x512xf32> -> vector<8x512xf32>
    %620 = arith.addf %617, %619 : vector<8x512xf32>
    %621 = vector.extract_strided_slice %620 {offsets = [0, 0], sizes = [8, 128], strides = [1, 1]} : vector<8x512xf32> to vector<8x128xf32>
    %622 = arith.negf %621 : vector<8x128xf32>
    %623 = math.exp %622 : vector<8x128xf32>
    %cst_116 = arith.constant 1.000000e+00 : f32
    %624 = vector.broadcast %cst_116 : f32 to vector<8x128xf32>
    %625 = arith.addf %624, %623 : vector<8x128xf32>
    %626 = arith.divf %624, %625 : vector<8x128xf32>
    %627 = vector.extract_strided_slice %620 {offsets = [0, 128], sizes = [8, 128], strides = [1, 1]} : vector<8x512xf32> to vector<8x128xf32>
    %628 = arith.negf %627 : vector<8x128xf32>
    %629 = math.exp %628 : vector<8x128xf32>
    %cst_117 = arith.constant 1.000000e+00 : f32
    %630 = vector.broadcast %cst_117 : f32 to vector<8x128xf32>
    %631 = arith.addf %630, %629 : vector<8x128xf32>
    %632 = arith.divf %630, %631 : vector<8x128xf32>
    %633 = vector.extract_strided_slice %620 {offsets = [0, 256], sizes = [8, 128], strides = [1, 1]} : vector<8x512xf32> to vector<8x128xf32>
    %634 = math.tanh %633 : vector<8x128xf32>
    %635 = vector.extract_strided_slice %620 {offsets = [0, 384], sizes = [8, 128], strides = [1, 1]} : vector<8x512xf32> to vector<8x128xf32>
    %636 = arith.negf %635 : vector<8x128xf32>
    %637 = math.exp %636 : vector<8x128xf32>
    %cst_118 = arith.constant 1.000000e+00 : f32
    %638 = vector.broadcast %cst_118 : f32 to vector<8x128xf32>
    %639 = arith.addf %638, %637 : vector<8x128xf32>
    %640 = arith.divf %638, %639 : vector<8x128xf32>
    %641 = arith.mulf %632, %608 : vector<8x128xf32>
    %642 = arith.mulf %626, %634 : vector<8x128xf32>
    %643 = arith.addf %641, %642 : vector<8x128xf32>
    %644 = math.tanh %643 : vector<8x128xf32>
    %645 = arith.mulf %640, %644 : vector<8x128xf32>
    %646 = vector.broadcast %c17_i32 : i32 to vector<8x128xi32>
    %647 = arith.cmpi eq, %16, %646 : vector<8x128xi32>
    %648 = arith.select %647, %645, %613 : vector<8x128xi1>, vector<8x128xf32>
    %c18_i32 = arith.constant 18 : i32
    %649 = arith.index_cast %c18_i32 : i32 to index
    %c0_119 = arith.constant 0 : index
    %c0_120 = arith.constant 0 : index
    %650 = vector.load %arg8[%649, %c0_119, %c0_120] : memref<20x8x512xbf16, #tpu.memory_space<vmem>>, vector<1x8x512xbf16>
    %651 = vector.shape_cast %650 : vector<1x8x512xbf16> to vector<8x512xbf16>
    %652 = arith.extf %651 : vector<8x512xbf16> to vector<8x512xf32>
    %653 = arith.truncf %645 : vector<8x128xf32> to vector<8x128xbf16>
    %cst_121 = arith.constant dense<0.000000e+00> : vector<8x512xf32>
    %654 = tpu.matmul %653, %17, %cst_121 {dimension_numbers = #tpu.dot_dimension_numbers<[1], [0], [0], [1], [0, 0, 1, 1], [], []>} : vector<8x128xbf16>, vector<128x512xbf16>, vector<8x512xf32> -> vector<8x512xf32>
    %655 = arith.addf %652, %654 : vector<8x512xf32>
    %656 = vector.extract_strided_slice %655 {offsets = [0, 0], sizes = [8, 128], strides = [1, 1]} : vector<8x512xf32> to vector<8x128xf32>
    %657 = arith.negf %656 : vector<8x128xf32>
    %658 = math.exp %657 : vector<8x128xf32>
    %cst_122 = arith.constant 1.000000e+00 : f32
    %659 = vector.broadcast %cst_122 : f32 to vector<8x128xf32>
    %660 = arith.addf %659, %658 : vector<8x128xf32>
    %661 = arith.divf %659, %660 : vector<8x128xf32>
    %662 = vector.extract_strided_slice %655 {offsets = [0, 128], sizes = [8, 128], strides = [1, 1]} : vector<8x512xf32> to vector<8x128xf32>
    %663 = arith.negf %662 : vector<8x128xf32>
    %664 = math.exp %663 : vector<8x128xf32>
    %cst_123 = arith.constant 1.000000e+00 : f32
    %665 = vector.broadcast %cst_123 : f32 to vector<8x128xf32>
    %666 = arith.addf %665, %664 : vector<8x128xf32>
    %667 = arith.divf %665, %666 : vector<8x128xf32>
    %668 = vector.extract_strided_slice %655 {offsets = [0, 256], sizes = [8, 128], strides = [1, 1]} : vector<8x512xf32> to vector<8x128xf32>
    %669 = math.tanh %668 : vector<8x128xf32>
    %670 = vector.extract_strided_slice %655 {offsets = [0, 384], sizes = [8, 128], strides = [1, 1]} : vector<8x512xf32> to vector<8x128xf32>
    %671 = arith.negf %670 : vector<8x128xf32>
    %672 = math.exp %671 : vector<8x128xf32>
    %cst_124 = arith.constant 1.000000e+00 : f32
    %673 = vector.broadcast %cst_124 : f32 to vector<8x128xf32>
    %674 = arith.addf %673, %672 : vector<8x128xf32>
    %675 = arith.divf %673, %674 : vector<8x128xf32>
    %676 = arith.mulf %667, %643 : vector<8x128xf32>
    %677 = arith.mulf %661, %669 : vector<8x128xf32>
    %678 = arith.addf %676, %677 : vector<8x128xf32>
    %679 = math.tanh %678 : vector<8x128xf32>
    %680 = arith.mulf %675, %679 : vector<8x128xf32>
    %681 = vector.broadcast %c18_i32 : i32 to vector<8x128xi32>
    %682 = arith.cmpi eq, %16, %681 : vector<8x128xi32>
    %683 = arith.select %682, %680, %648 : vector<8x128xi1>, vector<8x128xf32>
    %c19_i32 = arith.constant 19 : i32
    %684 = arith.index_cast %c19_i32 : i32 to index
    %c0_125 = arith.constant 0 : index
    %c0_126 = arith.constant 0 : index
    %685 = vector.load %arg8[%684, %c0_125, %c0_126] : memref<20x8x512xbf16, #tpu.memory_space<vmem>>, vector<1x8x512xbf16>
    %686 = vector.shape_cast %685 : vector<1x8x512xbf16> to vector<8x512xbf16>
    %687 = arith.extf %686 : vector<8x512xbf16> to vector<8x512xf32>
    %688 = arith.truncf %680 : vector<8x128xf32> to vector<8x128xbf16>
    %cst_127 = arith.constant dense<0.000000e+00> : vector<8x512xf32>
    %689 = tpu.matmul %688, %17, %cst_127 {dimension_numbers = #tpu.dot_dimension_numbers<[1], [0], [0], [1], [0, 0, 1, 1], [], []>} : vector<8x128xbf16>, vector<128x512xbf16>, vector<8x512xf32> -> vector<8x512xf32>
    %690 = arith.addf %687, %689 : vector<8x512xf32>
    %691 = vector.extract_strided_slice %690 {offsets = [0, 0], sizes = [8, 128], strides = [1, 1]} : vector<8x512xf32> to vector<8x128xf32>
    %692 = arith.negf %691 : vector<8x128xf32>
    %693 = math.exp %692 : vector<8x128xf32>
    %cst_128 = arith.constant 1.000000e+00 : f32
    %694 = vector.broadcast %cst_128 : f32 to vector<8x128xf32>
    %695 = arith.addf %694, %693 : vector<8x128xf32>
    %696 = arith.divf %694, %695 : vector<8x128xf32>
    %697 = vector.extract_strided_slice %690 {offsets = [0, 128], sizes = [8, 128], strides = [1, 1]} : vector<8x512xf32> to vector<8x128xf32>
    %698 = arith.negf %697 : vector<8x128xf32>
    %699 = math.exp %698 : vector<8x128xf32>
    %cst_129 = arith.constant 1.000000e+00 : f32
    %700 = vector.broadcast %cst_129 : f32 to vector<8x128xf32>
    %701 = arith.addf %700, %699 : vector<8x128xf32>
    %702 = arith.divf %700, %701 : vector<8x128xf32>
    %703 = vector.extract_strided_slice %690 {offsets = [0, 256], sizes = [8, 128], strides = [1, 1]} : vector<8x512xf32> to vector<8x128xf32>
    %704 = math.tanh %703 : vector<8x128xf32>
    %705 = vector.extract_strided_slice %690 {offsets = [0, 384], sizes = [8, 128], strides = [1, 1]} : vector<8x512xf32> to vector<8x128xf32>
    %706 = arith.negf %705 : vector<8x128xf32>
    %707 = math.exp %706 : vector<8x128xf32>
    %cst_130 = arith.constant 1.000000e+00 : f32
    %708 = vector.broadcast %cst_130 : f32 to vector<8x128xf32>
    %709 = arith.addf %708, %707 : vector<8x128xf32>
    %710 = arith.divf %708, %709 : vector<8x128xf32>
    %711 = arith.mulf %702, %678 : vector<8x128xf32>
    %712 = arith.mulf %696, %704 : vector<8x128xf32>
    %713 = arith.addf %711, %712 : vector<8x128xf32>
    %714 = math.tanh %713 : vector<8x128xf32>
    %715 = arith.mulf %710, %714 : vector<8x128xf32>
    %716 = vector.broadcast %c19_i32 : i32 to vector<8x128xi32>
    %717 = arith.cmpi eq, %16, %716 : vector<8x128xi32>
    %718 = arith.select %717, %715, %683 : vector<8x128xi1>, vector<8x128xf32>
    %c20_i32 = arith.constant 20 : i32
    %c0_131 = arith.constant 0 : index
    %c0_132 = arith.constant 0 : index
    %719 = vector.load %arg5[%c0_131, %c0_132] : memref<128x2xf32, #tpu.memory_space<vmem>>, vector<128x2xf32>
    %cst_133 = arith.constant dense<0.000000e+00> : vector<8x2xf32>
    %720 = tpu.matmul %718, %719, %cst_133 {dimension_numbers = #tpu.dot_dimension_numbers<[1], [0], [0], [1], [0, 0, 1, 1], [], []>} : vector<8x128xf32>, vector<128x2xf32>, vector<8x2xf32> -> vector<8x2xf32>
    %c0_134 = arith.constant 0 : index
    %c0_135 = arith.constant 0 : index
    %721 = vector.load %arg6[%c0_134, %c0_135] : memref<1x2xf32, #tpu.memory_space<vmem>>, vector<1x2xf32>
    %722 = vector.broadcast %721 : vector<1x2xf32> to vector<8x2xf32>
    %723 = arith.addf %720, %722 : vector<8x2xf32>
    %cst_136 = arith.constant dense<0xFF800000> : vector<8xf32>
    %724 = vector.multi_reduction <maximumf>, %723, %cst_136 [1] : vector<8x2xf32> to vector<8xf32>
    %725 = vector.shape_cast %724 : vector<8xf32> to vector<8x1xf32>
    %726 = vector.broadcast %725 : vector<8x1xf32> to vector<8x2xf32>
    %727 = arith.subf %723, %726 : vector<8x2xf32>
    %728 = math.exp %727 : vector<8x2xf32>
    %cst_137 = arith.constant dense<0.000000e+00> : vector<8xf32>
    %729 = vector.multi_reduction <add>, %728, %cst_137 [1] : vector<8x2xf32> to vector<8xf32>
    %730 = vector.shape_cast %729 : vector<8xf32> to vector<8x1xf32>
    %731 = math.log %730 : vector<8x1xf32>
    %732 = arith.addf %725, %731 : vector<8x1xf32>
    %733 = vector.broadcast %732 : vector<8x1xf32> to vector<8x2xf32>
    %734 = arith.subf %723, %733 : vector<8x2xf32>
    %c0_138 = arith.constant 0 : index
    %c0_139 = arith.constant 0 : index
    %735 = vector.load %arg7[%c0_138, %c0_139] : memref<8x2xf32, #tpu.memory_space<vmem>>, vector<8x2xf32>
    tpu.vector_store %arg7[%c0_138, %c0_139], %734 {strides = array<i32>} : memref<8x2xf32, #tpu.memory_space<vmem>>, vector<8x2xf32>,
    return
  }
  func.func @transform_0(%arg0: i32) -> (i32, i32) {
    %c0_i32 = arith.constant 0 : i32
    %c0_i32_0 = arith.constant 0 : i32
    return %c0_i32, %arg0 : i32, i32
  }
  func.func @transform_1(%arg0: i32) -> (i32, i32) {
    %c0_i32 = arith.constant 0 : i32
    %c0_i32_0 = arith.constant 0 : i32
    return %arg0, %c0_i32 : i32, i32
  }
  func.func @transform_2(%arg0: i32) -> (i32, i32) {
    %c0_i32 = arith.constant 0 : i32
    %c0_i32_0 = arith.constant 0 : i32
    %c0_i32_1 = arith.constant 0 : i32
    return %c0_i32, %c0_i32_0 : i32, i32
  }
  func.func @transform_3(%arg0: i32) -> (i32, i32) {
    %c0_i32 = arith.constant 0 : i32
    %c0_i32_0 = arith.constant 0 : i32
    %c0_i32_1 = arith.constant 0 : i32
    return %c0_i32, %c0_i32_0 : i32, i32
  }
  func.func @transform_4(%arg0: i32) -> (i32, i32) {
    %c0_i32 = arith.constant 0 : i32
    %c0_i32_0 = arith.constant 0 : i32
    %c0_i32_1 = arith.constant 0 : i32
    return %c0_i32, %c0_i32_0 : i32, i32
  }
  func.func @transform_5(%arg0: i32) -> (i32, i32) {
    %c0_i32 = arith.constant 0 : i32
    %c0_i32_0 = arith.constant 0 : i32
    %c0_i32_1 = arith.constant 0 : i32
    return %c0_i32, %c0_i32_0 : i32, i32
  }
  func.func @transform_6(%arg0: i32) -> (i32, i32) {
    %c0_i32 = arith.constant 0 : i32
    %c0_i32_0 = arith.constant 0 : i32
    return %arg0, %c0_i32 : i32, i32
  }
}

</mosaic_0001>

<bundles_post_ra>
// kernel: _run.1
= control target key start
LH: loop header
LB: loop body
LE: loop exit
PB: predicated region body
PF: predicated region fallthrough
CT: control target
= control target key end

     0   :  { %11 = vsyncpa [#allocation4], 0  ;;  %s6173_s0 = inlined_call_operand.vmem [shape: s32[20,8], index: 0, kind: input, shape index: {}]   ;;  %s6174_s1 = inlined_call_operand.vmem [shape: s32[8,1], index: 1, kind: input, shape index: {}]   ;;  %s6175_s2 = inlined_call_operand.hbm [shape: bf16[128,512], index: 2, kind: input, shape index: {}]   ;;  %s6176_s3 = inlined_call_operand.hbm [shape: bf16[128,512], index: 3, kind: input, shape index: {}]   ;;  %s6177_s4 = inlined_call_operand.vmem [shape: f32[128,2], index: 4, kind: input, shape index: {}]   ;;  %s6178_s5 = inlined_call_operand.vmem [shape: f32[1,2], index: 5, kind: input, shape index: {}]   ;;  %s6179_s6 = inlined_call_operand.vmem [shape: f32[8,2], index: 6, kind: output, shape index: {}]  }
   0x1   :  { %12 = vsyncpa [#allocation6], 0  ;;  %s4769_s21 = smov [#allocation3]  }
   0x2   :  { %s22_s22 = sshll.u32 %s4769_s21, 4  ;;  %s23_s22 = int_to_ptr.vmem [resolvable:$true] %s22_s22 }
   0x3   :  { %s4733_s23 = scalar_lea.vmem %s23_s22, 4096  ;;  %p4738_p1 = scmp.lt.s32.totalorder %s23_s22, %s23_s22 }
   0x4   :  { %p4734_p0 = scmp.ne.s32.totalorder %s23_s22, %s4733_s23  ;;  %p4739_p2 = scmp.lt.s32.totalorder %s4733_s23, %s4733_s23 }
   0x6   :  { %p4740_p3 = por %p4739_p2, %p4738_p1 }
   0x8   :  { %p4741_p4 = pnand %p4740_p3, %p4734_p0 }
   0xa   :  { %4744 = shalt.err (!%p4741_p4)
}
   0xb   :  { %s4770_s24 = smov 256   ;;  %s4771_s25 = smov 16  }
   0xc   :  { %28 = dma.hbm_to_vmem [thread:$0]  %s6175_s2, 4096, %s23_s22, [#allocation4], %s4770_s24, %s4770_s24, %s4771_s25  }
   0xd   :  { %s4772_s28 = smov [#allocation5]  }
   0xe   :  { %s34_s29 = sshll.u32 %s4772_s28, 4  ;;  %s35_s29 = int_to_ptr.vmem [resolvable:$true] %s34_s29 }
   0xf   :  { %s4753_s30 = scalar_lea.vmem %s35_s29, 4096  ;;  %p4758_p6 = scmp.lt.s32.totalorder %s35_s29, %s35_s29 }
  0x10   :  { %p4754_p5 = scmp.ne.s32.totalorder %s35_s29, %s4753_s30  ;;  %p4759_p7 = scmp.lt.s32.totalorder %s4753_s30, %s4753_s30 }
  0x12   :  { %p4760_p8 = por %p4759_p7, %p4758_p6 }
  0x14   :  { %p4761_p9 = pnand %p4760_p8, %p4754_p5 }
  0x16   :  { %4764 = shalt.err (!%p4761_p9)
}
  0x17   :  { %40 = dma.hbm_to_vmem [thread:$0]  %s6176_s3, 4096, %s35_s29, [#allocation6], %s4770_s24, %s4770_s24, %s4771_s25  }
  0x18   :  { %4765 = dma.done.wait [#allocation4], 4096  }
  0x19   :  { %4766 = vsyncadd [#allocation4], 4294963200 }
  0x1a   :  { %4767 = dma.done.wait [#allocation6], 4096  }
  0x1b   :  { %4768 = vsyncadd [#allocation6], 4294963200  ;;  %v55_v0 = vlaneseq  ;;  %v6180_v2 = vmov 0   ;;  %v52_v7 = vld [vmem:[%s6173_s0] sm:$0xff]  ;;  %v4212_v16 = vld [vmem:[#allocation3 + $0xec] ss:$16 sps:$4 sm:$0xff]  }
  0x1c   :  { %561 = vmatprep.mubr.bf16.mxu0 %v6180_v2  ;;  %694 = vmatprep.mubr.bf16.mxu1 %v6180_v2  ;;  %v4209_v10 = vld [vmem:[#allocation3 + $0xe4] ss:$16 sps:$4 sm:$0xff]   ;;  %v4211_v13 = vld [vmem:[#allocation3 + $0xe0] ss:$16 sps:$4 sm:$0xff]   ;;  %v4214_v17 = vld [vmem:[#allocation3 + $0xe8] ss:$16 sps:$4 sm:$0xff]  }
  0x1d   :  { %v4819_v1 = vshrl.u32 %v55_v0, 7  ;;  %4208 = vset.pattern.permute.xlu0 %v6180_v2  ;;  %529 = vmatprep.subr.bf16.mxu0 %v4209_v10  ;;  %v4215_v18 = vld [vmem:[#allocation3 + $0xc4] ss:$16 sps:$4 sm:$0xff]   ;;  %v4217_v19 = vld [vmem:[#allocation3 + $0xc0] ss:$16 sps:$4 sm:$0xff]   ;;  %v53_v32 = vld [vmem:[%s6173_s0 + $0x8] sm:$0xff] }
  0x1e   :  { %530 = vmatpush1.bf16.msra.mxu0 %v4211_v13  ;;  %662 = vmatprep.subr.bf16.mxu1 %v4212_v16  ;;  %v4218_v22 = vld [vmem:[#allocation3 + $0xcc] ss:$16 sps:$4 sm:$0xff]   ;;  %v4221_v25 = vld [vmem:[#allocation3 + $0xa4] ss:$16 sps:$4 sm:$0xff]   ;;  %v4220_v26 = vld [vmem:[#allocation3 + $0xc8] ss:$16 sps:$4 sm:$0xff]  }
  0x1f   :  { %v4825_v3 = vsub.s32 0, %v4819_v1  ;;  %v4828_v4 = vsub.s32 2, %v4819_v1  ;;  %v4831_v5 = vsub.s32 1, %v4819_v1  ;;  %v4834_v6 = vsub.s32 3, %v4819_v1  ;;  %531 = vmatprep.subr.bf16.mxu0 %v4215_v18  ;;  %663 = vmatpush1.bf16.msra.mxu1 %v4214_v17  ;;  %v4223_v27 = vld [vmem:[#allocation3 + $0xa0] ss:$16 sps:$4 sm:$0xff]  }
  0x20   :  { %v94_v11 = vsub.s32 5, %v4819_v1  ;;  %v87_v12 = vsub.s32 4, %v4819_v1  ;;  %v108_v20 = vsub.s32 7, %v4819_v1  ;;  %v101_v21 = vsub.s32 6, %v4819_v1  ;;  %664 = vmatprep.subr.bf16.mxu1 %v4218_v22  ;;  %v4224_v28 = vld [vmem:[#allocation3 + $0xac] ss:$16 sps:$4 sm:$0xff]  }
  0x21   :  { %v60_v8 = vrot.slane %v52_v7, %v4825_v3  ;;  %v74_v9 = vrot.slane %v52_v7, %v4828_v4  ;;  %v67_v14 = vrot.slane %v52_v7, %v4831_v5  ;;  %v81_v15 = vrot.slane %v52_v7, %v4834_v6  ;;  %v4227_v29 = vld [vmem:[#allocation3 + $0x84] ss:$16 sps:$4 sm:$0xff]   ;;  %v4226_v33 = vld [vmem:[#allocation3 + $0xa8] ss:$16 sps:$4 sm:$0xff]   ;;  %v4229_v34 = vld [vmem:[#allocation3 + $0x80] ss:$16 sps:$4 sm:$0xff]  }
  0x22   :  { %v95_v23 = vrot.slane %v52_v7, %v94_v11  ;;  %v88_v24 = vrot.slane %v52_v7, %v87_v12  ;;  %532 = vmatpush1.bf16.msra.mxu0 %v4217_v19  ;;  %v109_v30 = vrot.slane %v52_v7, %v108_v20  ;;  %v102_v31 = vrot.slane %v52_v7, %v101_v21  ;;  %v4230_v35 = vld [vmem:[#allocation3 + $0x8c] ss:$16 sps:$4 sm:$0xff]   ;;  %v4233_v36 = vld [vmem:[#allocation3 + $0x64] ss:$16 sps:$4 sm:$0xff]   ;;  %v4232_v39 = vld [vmem:[#allocation3 + $0x88] ss:$16 sps:$4 sm:$0xff]  }
  0x23   :  { %62 = vbcast.lane.b32.xlu0 %v60_v8, 256  ;;  %76 = vbcast.lane.b32.xlu1 %v74_v9, 256  ;;  %v123_v37 = vrot.slane %v53_v32, %v4831_v5  ;;  %v116_v38 = vrot.slane %v53_v32, %v4825_v3  ;;  %v4235_v40 = vld [vmem:[#allocation3 + $0x60] ss:$16 sps:$4 sm:$0xff]   ;;  %v4236_v41 = vld [vmem:[#allocation3 + $0x6c] ss:$16 sps:$4 sm:$0xff]   ;;  %v137_v43 = vrot.slane %v53_v32, %v4834_v6 }
  0x24   :  { %533 = vmatprep.subr.bf16.mxu0 %v4221_v25  ;;  %665 = vmatpush1.bf16.msra.mxu1 %v4220_v26  ;;  %v4239_v42 = vld [vmem:[#allocation3 + $0x44] ss:$16 sps:$4 sm:$0xff]   ;;  %v130_v44 = vrot.slane %v53_v32, %v4828_v4  ;;  %v4238_v45 = vld [vmem:[#allocation3 + $0x68] ss:$16 sps:$4 sm:$0xff]   ;;  %v4241_v46 = vld [vmem:[#allocation3 + $0x40] ss:$16 sps:$4 sm:$0xff]   ;;  %v151_v49 = vrot.slane %v53_v32, %v94_v11  ;;  %v144_v50 = vrot.slane %v53_v32, %v87_v12 }
  0x25   :  { %666 = vmatprep.subr.bf16.mxu1 %v4224_v28  ;;  %v4242_v47 = vld [vmem:[#allocation3 + $0x4c] ss:$16 sps:$4 sm:$0xff]   ;;  %v4245_v48 = vld [vmem:[#allocation3 + $0x24] ss:$16 sps:$4 sm:$0xff]   ;;  %v4244_v51 = vld [vmem:[#allocation3 + $0x48] ss:$16 sps:$4 sm:$0xff]   ;;  %v165_v55 = vrot.slane %v53_v32, %v108_v20  ;;  %v158_v56 = vrot.slane %v53_v32, %v101_v21 }
  0x26   :  { %534 = vmatpush1.bf16.msra.mxu0 %v4223_v27  ;;  %v4247_v52 = vld [vmem:[#allocation3 + $0x20] ss:$16 sps:$4 sm:$0xff]   ;;  %v4248_v53 = vld [vmem:[#allocation3 + $0x2c] ss:$16 sps:$4 sm:$0xff]   ;;  %v4251_v54 = vld [vmem:[#allocation3 + $0x4] ss:$16 sps:$4 sm:$0xff]  }
  0x27   :  { %69 = vbcast.lane.b32.xlu0 %v67_v14, 256  ;;  %83 = vbcast.lane.b32.xlu1 %v81_v15, 256  ;;  %v54_v57 = vld [vmem:[%s6173_s0 + $0x10] sm:$0xf]  ;;  %v4250_v58 = vld [vmem:[#allocation3 + $0x28] ss:$16 sps:$4 sm:$0xff]  }
  0x28   :  { %535 = vmatprep.subr.bf16.mxu0 %v4227_v29  ;;  %667 = vmatpush1.bf16.msra.mxu1 %v4226_v33  ;;  %v4253_v59 = vld [vmem:[#allocation3] ss:$16 sps:$4 sm:$0xff]   ;;  %v4254_v60 = vld [vmem:[#allocation3 + $0xc] ss:$16 sps:$4 sm:$0xff]   ;;  %v4873_v61 = vld [vmem:[#allocation5 + $0xe4] ss:$16 sps:$4 sm:$0xff]   ;;  %v179_v62 = vrot.slane %v54_v57, %v4831_v5  ;;  %v172_v63 = vrot.slane %v54_v57, %v4825_v3  ;;  %v193_v8 = vrot.slane %v54_v57, %v4834_v6 }
  0x29   :  { %668 = vmatprep.subr.bf16.mxu1 %v4230_v35  ;;  %v4256_v1 = vld [vmem:[#allocation3 + $0x8] ss:$16 sps:$4 sm:$0xff]   ;;  %v4877_v7 = vld [vmem:[#allocation5 + $0xec] ss:$16 sps:$4 sm:$0xff]   ;;  %v186_v9 = vrot.slane %v54_v57, %v4828_v4  ;;  %v4884_v5 = vand.u32 127, %v55_v0  ;;  %v1155_v57 = vld [vmem:[%s6174_s1] sm:$0xff] }
  0x2a   :  { %536 = vmatpush1.bf16.msra.mxu0 %v4229_v34  ;;  %v4886_v12 = vld [vmem:[#allocation5 + $0xe0] ss:$16 sps:$4 sm:$0xff]   ;;  %v4890_v6 = vld [vmem:[#allocation5 + $0xc4] ss:$16 sps:$4 sm:$0xff]   ;;  %v4892_v4 = vld [vmem:[#allocation5 + $0xe8] ss:$16 sps:$4 sm:$0xff]  }
  0x2b   :  { %97 = vbcast.lane.b32.xlu1 %v95_v23, 256  ;;  %90 = vbcast.lane.b32.xlu0 %v88_v24, 256  ;;  %v4774_v13 = vmov 1.0|1.0   ;;  %v4896_v0 = vld [vmem:[#allocation5 + $0xcc] ss:$16 sps:$4 sm:$0xff]  }
  0x2c   :  { %537 = vmatprep.subr.bf16.mxu0 %v4233_v36  ;;  %669 = vmatpush1.bf16.msra.mxu1 %v4232_v39  ;;  %v4900_v15 = vld [vmem:[#allocation5 + $0xc0] ss:$16 sps:$4 sm:$0xff]   ;;  %v4904_v16 = vld [vmem:[#allocation5 + $0xa4] ss:$16 sps:$4 sm:$0xff]   ;;  %v4907_v17 = vld [vmem:[#allocation5 + $0xc8] ss:$16 sps:$4 sm:$0xff]  }
  0x2d   :  { %670 = vmatprep.subr.bf16.mxu1 %v4236_v41  ;;  %v4914_v18 = vld [vmem:[#allocation5 + $0xa0] ss:$16 sps:$4 sm:$0xff]   ;;  %v4916_v19 = vld [vmem:[#allocation5 + $0xac] ss:$16 sps:$4 sm:$0xff]   ;;  %v4919_v22 = vld [vmem:[#allocation5 + $0x84] ss:$16 sps:$4 sm:$0xff]  }
  0x2e   :  { %538 = vmatpush1.bf16.msra.mxu0 %v4235_v40  ;;  %v4921_v23 = vld [vmem:[#allocation5 + $0xa8] ss:$16 sps:$4 sm:$0xff]   ;;  %v4925_v24 = vld [vmem:[#allocation5 + $0x8c] ss:$16 sps:$4 sm:$0xff]   ;;  %v4932_v25 = vld [vmem:[#allocation5 + $0x80] ss:$16 sps:$4 sm:$0xff]  }
  0x2f   :  { %111 = vbcast.lane.b32.xlu1 %v109_v30, 256  ;;  %104 = vbcast.lane.b32.xlu0 %v102_v31, 256  ;;  %v4937_v26 = vld [vmem:[#allocation5 + $0x64] ss:$16 sps:$4 sm:$0xff]   ;;  %v4939_v27 = vld [vmem:[#allocation5 + $0x88] ss:$16 sps:$4 sm:$0xff]  }
  0x30   :  { %539 = vmatprep.subr.bf16.mxu0 %v4239_v42  ;;  %671 = vmatpush1.bf16.msra.mxu1 %v4238_v45  ;;  %v4943_v28 = vld [vmem:[#allocation5 + $0x60] ss:$16 sps:$4 sm:$0xff]   ;;  %v4945_v29 = vld [vmem:[#allocation5 + $0x6c] ss:$16 sps:$4 sm:$0xff]   ;;  %v4949_v32 = vld [vmem:[#allocation5 + $0x44] ss:$16 sps:$4 sm:$0xff]  }
  0x31   :  { %672 = vmatprep.subr.bf16.mxu1 %v4242_v47  ;;  %v4951_v33 = vld [vmem:[#allocation5 + $0x68] ss:$16 sps:$4 sm:$0xff]   ;;  %v4955_v34 = vld [vmem:[#allocation5 + $0x4c] ss:$16 sps:$4 sm:$0xff]   ;;  %v4962_v35 = vld [vmem:[#allocation5 + $0x40] ss:$16 sps:$4 sm:$0xff]  }
  0x32   :  { %540 = vmatpush1.bf16.msra.mxu0 %v4241_v46  ;;  %v4967_v36 = vld [vmem:[#allocation5 + $0x24] ss:$16 sps:$4 sm:$0xff]   ;;  %v4975_v39 = vld [vmem:[#allocation5 + $0x2c] ss:$16 sps:$4 sm:$0xff]   ;;  %v4992_v45 = vld [vmem:[#allocation5] ss:$16 sps:$4 sm:$0xff]  }
  0x33   :  { %125 = vbcast.lane.b32.xlu1 %v123_v37, 256  ;;  %118 = vbcast.lane.b32.xlu0 %v116_v38, 256  ;;  %v4969_v37 = vld [vmem:[#allocation5 + $0x48] ss:$16 sps:$4 sm:$0xff]   ;;  %v4973_v38 = vld [vmem:[#allocation5 + $0x20] ss:$16 sps:$4 sm:$0xff]  }
  0x34   :  { %541 = vmatprep.subr.bf16.mxu0 %v4245_v48  ;;  %673 = vmatpush1.bf16.msra.mxu1 %v4244_v51  ;;  %v4979_v42 = vld [vmem:[#allocation5 + $0x4] ss:$16 sps:$4 sm:$0xff]   ;;  %v4997_v46 = vld [vmem:[#allocation5 + $0x8] ss:$16 sps:$4 sm:$0xff]  }
  0x35   :  { %674 = vmatprep.subr.bf16.mxu1 %v4248_v53 }
  0x36   :  { %542 = vmatpush1.bf16.msra.mxu0 %v4247_v52 }
  0x37   :  { %139 = vbcast.lane.b32.xlu1 %v137_v43, 256  ;;  %132 = vbcast.lane.b32.xlu0 %v130_v44, 256  ;;  %v4981_v43 = vld [vmem:[#allocation5 + $0x28] ss:$16 sps:$4 sm:$0xff]   ;;  %v4985_v44 = vld [vmem:[#allocation5 + $0xc] ss:$16 sps:$4 sm:$0xff]  }
  0x38   :  { %543 = vmatprep.subr.bf16.mxu0 %v4251_v54  ;;  %675 = vmatpush1.bf16.msra.mxu1 %v4250_v58 }
  0x39   :  { %676 = vmatprep.subr.bf16.mxu1 %v4254_v60 }
  0x3a   :  { %544 = vmatpush1.bf16.msra.mxu0 %v4253_v59 }
  0x3b   :  { %153 = vbcast.lane.b32.xlu1 %v151_v49, 256  ;;  %146 = vbcast.lane.b32.xlu0 %v144_v50, 256 }
  0x3c   :  { %1357 = vmatprep.subr.bf16.mxu0 %v4873_v61  ;;  %677 = vmatpush1.bf16.msra.mxu1 %v4256_v1 }
  0x3d   :  { %1398 = vmatprep.subr.bf16.mxu1 %v4877_v7 }
  0x3f   :  { %167 = vbcast.lane.b32.xlu1 %v165_v55, 256  ;;  %160 = vbcast.lane.b32.xlu0 %v158_v56, 256 }
  0x43   :  { %181 = vbcast.lane.b32.xlu1 %v179_v62, 256  ;;  %174 = vbcast.lane.b32.xlu0 %v172_v63, 256 }
  0x47   :  { %195 = vbcast.lane.b32.xlu1 %v193_v8, 256  ;;  %188 = vbcast.lane.b32.xlu0 %v186_v9, 256 }
  0x4b   :  { %1157 = vperm.xlu0 %4208, %v1155_v57  }
  0x95   :  { %v63_v3 = vpop.permute.xlu0 %62  ;;  %v77_v10 = vpop.permute.xlu1 %76 }
  0x96   :  { %vm197_vm0 = vcmp.eq.s32.totalorder %v63_v3, %v4884_v5  ;;  %vm199_vm3 = vcmp.eq.s32.totalorder %v77_v10, %v4884_v5 }
  0x99   :  { %v70_v11 = vpop.permute.xlu0 %69  ;;  %v84_v14 = vpop.permute.xlu1 %83 }
  0x9a   :  { %vm198_vm1 = vcmp.eq.s32.totalorder %v70_v11, %v4884_v5  ;;  %vm200_vm4 = vcmp.eq.s32.totalorder %v84_v14, %v4884_v5 }
  0x9b   :  { %vm4068_vm2 = vmpackc.low %vm198_vm1, %vm197_vm0 }
  0x9c   :  { %4069 = vmatmul.mubr.msk.bf16.vlgmr.msra.gmra.mxu0 %vm4068_vm2, %v4774_v13  ;;  %4089 = vmatmul.mubr.msk.bf16.vlgmr.msra.gmra.mxu1 %vm4068_vm2, %v4774_v13  ;;  %vm4070_vm5 = vmpackc.low %vm200_vm4, %vm199_vm3 }
  0x9d   :  { %1358 = vmatpush1.bf16.msra.mxu0 %v4886_v12  ;;  %571 = vmatprep.mubr.bf16.mxu0 %v6180_v2  ;;  %v98_v20 = vpop.permute.xlu1 %97  ;;  %v91_v21 = vpop.permute.xlu0 %90 }
  0x9e   :  { %704 = vmatprep.mubr.bf16.mxu1 %v6180_v2  ;;  %1359 = vmatprep.subr.bf16.mxu0 %v4890_v6  ;;  %vm202_vm6 = vcmp.eq.s32.totalorder %v98_v20, %v4884_v5  ;;  %vm201_vm7 = vcmp.eq.s32.totalorder %v91_v21, %v4884_v5 }
  0x9f   :  { %1399 = vmatpush1.bf16.msra.mxu1 %v4892_v4  ;;  %vm4072_vm8 = vmpackc.low %vm202_vm6, %vm201_vm7 }
  0xa0   :  { %1400 = vmatprep.subr.bf16.mxu1 %v4896_v0 }
  0xa1   :  { %1360 = vmatpush1.bf16.msra.mxu0 %v4900_v15  ;;  %v112_v30 = vpop.permute.xlu1 %111  ;;  %v105_v31 = vpop.permute.xlu0 %104 }
  0xa2   :  { %1361 = vmatprep.subr.bf16.mxu0 %v4904_v16  ;;  %vm204_vm9 = vcmp.eq.s32.totalorder %v112_v30, %v4884_v5  ;;  %vm203_vm10 = vcmp.eq.s32.totalorder %v105_v31, %v4884_v5 }
  0xa3   :  { %1401 = vmatpush1.bf16.msra.mxu1 %v4907_v17  ;;  %vm4074_vm11 = vmpackc.low %vm204_vm9, %vm203_vm10 }
  0xa4   :  { %4071 = vmatmul.mubr.msk.bf16.gmra.mxu0 %vm4070_vm5, %v4774_v13  ;;  %4091 = vmatmul.mubr.msk.bf16.gmra.mxu1 %vm4070_vm5, %v4774_v13 }
  0xa5   :  { %581 = vmatprep.mubr.bf16.mxu0 %v6180_v2  ;;  %714 = vmatprep.mubr.bf16.mxu1 %v6180_v2  ;;  %v126_v40 = vpop.permute.xlu1 %125  ;;  %v119_v41 = vpop.permute.xlu0 %118 }
  0xa6   :  { %1362 = vmatpush1.bf16.msra.mxu0 %v4914_v18  ;;  %1402 = vmatprep.subr.bf16.mxu1 %v4916_v19  ;;  %vm206_vm12 = vcmp.eq.s32.totalorder %v126_v40, %v4884_v5  ;;  %vm205_vm13 = vcmp.eq.s32.totalorder %v119_v41, %v4884_v5 }
  0xa7   :  { %1363 = vmatprep.subr.bf16.mxu0 %v4919_v22  ;;  %1403 = vmatpush1.bf16.msra.mxu1 %v4921_v23  ;;  %vm4076_vm14 = vmpackc.low %vm206_vm12, %vm205_vm13 }
  0xa8   :  { %1404 = vmatprep.subr.bf16.mxu1 %v4925_v24 }
  0xa9   :  { %v140_v47 = vpop.permute.xlu1 %139  ;;  %v133_v48 = vpop.permute.xlu0 %132 }
  0xaa   :  { %1364 = vmatpush1.bf16.msra.mxu0 %v4932_v25  ;;  %vm208_vm15 = vcmp.eq.s32.totalorder %v140_v47, %v4884_v5  ;;  %vm207_vm0 = vcmp.eq.s32.totalorder %v133_v48, %v4884_v5 }
  0xab   :  { %1365 = vmatprep.subr.bf16.mxu0 %v4937_v26  ;;  %1405 = vmatpush1.bf16.msra.mxu1 %v4939_v27  ;;  %vm4078_vm1 = vmpackc.low %vm208_vm15, %vm207_vm0 }
  0xac   :  { %4073 = vmatmul.mubr.msk.bf16.gmra.mxu0 %vm4072_vm8, %v4774_v13  ;;  %4093 = vmatmul.mubr.msk.bf16.gmra.mxu1 %vm4072_vm8, %v4774_v13 }
  0xad   :  { %591 = vmatprep.mubr.bf16.mxu0 %v6180_v2  ;;  %724 = vmatprep.mubr.bf16.mxu1 %v6180_v2  ;;  %v154_v49 = vpop.permute.xlu1 %153  ;;  %v147_v50 = vpop.permute.xlu0 %146 }
  0xae   :  { %1366 = vmatpush1.bf16.msra.mxu0 %v4943_v28  ;;  %1406 = vmatprep.subr.bf16.mxu1 %v4945_v29  ;;  %vm210_vm2 = vcmp.eq.s32.totalorder %v154_v49, %v4884_v5  ;;  %vm209_vm3 = vcmp.eq.s32.totalorder %v147_v50, %v4884_v5 }
  0xaf   :  { %1367 = vmatprep.subr.bf16.mxu0 %v4949_v32  ;;  %1407 = vmatpush1.bf16.msra.mxu1 %v4951_v33  ;;  %vm4080_vm4 = vmpackc.low %vm210_vm2, %vm209_vm3 }
  0xb0   :  { %1408 = vmatprep.subr.bf16.mxu1 %v4955_v34 }
  0xb1   :  { %v168_v51 = vpop.permute.xlu1 %167  ;;  %v161_v52 = vpop.permute.xlu0 %160 }
  0xb2   :  { %1368 = vmatpush1.bf16.msra.mxu0 %v4962_v35  ;;  %vm212_vm5 = vcmp.eq.s32.totalorder %v168_v51, %v4884_v5  ;;  %vm211_vm6 = vcmp.eq.s32.totalorder %v161_v52, %v4884_v5 }
  0xb3   :  { %1369 = vmatprep.subr.bf16.mxu0 %v4967_v36  ;;  %1409 = vmatpush1.bf16.msra.mxu1 %v4969_v37  ;;  %vm4082_vm7 = vmpackc.low %vm212_vm5, %vm211_vm6 }
  0xb4   :  { %4075 = vmatmul.mubr.msk.bf16.gmra.mxu0 %vm4074_vm11, %v4774_v13  ;;  %4095 = vmatmul.mubr.msk.bf16.gmra.mxu1 %vm4074_vm11, %v4774_v13 }
  0xb5   :  { %601 = vmatprep.mubr.bf16.mxu0 %v6180_v2  ;;  %734 = vmatprep.mubr.bf16.mxu1 %v6180_v2  ;;  %v182_v53 = vpop.permute.xlu1 %181  ;;  %v175_v54 = vpop.permute.xlu0 %174 }
  0xb6   :  { %1370 = vmatpush1.bf16.msra.mxu0 %v4973_v38  ;;  %1410 = vmatprep.subr.bf16.mxu1 %v4975_v39  ;;  %vm214_vm8 = vcmp.eq.s32.totalorder %v182_v53, %v4884_v5  ;;  %vm213_vm9 = vcmp.eq.s32.totalorder %v175_v54, %v4884_v5 }
  0xb7   :  { %1371 = vmatprep.subr.bf16.mxu0 %v4979_v42  ;;  %1411 = vmatpush1.bf16.msra.mxu1 %v4981_v43  ;;  %vm4084_vm10 = vmpackc.low %vm214_vm8, %vm213_vm9 }
  0xb8   :  { %1412 = vmatprep.subr.bf16.mxu1 %v4985_v44 }
  0xb9   :  { %v196_v55 = vpop.permute.xlu1 %195  ;;  %v189_v56 = vpop.permute.xlu0 %188 }
  0xba   :  { %1372 = vmatpush1.bf16.msra.mxu0 %v4992_v45  ;;  %vm216_vm11 = vcmp.eq.s32.totalorder %v196_v55, %v4884_v5  ;;  %vm215_vm12 = vcmp.eq.s32.totalorder %v189_v56, %v4884_v5 }
  0xbb   :  { %1413 = vmatpush1.bf16.msra.mxu1 %v4997_v46  ;;  %1477 = vmatprep.subr.bf16.mxu0 %v4873_v61  ;;  %vm4086_vm13 = vmpackc.low %vm216_vm11, %vm215_vm12 }
  0xbc   :  { %4077 = vmatmul.mubr.msk.bf16.gmra.mxu0 %vm4076_vm14, %v4774_v13  ;;  %4097 = vmatmul.mubr.msk.bf16.gmra.mxu1 %vm4076_vm14, %v4774_v13 }
  0xbd   :  { %611 = vmatprep.mubr.bf16.mxu0 %v6180_v2  ;;  %744 = vmatprep.mubr.bf16.mxu1 %v6180_v2 }
  0xbe   :  { %1518 = vmatprep.subr.bf16.mxu1 %v4877_v7 }
  0xc4   :  { %4079 = vmatmul.mubr.msk.bf16.gmra.mxu0 %vm4078_vm1, %v4774_v13  ;;  %4099 = vmatmul.mubr.msk.bf16.gmra.mxu1 %vm4078_vm1, %v4774_v13 }
  0xc5   :  { %621 = vmatprep.mubr.bf16.mxu0 %v6180_v2  ;;  %754 = vmatprep.mubr.bf16.mxu1 %v6180_v2 }
  0xcc   :  { %4081 = vmatmul.mubr.msk.bf16.gmra.mxu0 %vm4080_vm4, %v4774_v13  ;;  %4101 = vmatmul.mubr.msk.bf16.gmra.mxu1 %vm4080_vm4, %v4774_v13 }
  0xcd   :  { %631 = vmatprep.mubr.bf16.mxu0 %v6180_v2  ;;  %764 = vmatprep.mubr.bf16.mxu1 %v6180_v2 }
  0xd4   :  { %4083 = vmatmul.mubr.msk.bf16.gmra.mxu0 %vm4082_vm7, %v4774_v13  ;;  %4103 = vmatmul.mubr.msk.bf16.gmra.mxu1 %vm4082_vm7, %v4774_v13 }
  0xd5   :  { %641 = vmatprep.mubr.bf16.mxu0 %v6180_v2  ;;  %774 = vmatprep.mubr.bf16.mxu1 %v6180_v2 }
  0xdc   :  { %4085 = vmatmul.mubr.msk.bf16.gmra.mxu0 %vm4084_vm10, %v4774_v13  ;;  %4105 = vmatmul.mubr.msk.bf16.gmra.mxu1 %vm4084_vm10, %v4774_v13 }
  0xdd   :  { %651 = vmatprep.mubr.bf16.mxu0 %v6180_v2  ;;  %784 = vmatprep.mubr.bf16.mxu1 %v6180_v2 }
  0xe4   :  { %4087 = vmatmul.mubr.msk.bf16.gmra.mxu0 %vm4086_vm13, %v4774_v13  ;;  %4107 = vmatmul.mubr.msk.bf16.gmra.mxu1 %vm4086_vm13, %v4774_v13 }
  0xe5   :  { %1389 = vmatprep.mubr.bf16.mxu0 %v6180_v2  ;;  %1430 = vmatprep.mubr.bf16.mxu1 %v6180_v2 }
  0xec   :  { %1390 = vmatmul.mubr.bf16.vlgmr.msra.gmra.mxu0 %v6180_v2  ;;  %1431 = vmatmul.mubr.bf16.vlgmr.msra.gmra.mxu1 %v6180_v2 }
  0xed   :  { %1478 = vmatpush1.bf16.msra.mxu0 %v4886_v12  ;;  %1519 = vmatpush1.bf16.msra.mxu1 %v4892_v4 }
  0xee   :  { %1479 = vmatprep.subr.bf16.mxu0 %v4890_v6  ;;  %1520 = vmatprep.subr.bf16.mxu1 %v4896_v0 }
  0xef   :  { %1509 = vmatprep.mubr.bf16.mxu0 %v6180_v2  ;;  %1550 = vmatprep.mubr.bf16.mxu1 %v6180_v2 }
  0xf1   :  { %1480 = vmatpush1.bf16.msra.mxu0 %v4900_v15  ;;  %1521 = vmatpush1.bf16.msra.mxu1 %v4907_v17 }
  0xf2   :  { %1481 = vmatprep.subr.bf16.mxu0 %v4904_v16  ;;  %1522 = vmatprep.subr.bf16.mxu1 %v4916_v19 }
  0xf5   :  { %1482 = vmatpush1.bf16.msra.mxu0 %v4914_v18  ;;  %1523 = vmatpush1.bf16.msra.mxu1 %v4921_v23 }
  0xf6   :  { %1483 = vmatprep.subr.bf16.mxu0 %v4919_v22  ;;  %1524 = vmatprep.subr.bf16.mxu1 %v4925_v24 }
  0xf9   :  { %1484 = vmatpush1.bf16.msra.mxu0 %v4932_v25  ;;  %1525 = vmatpush1.bf16.msra.mxu1 %v4939_v27 }
  0xfa   :  { %1485 = vmatprep.subr.bf16.mxu0 %v4937_v26  ;;  %1526 = vmatprep.subr.bf16.mxu1 %v4945_v29 }
  0xfd   :  { %1486 = vmatpush1.bf16.msra.mxu0 %v4943_v28  ;;  %1527 = vmatpush1.bf16.msra.mxu1 %v4951_v33 }
  0xfe   :  { %1487 = vmatprep.subr.bf16.mxu0 %v4949_v32  ;;  %1528 = vmatprep.subr.bf16.mxu1 %v4955_v34 }
 0x101   :  { %1488 = vmatpush1.bf16.msra.mxu0 %v4962_v35  ;;  %1529 = vmatpush1.bf16.msra.mxu1 %v4969_v37 }
 0x102   :  { %1489 = vmatprep.subr.bf16.mxu0 %v4967_v36  ;;  %1530 = vmatprep.subr.bf16.mxu1 %v4975_v39 }
 0x105   :  { %1490 = vmatpush1.bf16.msra.mxu0 %v4973_v38  ;;  %1531 = vmatpush1.bf16.msra.mxu1 %v4981_v43 }
 0x106   :  { %1491 = vmatprep.subr.bf16.mxu0 %v4979_v42  ;;  %1532 = vmatprep.subr.bf16.mxu1 %v4985_v44 }
 0x109   :  { %1492 = vmatpush1.bf16.msra.mxu0 %v4992_v45  ;;  %1533 = vmatpush1.bf16.msra.mxu1 %v4997_v46 }
 0x10a   :  { %1597 = vmatprep.subr.bf16.mxu0 %v4873_v61  ;;  %1638 = vmatprep.subr.bf16.mxu1 %v4877_v7 }
 0x15c   :  { %v563_v58 = vpop.f32.mrf.mxu0  ;;  %v696_v59 = vpop.f32.mrf.mxu1 }
 0x15e   :  { %v565_v60 = vpop.f32.mrf.mxu0  ;;  %v698_v62 = vpop.f32.mrf.mxu1 }
 0x15f   :  { %v5077_v63 = vpack.c.bf16 %v565_v60, %v563_v58  ;;  %v5079_v1 = vpack.c.bf16 %v698_v62, %v696_v59 }
 0x160   :  { %v5081_v8 = vpop.f32.mrf.mxu0  ;;  %v5083_v9 = vpop.f32.mrf.mxu1 }
 0x162   :  { %v5085_v3 = vpop.f32.mrf.mxu0  ;;  %v5087_v5 = vpop.f32.mrf.mxu1 }
 0x164   :  { %v573_v10 = vpop.f32.mrf.mxu0  ;;  %v706_v11 = vpop.f32.mrf.mxu1 }
 0x166   :  { %v575_v13 = vpop.f32.mrf.mxu0  ;;  %v708_v14 = vpop.f32.mrf.mxu1 }
 0x167   :  { %v5089_v20 = vpack.c.bf16 %v575_v13, %v573_v10  ;;  %v5091_v21 = vpack.c.bf16 %v708_v14, %v706_v11 }
 0x168   :  { %v5093_v30 = vpop.f32.mrf.mxu0  ;;  %v5095_v31 = vpop.f32.mrf.mxu1 }
 0x16a   :  { %v5097_v40 = vpop.f32.mrf.mxu0  ;;  %v5099_v41 = vpop.f32.mrf.mxu1 }
 0x16c   :  { %v5101_v47 = vpop.f32.mrf.mxu0  ;;  %v716_v48 = vpop.f32.mrf.mxu1 }
 0x16e   :  { %v5103_v49 = vpop.f32.mrf.mxu0  ;;  %v718_v50 = vpop.f32.mrf.mxu1 }
 0x16f   :  { %6213 = vst [vmem:[#allocation9_spill] sm:$0xff] %v5103_v49  ;;  %v5105_v51 = vpack.c.bf16 %v718_v50, %v716_v48 }
 0x170   :  { %v587_v52 = vpop.f32.mrf.mxu0  ;;  %v720_v53 = vpop.f32.mrf.mxu1 }
 0x171   :  { %6214 = vst [vmem:[#allocation10_spill] sm:$0xff] %v5105_v51 }
 0x172   :  { %v589_v54 = vpop.f32.mrf.mxu0  ;;  %v722_v55 = vpop.f32.mrf.mxu1 }
 0x173   :  { %v5107_v56 = vpack.c.bf16 %v589_v54, %v587_v52  ;;  %v5109_v57 = vpack.c.bf16 %v722_v55, %v720_v53 }
 0x174   :  { %v593_v58 = vpop.f32.mrf.mxu0  ;;  %v726_v59 = vpop.f32.mrf.mxu1 }
 0x175   :  { %6215 = vst [vmem:[#allocation11_spill] sm:$0xff] %v5107_v56  ;;  %6216 = vst [vmem:[#allocation12_spill] sm:$0xff] %v5109_v57 }
 0x176   :  { %v595_v60 = vpop.f32.mrf.mxu0  ;;  %v728_v62 = vpop.f32.mrf.mxu1 }
 0x177   :  { %v5111_v10 = vpack.c.bf16 %v595_v60, %v593_v58  ;;  %v5113_v11 = vpack.c.bf16 %v728_v62, %v726_v59 }
 0x178   :  { %v597_v13 = vpop.f32.mrf.mxu0  ;;  %v730_v14 = vpop.f32.mrf.mxu1 }
 0x179   :  { %6217 = vst [vmem:[#allocation13_spill] sm:$0xff] %v5111_v10  ;;  %6218 = vst [vmem:[#allocation14_spill] sm:$0xff] %v5113_v11 }
 0x17a   :  { %v599_v48 = vpop.f32.mrf.mxu0  ;;  %v732_v50 = vpop.f32.mrf.mxu1 }
 0x17b   :  { %v5115_v2 = vpack.c.bf16 %v599_v48, %v597_v13  ;;  %v5117_v51 = vpack.c.bf16 %v732_v50, %v730_v14 }
 0x17c   :  { %v603_v52 = vpop.f32.mrf.mxu0  ;;  %v736_v54 = vpop.f32.mrf.mxu1 }
 0x17d   :  { %6219 = vst [vmem:[#allocation15_spill] sm:$0xff] %v5115_v2  ;;  %6220 = vst [vmem:[#allocation16_spill] sm:$0xff] %v5117_v51 }
 0x17e   :  { %v605_v53 = vpop.f32.mrf.mxu0  ;;  %v738_v55 = vpop.f32.mrf.mxu1 }
 0x17f   :  { %v5119_v57 = vpack.c.bf16 %v605_v53, %v603_v52  ;;  %v5121_v56 = vpack.c.bf16 %v738_v55, %v736_v54 }
 0x180   :  { %v607_v58 = vpop.f32.mrf.mxu0  ;;  %v740_v60 = vpop.f32.mrf.mxu1 }
 0x181   :  { %6221 = vst [vmem:[#allocation17_spill] sm:$0xff] %v5119_v57  ;;  %6222 = vst [vmem:[#allocation18_spill] sm:$0xff] %v5121_v56 }
 0x182   :  { %v609_v59 = vpop.f32.mrf.mxu0  ;;  %v742_v62 = vpop.f32.mrf.mxu1 }
 0x183   :  { %v5123_v11 = vpack.c.bf16 %v609_v59, %v607_v58  ;;  %v5125_v10 = vpack.c.bf16 %v742_v62, %v740_v60 }
 0x184   :  { %v613_v13 = vpop.f32.mrf.mxu0  ;;  %v746_v48 = vpop.f32.mrf.mxu1 }
 0x185   :  { %6223 = vst [vmem:[#allocation19_spill] sm:$0xff] %v5123_v11  ;;  %6224 = vst [vmem:[#allocation20_spill] sm:$0xff] %v5125_v10 }
 0x186   :  { %v615_v14 = vpop.f32.mrf.mxu0  ;;  %v748_v50 = vpop.f32.mrf.mxu1 }
 0x187   :  { %v5127_v51 = vpack.c.bf16 %v615_v14, %v613_v13  ;;  %v5129_v2 = vpack.c.bf16 %v748_v50, %v746_v48 }
 0x188   :  { %v617_v52 = vpop.f32.mrf.mxu0  ;;  %v750_v53 = vpop.f32.mrf.mxu1 }
 0x189   :  { %6225 = vst [vmem:[#allocation21_spill] sm:$0xff] %v5127_v51  ;;  %6226 = vst [vmem:[#allocation22_spill] sm:$0xff] %v5129_v2 }
 0x18a   :  { %v619_v54 = vpop.f32.mrf.mxu0  ;;  %v752_v55 = vpop.f32.mrf.mxu1 }
 0x18b   :  { %v5131_v56 = vpack.c.bf16 %v619_v54, %v617_v52  ;;  %v5133_v57 = vpack.c.bf16 %v752_v55, %v750_v53 }
 0x18c   :  { %v623_v58 = vpop.f32.mrf.mxu0  ;;  %v756_v59 = vpop.f32.mrf.mxu1 }
 0x18d   :  { %6227 = vst [vmem:[#allocation23_spill] sm:$0xff] %v5131_v56  ;;  %6228 = vst [vmem:[#allocation24_spill] sm:$0xff] %v5133_v57 }
 0x18e   :  { %v625_v60 = vpop.f32.mrf.mxu0  ;;  %v758_v62 = vpop.f32.mrf.mxu1 }
 0x18f   :  { %v5135_v10 = vpack.c.bf16 %v625_v60, %v623_v58  ;;  %v5137_v11 = vpack.c.bf16 %v758_v62, %v756_v59 }
 0x190   :  { %v627_v13 = vpop.f32.mrf.mxu0  ;;  %v760_v14 = vpop.f32.mrf.mxu1 }
 0x191   :  { %6229 = vst [vmem:[#allocation25_spill] sm:$0xff] %v5135_v10  ;;  %6230 = vst [vmem:[#allocation26_spill] sm:$0xff] %v5137_v11 }
 0x192   :  { %v629_v48 = vpop.f32.mrf.mxu0  ;;  %v762_v50 = vpop.f32.mrf.mxu1 }
 0x193   :  { %v5139_v2 = vpack.c.bf16 %v629_v48, %v627_v13  ;;  %v5141_v51 = vpack.c.bf16 %v762_v50, %v760_v14 }
 0x194   :  { %v633_v52 = vpop.f32.mrf.mxu0  ;;  %v766_v54 = vpop.f32.mrf.mxu1 }
 0x195   :  { %6231 = vst [vmem:[#allocation27_spill] sm:$0xff] %v5139_v2  ;;  %6232 = vst [vmem:[#allocation28_spill] sm:$0xff] %v5141_v51 }
 0x196   :  { %v635_v53 = vpop.f32.mrf.mxu0  ;;  %v768_v55 = vpop.f32.mrf.mxu1 }
 0x197   :  { %v5143_v57 = vpack.c.bf16 %v635_v53, %v633_v52  ;;  %v5145_v56 = vpack.c.bf16 %v768_v55, %v766_v54 }
 0x198   :  { %v637_v58 = vpop.f32.mrf.mxu0  ;;  %v770_v60 = vpop.f32.mrf.mxu1 }
 0x199   :  { %6233 = vst [vmem:[#allocation29_spill] sm:$0xff] %v5143_v57  ;;  %6234 = vst [vmem:[#allocation30_spill] sm:$0xff] %v5145_v56 }
 0x19a   :  { %v639_v59 = vpop.f32.mrf.mxu0  ;;  %v772_v62 = vpop.f32.mrf.mxu1 }
 0x19b   :  { %v5147_v11 = vpack.c.bf16 %v639_v59, %v637_v58  ;;  %v5149_v10 = vpack.c.bf16 %v772_v62, %v770_v60 }
 0x19c   :  { %v643_v13 = vpop.f32.mrf.mxu0  ;;  %v776_v48 = vpop.f32.mrf.mxu1 }
 0x19d   :  { %6235 = vst [vmem:[#allocation31_spill] sm:$0xff] %v5147_v11  ;;  %6236 = vst [vmem:[#allocation32_spill] sm:$0xff] %v5149_v10 }
 0x19e   :  { %v645_v14 = vpop.f32.mrf.mxu0  ;;  %v778_v50 = vpop.f32.mrf.mxu1 }
 0x19f   :  { %v5151_v51 = vpack.c.bf16 %v645_v14, %v643_v13  ;;  %v5153_v2 = vpack.c.bf16 %v778_v50, %v776_v48 }
 0x1a0   :  { %v647_v52 = vpop.f32.mrf.mxu0  ;;  %v780_v53 = vpop.f32.mrf.mxu1 }
 0x1a1   :  { %6237 = vst [vmem:[#allocation33_spill] sm:$0xff] %v5151_v51  ;;  %6238 = vst [vmem:[#allocation34_spill] sm:$0xff] %v5153_v2 }
 0x1a2   :  { %v649_v54 = vpop.f32.mrf.mxu0  ;;  %v782_v55 = vpop.f32.mrf.mxu1 }
 0x1a3   :  { %v5155_v56 = vpack.c.bf16 %v649_v54, %v647_v52  ;;  %v5157_v57 = vpack.c.bf16 %v782_v55, %v780_v53  ;;  %v1193_v52 = vunpack.c.l.bf16 %v5077_v63 }
 0x1a4   :  { %v653_v58 = vpop.f32.mrf.mxu0  ;;  %v786_v59 = vpop.f32.mrf.mxu1 }
 0x1a5   :  { %6239 = vst [vmem:[#allocation35_spill] sm:$0xff] %v5155_v56  ;;  %6240 = vst [vmem:[#allocation36_spill] sm:$0xff] %v5157_v57  ;;  %v1194_v57 = vunpack.c.h.bf16 %v5077_v63 }
 0x1a6   :  { %v655_v60 = vpop.f32.mrf.mxu0  ;;  %v788_v62 = vpop.f32.mrf.mxu1 }
 0x1a7   :  { %v5159_v10 = vpack.c.bf16 %v655_v60, %v653_v58  ;;  %v5161_v11 = vpack.c.bf16 %v788_v62, %v786_v59 }
 0x1a8   :  { %v657_v13 = vpop.f32.mrf.mxu0  ;;  %v790_v14 = vpop.f32.mrf.mxu1 }
 0x1a9   :  { %6241 = vst [vmem:[#allocation37_spill] sm:$0xff] %v5159_v10  ;;  %6242 = vst [vmem:[#allocation38_spill] sm:$0xff] %v5161_v11 }
 0x1aa   :  { %v659_v48 = vpop.f32.mrf.mxu0  ;;  %v792_v50 = vpop.f32.mrf.mxu1 }
 0x1ab   :  { %v5163_v2 = vpack.c.bf16 %v659_v48, %v657_v13  ;;  %v5165_v51 = vpack.c.bf16 %v792_v50, %v790_v14  ;;  %v1196_v14 = vunpack.c.h.bf16 %v5079_v1  ;;  %v1195_v50 = vunpack.c.l.bf16 %v5079_v1 }
 0x1ac   :  { %v1391_v53 = vpop.f32.mrf.mxu0  ;;  %v1432_v54 = vpop.f32.mrf.mxu1 }
 0x1ad   :  { %6243 = vst [vmem:[#allocation39_spill] sm:$0xff] %v5163_v2  ;;  %6244 = vst [vmem:[#allocation40_spill] sm:$0xff] %v5165_v51  ;;  %v1439_v55 = vadd.f32 %v1391_v53, %v1193_v52  ;;  %v1441_v51 = vadd.f32 %v1432_v54, %v1195_v50 }
 0x1ae   :  { %v1393_v56 = vpop.f32.mrf.mxu0  ;;  %v1434_v58 = vpop.f32.mrf.mxu1 }
 0x1af   :  { %v3997_v60 = vmul.f32 -1.442695, %v1439_v55  ;;  %v1440_v59 = vadd.f32 %v1393_v56, %v1194_v57  ;;  %v1442_v48 = vadd.f32 %v1434_v58, %v1196_v14 }
 0x1b0   :  { %v1395_v62 = vpop.f32.mrf.mxu0  ;;  %v1436_v11 = vpop.f32.mrf.mxu1 }
 0x1b1   :  { %4305 = vpow2.f32 %v3997_v60  ;;  %v3998_v10 = vmul.f32 -1.442695, %v1440_v59  ;;  %v3999_v52 = vmul.f32 -1.442695, %v1442_v48  ;;  %v6245_v62 = vmov 0  }
 0x1b2   :  { %v1396_v49 = vpop.f32.mrf.mxu0  ;;  %v1437_v13 = vpop.f32.mrf.mxu1 }
 0x1b3   :  { %4307 = vpow2.f32 %v3998_v10  ;;  %v4110_v13 = vpack.c.bf16 %v5085_v3, %v5081_v8 }
 0x1b4   :  { %4309 = vtanh.f32 %v1441_v51 }
 0x1b5   :  { %4311 = vpow2.f32 %v3999_v52  ;;  %v1472_v14 = vunpack.c.l.bf16 %v4110_v13 }
 0x1be   :  { %v4306_v53 = vpop.eup %4305 }
 0x1bf   :  { %v1446_v63 = vadd.f32 1.0, %v4306_v53  ;;  %v1473_v53 = vunpack.c.h.bf16 %v4110_v13 }
 0x1c0   :  { %v4308_v2 = vpop.eup %4307 }
 0x1c1   :  { %4313 = vrcp.f32 %v1446_v63  ;;  %v1452_v56 = vadd.f32 1.0, %v4308_v2  ;;  %v4310_v57 = vpop.eup %4309 }
 0x1c2   :  { %v4312_v11 = vpop.eup %4311 }
 0x1c3   :  { %4315 = vrcp.f32 %v1452_v56  ;;  %v1459_v60 = vadd.f32 1.0, %v4312_v11 }
 0x1c5   :  { %4317 = vrcp.f32 %v1459_v60  ;;  %v4111_v60 = vpack.c.bf16 %v5087_v5, %v5083_v9 }
 0x1c7   :  { %v1475_v8 = vunpack.c.h.bf16 %v4111_v60 }
 0x1ce   :  { %v4314_v49 = vpop.eup %4313 }
 0x1cf   :  { %v1463_v55 = vmul.f32 %v4314_v49, %v4310_v57 }
 0x1d0   :  { %v4316_v10 = vpop.eup %4315 }
 0x1d1   :  { %v1462_v59 = vmul.f32 0.0, %v4316_v10 }
 0x1d2   :  { %v4318_v1 = vpop.eup %4317 }
 0x1d3   :  { %v5171_v58 = vadd.f32 %v1463_v55, %v1462_v59 }
 0x1d5   :  { %4319 = vtanh.f32 %v5171_v58 }
 0x1e2   :  { %v4320_v54 = vpop.eup %4319 }
 0x1e3   :  { %v5174_v51 = vmul.f32 %v4320_v54, %v4318_v1  ;;  %v1474_v54 = vunpack.c.l.bf16 %v4111_v60 }
 0x1e5   :  { %v1476_v2 = vpack.c.bf16 %v5174_v51, %v5174_v51 }
 0x1e7   :  { %1510 = vmatmul.mubr.bf16.vlgmr.msra.gmra.mxu0 %v1476_v2  ;;  %1551 = vmatmul.mubr.bf16.vlgmr.msra.gmra.mxu1 %v1476_v2 }
 0x1e8   :  { %1598 = vmatpush1.bf16.msra.mxu0 %v4886_v12  ;;  %1639 = vmatpush1.bf16.msra.mxu1 %v4892_v4 }
 0x1e9   :  { %1599 = vmatprep.subr.bf16.mxu0 %v4890_v6  ;;  %1640 = vmatprep.subr.bf16.mxu1 %v4896_v0 }
 0x1ea   :  { %1629 = vmatprep.mubr.bf16.mxu0 %v6245_v62  ;;  %1670 = vmatprep.mubr.bf16.mxu1 %v6245_v62 }
 0x1ec   :  { %1600 = vmatpush1.bf16.msra.mxu0 %v4900_v15  ;;  %1641 = vmatpush1.bf16.msra.mxu1 %v4907_v17 }
 0x1ed   :  { %1601 = vmatprep.subr.bf16.mxu0 %v4904_v16  ;;  %1642 = vmatprep.subr.bf16.mxu1 %v4916_v19 }
 0x1f0   :  { %1602 = vmatpush1.bf16.msra.mxu0 %v4914_v18  ;;  %1643 = vmatpush1.bf16.msra.mxu1 %v4921_v23 }
 0x1f1   :  { %1603 = vmatprep.subr.bf16.mxu0 %v4919_v22  ;;  %1644 = vmatprep.subr.bf16.mxu1 %v4925_v24 }
 0x1f4   :  { %1604 = vmatpush1.bf16.msra.mxu0 %v4932_v25  ;;  %1645 = vmatpush1.bf16.msra.mxu1 %v4939_v27 }
 0x1f5   :  { %1605 = vmatprep.subr.bf16.mxu0 %v4937_v26  ;;  %1646 = vmatprep.subr.bf16.mxu1 %v4945_v29 }
 0x1f8   :  { %1606 = vmatpush1.bf16.msra.mxu0 %v4943_v28  ;;  %1647 = vmatpush1.bf16.msra.mxu1 %v4951_v33 }
 0x1f9   :  { %1607 = vmatprep.subr.bf16.mxu0 %v4949_v32  ;;  %1648 = vmatprep.subr.bf16.mxu1 %v4955_v34 }
 0x1fc   :  { %1608 = vmatpush1.bf16.msra.mxu0 %v4962_v35  ;;  %1649 = vmatpush1.bf16.msra.mxu1 %v4969_v37 }
 0x1fd   :  { %1609 = vmatprep.subr.bf16.mxu0 %v4967_v36  ;;  %1650 = vmatprep.subr.bf16.mxu1 %v4975_v39 }
 0x200   :  { %1610 = vmatpush1.bf16.msra.mxu0 %v4973_v38  ;;  %1651 = vmatpush1.bf16.msra.mxu1 %v4981_v43 }
 0x201   :  { %1611 = vmatprep.subr.bf16.mxu0 %v4979_v42  ;;  %1652 = vmatprep.subr.bf16.mxu1 %v4985_v44 }
 0x204   :  { %1612 = vmatpush1.bf16.msra.mxu0 %v4992_v45  ;;  %1653 = vmatpush1.bf16.msra.mxu1 %v4997_v46 }
 0x205   :  { %1717 = vmatprep.subr.bf16.mxu0 %v4873_v61  ;;  %1758 = vmatprep.subr.bf16.mxu1 %v4877_v7 }
 0x2a7   :  { %v1511_v48 = vpop.f32.mrf.mxu0  ;;  %v1552_v50 = vpop.f32.mrf.mxu1 }
 0x2a8   :  { %v1559_v52 = vadd.f32 %v1511_v48, %v1472_v14  ;;  %v1561_v2 = vadd.f32 %v1552_v50, %v1474_v54  ;;  %v5220_v50 = vpop.permute.xlu0 %1157  ;;  %v1593_v54 = vunpack.c.h.bf16 %v5089_v20 }
 0x2a9   :  { %v1513_v63 = vpop.f32.mrf.mxu0  ;;  %v1554_v56 = vpop.f32.mrf.mxu1  ;;  %vm1467_vm14 = vcmp.eq.s32.totalorder %v5220_v50, 0  ;;  %vm1587_vm15 = vcmp.eq.s32.totalorder %v5220_v50, 1  ;;  %vm1707_vm0 = vcmp.eq.s32.totalorder %v5220_v50, 2  ;;  %vm1827_vm1 = vcmp.eq.s32.totalorder %v5220_v50, 3 }
 0x2aa   :  { %v4000_v57 = vmul.f32 -1.442695, %v1559_v52  ;;  %v1560_v11 = vadd.f32 %v1513_v63, %v1473_v53  ;;  %v1562_v3 = vadd.f32 %v1554_v56, %v1475_v8  ;;  %vm1947_vm2 = vcmp.eq.s32.totalorder %v5220_v50, 4 }
 0x2ab   :  { %v1515_v49 = vpop.f32.mrf.mxu0  ;;  %v1556_v55 = vpop.f32.mrf.mxu1  ;;  %vm2067_vm3 = vcmp.eq.s32.totalorder %v5220_v50, 5  ;;  %vm2187_vm4 = vcmp.eq.s32.totalorder %v5220_v50, 6  ;;  %vm2307_vm5 = vcmp.eq.s32.totalorder %v5220_v50, 7  ;;  %vm2427_vm6 = vcmp.eq.s32.totalorder %v5220_v50, 8 }
 0x2ac   :  { %4321 = vpow2.f32 %v4000_v57  ;;  %v4001_v10 = vmul.f32 -1.442695, %v1560_v11  ;;  %v4002_v14 = vmul.f32 -1.442695, %v1562_v3  ;;  %vm2547_vm7 = vcmp.eq.s32.totalorder %v5220_v50, 9 }
 0x2ad   :  { %v1516_v59 = vpop.f32.mrf.mxu0  ;;  %v1557_v1 = vpop.f32.mrf.mxu1  ;;  %vm2667_vm8 = vcmp.eq.s32.totalorder %v5220_v50, 10  ;;  %vm2787_vm9 = vcmp.eq.s32.totalorder %v5220_v50, 11  ;;  %vm2907_vm10 = vcmp.eq.s32.totalorder %v5220_v50, 12  ;;  %vm3027_vm11 = vcmp.eq.s32.totalorder %v5220_v50, 13 }
 0x2ae   :  { %4323 = vpow2.f32 %v4001_v10  ;;  %v1468_v1 = vsel %vm1467_vm14, %v5174_v51, 0.0  ;;  %vm3147_vm12 = vcmp.eq.s32.totalorder %v5220_v50, 14  ;;  %vm3267_vm13 = vcmp.eq.s32.totalorder %v5220_v50, 15 }
 0x2af   :  { %4325 = vtanh.f32 %v1561_v2  ;;  %vm3387_vm14 = vcmp.eq.s32.totalorder %v5220_v50, 16 }
 0x2b0   :  { %4327 = vpow2.f32 %v4002_v14 }
 0x2b9   :  { %v4322_v13 = vpop.eup %4321 }
 0x2ba   :  { %v1566_v48 = vadd.f32 1.0, %v4322_v13 }
 0x2bb   :  { %v4324_v52 = vpop.eup %4323 }
 0x2bc   :  { %4329 = vrcp.f32 %v1566_v48  ;;  %v1572_v53 = vadd.f32 1.0, %v4324_v52  ;;  %v4326_v63 = vpop.eup %4325 }
 0x2bd   :  { %v4328_v57 = vpop.eup %4327 }
 0x2be   :  { %4331 = vrcp.f32 %v1572_v53  ;;  %v1579_v49 = vadd.f32 1.0, %v4328_v57 }
 0x2c0   :  { %4333 = vrcp.f32 %v1579_v49 }
 0x2c9   :  { %v4330_v11 = vpop.eup %4329 }
 0x2ca   :  { %v1583_v9 = vmul.f32 %v4330_v11, %v4326_v63 }
 0x2cb   :  { %v4332_v5 = vpop.eup %4331 }
 0x2cc   :  { %v1582_v55 = vmul.f32 %v4332_v5, %v5171_v58 }
 0x2cd   :  { %v4334_v10 = vpop.eup %4333 }
 0x2ce   :  { %v5217_v56 = vadd.f32 %v1583_v9, %v1582_v55  ;;  %v1594_v9 = vunpack.c.l.bf16 %v5091_v21 }
 0x2d0   :  { %4335 = vtanh.f32 %v5217_v56 }
 0x2dd   :  { %v4336_v60 = vpop.eup %4335 }
 0x2de   :  { %v1586_v59 = vmul.f32 %v4336_v60, %v4334_v10 }
 0x2e0   :  { %v5225_v8 = vsel %vm1587_vm15, %v1586_v59, %v1468_v1  ;;  %v1596_v3 = vpack.c.bf16 %v1586_v59, %v1586_v59  ;;  %vm3507_vm15 = vcmp.eq.s32.totalorder %v5220_v50, 17 }
 0x2e2   :  { %1630 = vmatmul.mubr.bf16.vlgmr.msra.gmra.mxu0 %v1596_v3  ;;  %1671 = vmatmul.mubr.bf16.vlgmr.msra.gmra.mxu1 %v1596_v3 }
 0x2e3   :  { %1718 = vmatpush1.bf16.msra.mxu0 %v4886_v12  ;;  %1759 = vmatpush1.bf16.msra.mxu1 %v4892_v4  ;;  %v1592_v12 = vunpack.c.l.bf16 %v5089_v20 }
 0x2e4   :  { %1719 = vmatprep.subr.bf16.mxu0 %v4890_v6  ;;  %1760 = vmatprep.subr.bf16.mxu1 %v4896_v0 }
 0x2e5   :  { %1749 = vmatprep.mubr.bf16.mxu0 %v6245_v62  ;;  %1790 = vmatprep.mubr.bf16.mxu1 %v6245_v62 }
 0x2e7   :  { %1720 = vmatpush1.bf16.msra.mxu0 %v4900_v15  ;;  %1761 = vmatpush1.bf16.msra.mxu1 %v4907_v17 }
 0x2e8   :  { %1721 = vmatprep.subr.bf16.mxu0 %v4904_v16  ;;  %1762 = vmatprep.subr.bf16.mxu1 %v4916_v19 }
 0x2eb   :  { %1722 = vmatpush1.bf16.msra.mxu0 %v4914_v18  ;;  %1763 = vmatpush1.bf16.msra.mxu1 %v4921_v23 }
 0x2ec   :  { %1723 = vmatprep.subr.bf16.mxu0 %v4919_v22  ;;  %1764 = vmatprep.subr.bf16.mxu1 %v4925_v24 }
 0x2ef   :  { %1724 = vmatpush1.bf16.msra.mxu0 %v4932_v25  ;;  %1765 = vmatpush1.bf16.msra.mxu1 %v4939_v27 }
 0x2f0   :  { %1725 = vmatprep.subr.bf16.mxu0 %v4937_v26  ;;  %1766 = vmatprep.subr.bf16.mxu1 %v4945_v29 }
 0x2f3   :  { %1726 = vmatpush1.bf16.msra.mxu0 %v4943_v28  ;;  %1767 = vmatpush1.bf16.msra.mxu1 %v4951_v33 }
 0x2f4   :  { %1727 = vmatprep.subr.bf16.mxu0 %v4949_v32  ;;  %1768 = vmatprep.subr.bf16.mxu1 %v4955_v34 }
 0x2f7   :  { %1728 = vmatpush1.bf16.msra.mxu0 %v4962_v35  ;;  %1769 = vmatpush1.bf16.msra.mxu1 %v4969_v37 }
 0x2f8   :  { %1729 = vmatprep.subr.bf16.mxu0 %v4967_v36  ;;  %1770 = vmatprep.subr.bf16.mxu1 %v4975_v39 }
 0x2fb   :  { %1730 = vmatpush1.bf16.msra.mxu0 %v4973_v38  ;;  %1771 = vmatpush1.bf16.msra.mxu1 %v4981_v43 }
 0x2fc   :  { %1731 = vmatprep.subr.bf16.mxu0 %v4979_v42  ;;  %1772 = vmatprep.subr.bf16.mxu1 %v4985_v44 }
 0x2ff   :  { %1732 = vmatpush1.bf16.msra.mxu0 %v4992_v45  ;;  %1773 = vmatpush1.bf16.msra.mxu1 %v4997_v46 }
 0x300   :  { %1837 = vmatprep.subr.bf16.mxu0 %v4873_v61  ;;  %1878 = vmatprep.subr.bf16.mxu1 %v4877_v7  ;;  %v1595_v61 = vunpack.c.h.bf16 %v5091_v21 }
 0x3a2   :  { %v1631_v6 = vpop.f32.mrf.mxu0  ;;  %v1672_v58 = vpop.f32.mrf.mxu1 }
 0x3a3   :  { %v1679_v51 = vadd.f32 %v1631_v6, %v1592_v12  ;;  %v1681_v5 = vadd.f32 %v1672_v58, %v1594_v9 }
 0x3a4   :  { %v1633_v2 = vpop.f32.mrf.mxu0  ;;  %v1674_v14 = vpop.f32.mrf.mxu1 }
 0x3a5   :  { %v4003_v13 = vmul.f32 -1.442695, %v1679_v51  ;;  %v1680_v48 = vadd.f32 %v1633_v2, %v1593_v54  ;;  %v1682_v7 = vadd.f32 %v1674_v14, %v1595_v61 }
 0x3a6   :  { %v1635_v52 = vpop.f32.mrf.mxu0  ;;  %v1676_v53 = vpop.f32.mrf.mxu1 }
 0x3a7   :  { %4337 = vpow2.f32 %v4003_v13  ;;  %v4004_v63 = vmul.f32 -1.442695, %v1680_v48  ;;  %v4005_v49 = vmul.f32 -1.442695, %v1682_v7  ;;  %v5273_v52 = vld [vmem:[#allocation5 + $0xe0] ss:$16 sps:$4 sm:$0xff]  }
 0x3a8   :  { %v1636_v57 = vpop.f32.mrf.mxu0  ;;  %v1677_v11 = vpop.f32.mrf.mxu1 }
 0x3a9   :  { %4339 = vpow2.f32 %v4004_v63 }
 0x3aa   :  { %4341 = vtanh.f32 %v1681_v5  ;;  %v5328_v5 = vld [vmem:[#allocation5 + $0xe8] ss:$16 sps:$4 sm:$0xff]  }
 0x3ab   :  { %4343 = vpow2.f32 %v4005_v49  ;;  %v5332_v49 = vld [vmem:[#allocation5 + $0xcc] ss:$16 sps:$4 sm:$0xff]  }
 0x3b4   :  { %v4338_v55 = vpop.eup %4337 }
 0x3b5   :  { %v1686_v20 = vadd.f32 1.0, %v4338_v55  ;;  %v5337_v55 = vld [vmem:[#allocation5 + $0xc0] ss:$16 sps:$4 sm:$0xff]  }
 0x3b6   :  { %v4340_v10 = vpop.eup %4339 }
 0x3b7   :  { %4345 = vrcp.f32 %v1686_v20  ;;  %v1692_v60 = vadd.f32 1.0, %v4340_v10  ;;  %v4342_v59 = vpop.eup %4341  ;;  %v5340_v20 = vld [vmem:[#allocation5 + $0xc8] ss:$16 sps:$4 sm:$0xff]   ;;  %v5343_v10 = vld [vmem:[#allocation5 + $0xa4] ss:$16 sps:$4 sm:$0xff]  }
 0x3b8   :  { %v4344_v1 = vpop.eup %4343 }
 0x3b9   :  { %4347 = vrcp.f32 %v1692_v60  ;;  %v1699_v51 = vadd.f32 1.0, %v4344_v1  ;;  %v5346_v60 = vld [vmem:[#allocation5 + $0xac] ss:$16 sps:$4 sm:$0xff]   ;;  %v5352_v1 = vld [vmem:[#allocation5 + $0xa8] ss:$16 sps:$4 sm:$0xff]  }
 0x3bb   :  { %4349 = vrcp.f32 %v1699_v51  ;;  %v5364_v51 = vld [vmem:[#allocation5 + $0x88] ss:$16 sps:$4 sm:$0xff]  }
 0x3c4   :  { %v4346_v3 = vpop.eup %4345 }
 0x3c5   :  { %v1703_v12 = vmul.f32 %v4346_v3, %v4342_v59  ;;  %v5349_v59 = vld [vmem:[#allocation5 + $0xa0] ss:$16 sps:$4 sm:$0xff]   ;;  %v5355_v3 = vld [vmem:[#allocation5 + $0x84] ss:$16 sps:$4 sm:$0xff]  }
 0x3c6   :  { %v4348_v6 = vpop.eup %4347 }
 0x3c7   :  { %v1702_v54 = vmul.f32 %v4348_v6, %v5217_v56  ;;  %v5277_v56 = vld [vmem:[#allocation5 + $0xc4] ss:$16 sps:$4 sm:$0xff]   ;;  %v5361_v6 = vld [vmem:[#allocation5 + $0x80] ss:$16 sps:$4 sm:$0xff]  }
 0x3c8   :  { %v4350_v21 = vpop.eup %4349 }
 0x3c9   :  { %v5266_v2 = vadd.f32 %v1703_v12, %v1702_v54  ;;  %v5358_v12 = vld [vmem:[#allocation5 + $0x8c] ss:$16 sps:$4 sm:$0xff]   ;;  %v5367_v54 = vld [vmem:[#allocation5 + $0x64] ss:$16 sps:$4 sm:$0xff]  }
 0x3cb   :  { %4351 = vtanh.f32 %v5266_v2 }
 0x3d8   :  { %v4352_v58 = vpop.eup %4351 }
 0x3d9   :  { %v1706_v14 = vmul.f32 %v4352_v58, %v4350_v21  ;;  %v5373_v21 = vld [vmem:[#allocation5 + $0x60] ss:$16 sps:$4 sm:$0xff]   ;;  %v5376_v58 = vld [vmem:[#allocation5 + $0x68] ss:$16 sps:$4 sm:$0xff]  }
 0x3db   :  { %v5271_v13 = vsel %vm1707_vm0, %v1706_v14, %v5225_v8  ;;  %v1716_v48 = vpack.c.bf16 %v1706_v14, %v1706_v14  ;;  %v5379_v14 = vld [vmem:[#allocation5 + $0x44] ss:$16 sps:$4 sm:$0xff]   ;;  %vm3627_vm0 = vcmp.eq.s32.totalorder %v5220_v50, 18 }
 0x3dd   :  { %1750 = vmatmul.mubr.bf16.vlgmr.msra.gmra.mxu0 %v1716_v48  ;;  %1791 = vmatmul.mubr.bf16.vlgmr.msra.gmra.mxu1 %v1716_v48  ;;  %v5385_v48 = vld [vmem:[#allocation5 + $0x40] ss:$16 sps:$4 sm:$0xff]  }
 0x3de   :  { %1838 = vmatpush1.bf16.msra.mxu0 %v5273_v52  ;;  %1879 = vmatpush1.bf16.msra.mxu1 %v4892_v4  ;;  %v5309_v4 = vld [vmem:[#allocation5 + $0xe4] ss:$16 sps:$4 sm:$0xff]  }
 0x3df   :  { %1839 = vmatprep.subr.bf16.mxu0 %v5277_v56  ;;  %1880 = vmatprep.subr.bf16.mxu1 %v4896_v0  ;;  %v5312_v0 = vld [vmem:[#allocation5 + $0xec] ss:$16 sps:$4 sm:$0xff]  }
 0x3e0   :  { %1869 = vmatprep.mubr.bf16.mxu0 %v6245_v62  ;;  %1910 = vmatprep.mubr.bf16.mxu1 %v6245_v62 }
 0x3e2   :  { %1840 = vmatpush1.bf16.msra.mxu0 %v4900_v15  ;;  %1881 = vmatpush1.bf16.msra.mxu1 %v4907_v17  ;;  %v4114_v15 = vpack.c.bf16 %v5097_v40, %v5093_v30 }
 0x3e3   :  { %1841 = vmatprep.subr.bf16.mxu0 %v4904_v16  ;;  %1882 = vmatprep.subr.bf16.mxu1 %v4916_v19 }
 0x3e4   :  { %v1712_v16 = vunpack.c.l.bf16 %v4114_v15 }
 0x3e6   :  { %1842 = vmatpush1.bf16.msra.mxu0 %v4914_v18  ;;  %1883 = vmatpush1.bf16.msra.mxu1 %v4921_v23 }
 0x3e7   :  { %1843 = vmatprep.subr.bf16.mxu0 %v4919_v22  ;;  %1884 = vmatprep.subr.bf16.mxu1 %v4925_v24  ;;  %v1713_v22 = vunpack.c.h.bf16 %v4114_v15  ;;  %v5388_v15 = vld [vmem:[#allocation5 + $0x48] ss:$16 sps:$4 sm:$0xff]  }
 0x3ea   :  { %1844 = vmatpush1.bf16.msra.mxu0 %v4932_v25  ;;  %1885 = vmatpush1.bf16.msra.mxu1 %v4939_v27 }
 0x3eb   :  { %1845 = vmatprep.subr.bf16.mxu0 %v4937_v26  ;;  %1886 = vmatprep.subr.bf16.mxu1 %v4945_v29 }
 0x3ee   :  { %1846 = vmatpush1.bf16.msra.mxu0 %v4943_v28  ;;  %1887 = vmatpush1.bf16.msra.mxu1 %v4951_v33 }
 0x3ef   :  { %1847 = vmatprep.subr.bf16.mxu0 %v4949_v32  ;;  %1888 = vmatprep.subr.bf16.mxu1 %v4955_v34  ;;  %v4115_v32 = vpack.c.bf16 %v5099_v41, %v5095_v31 }
 0x3f2   :  { %1848 = vmatpush1.bf16.msra.mxu0 %v4962_v35  ;;  %1889 = vmatpush1.bf16.msra.mxu1 %v4969_v37  ;;  %v1715_v35 = vunpack.c.h.bf16 %v4115_v32  ;;  %v1714_v37 = vunpack.c.l.bf16 %v4115_v32 }
 0x3f3   :  { %1849 = vmatprep.subr.bf16.mxu0 %v4967_v36  ;;  %1890 = vmatprep.subr.bf16.mxu1 %v4975_v39 }
 0x3f6   :  { %1850 = vmatpush1.bf16.msra.mxu0 %v4973_v38  ;;  %1891 = vmatpush1.bf16.msra.mxu1 %v4981_v43 }
 0x3f7   :  { %1851 = vmatprep.subr.bf16.mxu0 %v4979_v42  ;;  %1892 = vmatprep.subr.bf16.mxu1 %v4985_v44 }
 0x3fa   :  { %1852 = vmatpush1.bf16.msra.mxu0 %v4992_v45  ;;  %1893 = vmatpush1.bf16.msra.mxu1 %v4997_v46 }
 0x3fb   :  { %1957 = vmatprep.subr.bf16.mxu0 %v5309_v4  ;;  %1998 = vmatprep.subr.bf16.mxu1 %v5312_v0 }
 0x49d   :  { %v1751_v17 = vpop.f32.mrf.mxu0  ;;  %v1792_v18 = vpop.f32.mrf.mxu1 }
 0x49e   :  { %v1799_v19 = vadd.f32 %v1751_v17, %v1712_v16  ;;  %v1801_v38 = vadd.f32 %v1792_v18, %v1714_v37  ;;  %v5391_v16 = vld [vmem:[#allocation5 + $0x24] ss:$16 sps:$4 sm:$0xff]   ;;  %v5394_v17 = vld [vmem:[#allocation5 + $0x2c] ss:$16 sps:$4 sm:$0xff]   ;;  %v5397_v18 = vld [vmem:[#allocation5 + $0x20] ss:$16 sps:$4 sm:$0xff]  }
 0x49f   :  { %v1753_v23 = vpop.f32.mrf.mxu0  ;;  %v1794_v24 = vpop.f32.mrf.mxu1 }
 0x4a0   :  { %v4006_v25 = vmul.f32 -1.442695, %v1799_v19  ;;  %v1800_v26 = vadd.f32 %v1753_v23, %v1713_v22  ;;  %v1802_v36 = vadd.f32 %v1794_v24, %v1715_v35  ;;  %v5400_v19 = vld [vmem:[#allocation5 + $0x28] ss:$16 sps:$4 sm:$0xff]   ;;  %v5403_v22 = vld [vmem:[#allocation5 + $0x4] ss:$16 sps:$4 sm:$0xff]  }
 0x4a1   :  { %v1755_v27 = vpop.f32.mrf.mxu0  ;;  %v1796_v28 = vpop.f32.mrf.mxu1  ;;  %v5406_v23 = vld [vmem:[#allocation5 + $0xc] ss:$16 sps:$4 sm:$0xff]   ;;  %v5409_v24 = vld [vmem:[#allocation5] ss:$16 sps:$4 sm:$0xff]  }
 0x4a2   :  { %4353 = vpow2.f32 %v4006_v25  ;;  %v4007_v29 = vmul.f32 -1.442695, %v1800_v26  ;;  %v4008_v39 = vmul.f32 -1.442695, %v1802_v36  ;;  %v5412_v25 = vld [vmem:[#allocation5 + $0x8] ss:$16 sps:$4 sm:$0xff]  }
 0x4a3   :  { %v1756_v33 = vpop.f32.mrf.mxu0  ;;  %v1797_v34 = vpop.f32.mrf.mxu1  ;;  %v6246_v26 = vld [vmem:[#allocation9_spill] sm:$0xff] }
 0x4a4   :  { %4355 = vpow2.f32 %v4007_v29  ;;  %v4116_v27 = vpack.c.bf16 %v6246_v26, %v5101_v47 }
 0x4a5   :  { %4357 = vtanh.f32 %v1801_v38 }
 0x4a6   :  { %4359 = vpow2.f32 %v4008_v39  ;;  %v1832_v28 = vunpack.c.l.bf16 %v4116_v27  ;;  %v1833_v34 = vunpack.c.h.bf16 %v4116_v27 }
 0x4af   :  { %v4354_v42 = vpop.eup %4353 }
 0x4b0   :  { %v1806_v43 = vadd.f32 1.0, %v4354_v42 }
 0x4b1   :  { %v4356_v44 = vpop.eup %4355 }
 0x4b2   :  { %4361 = vrcp.f32 %v1806_v43  ;;  %v1812_v45 = vadd.f32 1.0, %v4356_v44  ;;  %v4358_v46 = vpop.eup %4357 }
 0x4b3   :  { %v4360_v30 = vpop.eup %4359 }
 0x4b4   :  { %4363 = vrcp.f32 %v1812_v45  ;;  %v1819_v8 = vadd.f32 1.0, %v4360_v30 }
 0x4b6   :  { %4365 = vrcp.f32 %v1819_v8 }
 0x4bf   :  { %v4362_v40 = vpop.eup %4361 }
 0x4c0   :  { %v1823_v31 = vmul.f32 %v4362_v40, %v4358_v46  ;;  %v6247_v46 = vld [vmem:[#allocation10_spill] sm:$0xff] }
 0x4c1   :  { %v4364_v41 = vpop.eup %4363  ;;  %v1835_v30 = vunpack.c.h.bf16 %v6247_v46  ;;  %v1834_v47 = vunpack.c.l.bf16 %v6247_v46 }
 0x4c2   :  { %v1822_v53 = vmul.f32 %v4364_v41, %v5266_v2  ;;  %v5370_v2 = vld [vmem:[#allocation5 + $0x6c] ss:$16 sps:$4 sm:$0xff]  }
 0x4c3   :  { %v4366_v57 = vpop.eup %4365 }
 0x4c4   :  { %v5320_v63 = vadd.f32 %v1823_v31, %v1822_v53 }
 0x4c6   :  { %4367 = vtanh.f32 %v5320_v63 }
 0x4d3   :  { %v4368_v11 = vpop.eup %4367 }
 0x4d4   :  { %v1826_v61 = vmul.f32 %v4368_v11, %v4366_v57 }
 0x4d6   :  { %v5325_v7 = vsel %vm1827_vm1, %v1826_v61, %v5271_v13  ;;  %v1836_v9 = vpack.c.bf16 %v1826_v61, %v1826_v61  ;;  %v5382_v13 = vld [vmem:[#allocation5 + $0x4c] ss:$16 sps:$4 sm:$0xff]   ;;  %vm4776_vm1 = vmmov 0  }
 0x4d8   :  { %1870 = vmatmul.mubr.bf16.vlgmr.msra.gmra.mxu0 %v1836_v9  ;;  %1911 = vmatmul.mubr.bf16.vlgmr.msra.gmra.mxu1 %v1836_v9 }
 0x4d9   :  { %1958 = vmatpush1.bf16.msra.mxu0 %v5273_v52  ;;  %1999 = vmatpush1.bf16.msra.mxu1 %v5328_v5 }
 0x4da   :  { %1959 = vmatprep.subr.bf16.mxu0 %v5277_v56  ;;  %2000 = vmatprep.subr.bf16.mxu1 %v5332_v49 }
 0x4db   :  { %1989 = vmatprep.mubr.bf16.mxu0 %v6245_v62  ;;  %2030 = vmatprep.mubr.bf16.mxu1 %v6245_v62 }
 0x4dd   :  { %1960 = vmatpush1.bf16.msra.mxu0 %v5337_v55  ;;  %2001 = vmatpush1.bf16.msra.mxu1 %v5340_v20 }
 0x4de   :  { %1961 = vmatprep.subr.bf16.mxu0 %v5343_v10  ;;  %2002 = vmatprep.subr.bf16.mxu1 %v5346_v60 }
 0x4e1   :  { %1962 = vmatpush1.bf16.msra.mxu0 %v5349_v59  ;;  %2003 = vmatpush1.bf16.msra.mxu1 %v5352_v1 }
 0x4e2   :  { %1963 = vmatprep.subr.bf16.mxu0 %v5355_v3  ;;  %2004 = vmatprep.subr.bf16.mxu1 %v5358_v12 }
 0x4e5   :  { %1964 = vmatpush1.bf16.msra.mxu0 %v5361_v6  ;;  %2005 = vmatpush1.bf16.msra.mxu1 %v5364_v51 }
 0x4e6   :  { %1965 = vmatprep.subr.bf16.mxu0 %v5367_v54  ;;  %2006 = vmatprep.subr.bf16.mxu1 %v5370_v2 }
 0x4e9   :  { %1966 = vmatpush1.bf16.msra.mxu0 %v5373_v21  ;;  %2007 = vmatpush1.bf16.msra.mxu1 %v5376_v58 }
 0x4ea   :  { %1967 = vmatprep.subr.bf16.mxu0 %v5379_v14  ;;  %2008 = vmatprep.subr.bf16.mxu1 %v5382_v13 }
 0x4ed   :  { %1968 = vmatpush1.bf16.msra.mxu0 %v5385_v48  ;;  %2009 = vmatpush1.bf16.msra.mxu1 %v5388_v15 }
 0x4ee   :  { %1969 = vmatprep.subr.bf16.mxu0 %v5391_v16  ;;  %2010 = vmatprep.subr.bf16.mxu1 %v5394_v17 }
 0x4f1   :  { %1970 = vmatpush1.bf16.msra.mxu0 %v5397_v18  ;;  %2011 = vmatpush1.bf16.msra.mxu1 %v5400_v19 }
 0x4f2   :  { %1971 = vmatprep.subr.bf16.mxu0 %v5403_v22  ;;  %2012 = vmatprep.subr.bf16.mxu1 %v5406_v23 }
 0x4f5   :  { %1972 = vmatpush1.bf16.msra.mxu0 %v5409_v24  ;;  %2013 = vmatpush1.bf16.msra.mxu1 %v5412_v25 }
 0x4f6   :  { %2077 = vmatprep.subr.bf16.mxu0 %v5309_v4  ;;  %2118 = vmatprep.subr.bf16.mxu1 %v5312_v0 }
 0x598   :  { %v1871_v29 = vpop.f32.mrf.mxu0  ;;  %v1912_v32 = vpop.f32.mrf.mxu1 }
 0x599   :  { %v1919_v33 = vadd.f32 %v1871_v29, %v1832_v28  ;;  %v1921_v31 = vadd.f32 %v1912_v32, %v1834_v47 }
 0x59a   :  { %v1873_v35 = vpop.f32.mrf.mxu0  ;;  %v1914_v36 = vpop.f32.mrf.mxu1 }
 0x59b   :  { %v4009_v37 = vmul.f32 -1.442695, %v1919_v33  ;;  %v1920_v38 = vadd.f32 %v1873_v35, %v1833_v34  ;;  %v1922_v40 = vadd.f32 %v1914_v36, %v1835_v30 }
 0x59c   :  { %v1875_v39 = vpop.f32.mrf.mxu0  ;;  %v1916_v42 = vpop.f32.mrf.mxu1 }
 0x59d   :  { %4369 = vpow2.f32 %v4009_v37  ;;  %v4010_v43 = vmul.f32 -1.442695, %v1920_v38  ;;  %v4011_v41 = vmul.f32 -1.442695, %v1922_v40 }
 0x59e   :  { %v1876_v44 = vpop.f32.mrf.mxu0  ;;  %v1917_v45 = vpop.f32.mrf.mxu1 }
 0x59f   :  { %4371 = vpow2.f32 %v4010_v43 }
 0x5a0   :  { %4373 = vtanh.f32 %v1921_v31 }
 0x5a1   :  { %4375 = vpow2.f32 %v4011_v41 }
 0x5aa   :  { %v4370_v8 = vpop.eup %4369 }
 0x5ab   :  { %v1926_v53 = vadd.f32 1.0, %v4370_v8 }
 0x5ac   :  { %v4372_v57 = vpop.eup %4371 }
 0x5ad   :  { %4377 = vrcp.f32 %v1926_v53  ;;  %v1932_v11 = vadd.f32 1.0, %v4372_v57  ;;  %v4374_v61 = vpop.eup %4373  ;;  %v6249_v57 = vld [vmem:[#allocation12_spill] sm:$0xff] }
 0x5ae   :  { %v4376_v9 = vpop.eup %4375 }
 0x5af   :  { %4379 = vrcp.f32 %v1932_v11  ;;  %v1939_v29 = vadd.f32 1.0, %v4376_v9  ;;  %v1955_v11 = vunpack.c.h.bf16 %v6249_v57  ;;  %v1954_v9 = vunpack.c.l.bf16 %v6249_v57 }
 0x5b1   :  { %4381 = vrcp.f32 %v1939_v29 }
 0x5ba   :  { %v4378_v26 = vpop.eup %4377 }
 0x5bb   :  { %v1943_v27 = vmul.f32 %v4378_v26, %v4374_v61 }
 0x5bc   :  { %v4380_v28 = vpop.eup %4379 }
 0x5bd   :  { %v1942_v33 = vmul.f32 %v4380_v28, %v5320_v63  ;;  %v6248_v63 = vld [vmem:[#allocation11_spill] sm:$0xff] }
 0x5be   :  { %v4382_v32 = vpop.eup %4381  ;;  %v1953_v44 = vunpack.c.h.bf16 %v6248_v63 }
 0x5bf   :  { %v5422_v34 = vadd.f32 %v1943_v27, %v1942_v33 }
 0x5c1   :  { %4383 = vtanh.f32 %v5422_v34 }
 0x5ce   :  { %v4384_v35 = vpop.eup %4383 }
 0x5cf   :  { %v1946_v36 = vmul.f32 %v4384_v35, %v4382_v32 }
 0x5d1   :  { %v5427_v37 = vsel %vm1947_vm2, %v1946_v36, %v5325_v7  ;;  %v1956_v38 = vpack.c.bf16 %v1946_v36, %v1946_v36  ;;  %v1952_v7 = vunpack.c.l.bf16 %v6248_v63  ;;  %vm3747_vm2 = vcmp.eq.s32.totalorder %v5220_v50, 19 }
 0x5d3   :  { %1990 = vmatmul.mubr.bf16.vlgmr.msra.gmra.mxu0 %v1956_v38  ;;  %2031 = vmatmul.mubr.bf16.vlgmr.msra.gmra.mxu1 %v1956_v38 }
 0x5d4   :  { %2078 = vmatpush1.bf16.msra.mxu0 %v5273_v52  ;;  %2119 = vmatpush1.bf16.msra.mxu1 %v5328_v5 }
 0x5d5   :  { %2079 = vmatprep.subr.bf16.mxu0 %v5277_v56  ;;  %2120 = vmatprep.subr.bf16.mxu1 %v5332_v49 }
 0x5d6   :  { %2109 = vmatprep.mubr.bf16.mxu0 %v6245_v62  ;;  %2150 = vmatprep.mubr.bf16.mxu1 %v6245_v62 }
 0x5d8   :  { %2080 = vmatpush1.bf16.msra.mxu0 %v5337_v55  ;;  %2121 = vmatpush1.bf16.msra.mxu1 %v5340_v20 }
 0x5d9   :  { %2081 = vmatprep.subr.bf16.mxu0 %v5343_v10  ;;  %2122 = vmatprep.subr.bf16.mxu1 %v5346_v60 }
 0x5dc   :  { %2082 = vmatpush1.bf16.msra.mxu0 %v5349_v59  ;;  %2123 = vmatpush1.bf16.msra.mxu1 %v5352_v1 }
 0x5dd   :  { %2083 = vmatprep.subr.bf16.mxu0 %v5355_v3  ;;  %2124 = vmatprep.subr.bf16.mxu1 %v5358_v12 }
 0x5e0   :  { %2084 = vmatpush1.bf16.msra.mxu0 %v5361_v6  ;;  %2125 = vmatpush1.bf16.msra.mxu1 %v5364_v51 }
 0x5e1   :  { %2085 = vmatprep.subr.bf16.mxu0 %v5367_v54  ;;  %2126 = vmatprep.subr.bf16.mxu1 %v5370_v2 }
 0x5e4   :  { %2086 = vmatpush1.bf16.msra.mxu0 %v5373_v21  ;;  %2127 = vmatpush1.bf16.msra.mxu1 %v5376_v58 }
 0x5e5   :  { %2087 = vmatprep.subr.bf16.mxu0 %v5379_v14  ;;  %2128 = vmatprep.subr.bf16.mxu1 %v5382_v13 }
 0x5e8   :  { %2088 = vmatpush1.bf16.msra.mxu0 %v5385_v48  ;;  %2129 = vmatpush1.bf16.msra.mxu1 %v5388_v15 }
 0x5e9   :  { %2089 = vmatprep.subr.bf16.mxu0 %v5391_v16  ;;  %2130 = vmatprep.subr.bf16.mxu1 %v5394_v17 }
 0x5ec   :  { %2090 = vmatpush1.bf16.msra.mxu0 %v5397_v18  ;;  %2131 = vmatpush1.bf16.msra.mxu1 %v5400_v19 }
 0x5ed   :  { %2091 = vmatprep.subr.bf16.mxu0 %v5403_v22  ;;  %2132 = vmatprep.subr.bf16.mxu1 %v5406_v23 }
 0x5f0   :  { %2092 = vmatpush1.bf16.msra.mxu0 %v5409_v24  ;;  %2133 = vmatpush1.bf16.msra.mxu1 %v5412_v25 }
 0x5f1   :  { %2197 = vmatprep.subr.bf16.mxu0 %v5309_v4  ;;  %2238 = vmatprep.subr.bf16.mxu1 %v5312_v0 }
 0x693   :  { %v1991_v39 = vpop.f32.mrf.mxu0  ;;  %v2032_v42 = vpop.f32.mrf.mxu1 }
 0x694   :  { %v2039_v43 = vadd.f32 %v1991_v39, %v1952_v7  ;;  %v2041_v26 = vadd.f32 %v2032_v42, %v1954_v9 }
 0x695   :  { %v1993_v45 = vpop.f32.mrf.mxu0  ;;  %v2034_v46 = vpop.f32.mrf.mxu1 }
 0x696   :  { %v4012_v30 = vmul.f32 -1.442695, %v2039_v43  ;;  %v2040_v40 = vadd.f32 %v1993_v45, %v1953_v44  ;;  %v2042_v61 = vadd.f32 %v2034_v46, %v1955_v11 }
 0x697   :  { %v1995_v47 = vpop.f32.mrf.mxu0  ;;  %v2036_v31 = vpop.f32.mrf.mxu1 }
 0x698   :  { %4385 = vpow2.f32 %v4012_v30  ;;  %v4013_v41 = vmul.f32 -1.442695, %v2040_v40  ;;  %v4014_v27 = vmul.f32 -1.442695, %v2042_v61 }
 0x699   :  { %v1996_v8 = vpop.f32.mrf.mxu0  ;;  %v2037_v53 = vpop.f32.mrf.mxu1 }
 0x69a   :  { %4387 = vpow2.f32 %v4013_v41 }
 0x69b   :  { %4389 = vtanh.f32 %v2041_v26 }
 0x69c   :  { %4391 = vpow2.f32 %v4014_v27 }
 0x6a5   :  { %v4386_v28 = vpop.eup %4385 }
 0x6a6   :  { %v2046_v29 = vadd.f32 1.0, %v4386_v28 }
 0x6a7   :  { %v4388_v33 = vpop.eup %4387 }
 0x6a8   :  { %4393 = vrcp.f32 %v2046_v29  ;;  %v2052_v32 = vadd.f32 1.0, %v4388_v33  ;;  %v4390_v35 = vpop.eup %4389  ;;  %v6251_v33 = vld [vmem:[#allocation14_spill] sm:$0xff] }
 0x6a9   :  { %v4392_v36 = vpop.eup %4391 }
 0x6aa   :  { %4395 = vrcp.f32 %v2052_v32  ;;  %v2059_v39 = vadd.f32 1.0, %v4392_v36  ;;  %v2075_v32 = vunpack.c.h.bf16 %v6251_v33  ;;  %v2074_v36 = vunpack.c.l.bf16 %v6251_v33 }
 0x6ac   :  { %4397 = vrcp.f32 %v2059_v39 }
 0x6b5   :  { %v4394_v38 = vpop.eup %4393 }
 0x6b6   :  { %v2063_v63 = vmul.f32 %v4394_v38, %v4390_v35 }
 0x6b7   :  { %v4396_v7 = vpop.eup %4395 }
 0x6b8   :  { %v2062_v43 = vmul.f32 %v4396_v7, %v5422_v34  ;;  %v6250_v34 = vld [vmem:[#allocation13_spill] sm:$0xff] }
 0x6b9   :  { %v4398_v42 = vpop.eup %4397  ;;  %v2073_v8 = vunpack.c.h.bf16 %v6250_v34 }
 0x6ba   :  { %v5468_v44 = vadd.f32 %v2063_v63, %v2062_v43 }
 0x6bc   :  { %4399 = vtanh.f32 %v5468_v44 }
 0x6c9   :  { %v4400_v45 = vpop.eup %4399 }
 0x6ca   :  { %v2066_v46 = vmul.f32 %v4400_v45, %v4398_v42 }
 0x6cc   :  { %v5473_v30 = vsel %vm2067_vm3, %v2066_v46, %v5427_v37  ;;  %v2076_v40 = vpack.c.bf16 %v2066_v46, %v2066_v46  ;;  %v2072_v37 = vunpack.c.l.bf16 %v6250_v34  ;;  %vm3842_vm3 = vcmask 15360  }
 0x6ce   :  { %2110 = vmatmul.mubr.bf16.vlgmr.msra.gmra.mxu0 %v2076_v40  ;;  %2151 = vmatmul.mubr.bf16.vlgmr.msra.gmra.mxu1 %v2076_v40 }
 0x6cf   :  { %2198 = vmatpush1.bf16.msra.mxu0 %v5273_v52  ;;  %2239 = vmatpush1.bf16.msra.mxu1 %v5328_v5 }
 0x6d0   :  { %2199 = vmatprep.subr.bf16.mxu0 %v5277_v56  ;;  %2240 = vmatprep.subr.bf16.mxu1 %v5332_v49 }
 0x6d1   :  { %2229 = vmatprep.mubr.bf16.mxu0 %v6245_v62  ;;  %2270 = vmatprep.mubr.bf16.mxu1 %v6245_v62 }
 0x6d3   :  { %2200 = vmatpush1.bf16.msra.mxu0 %v5337_v55  ;;  %2241 = vmatpush1.bf16.msra.mxu1 %v5340_v20 }
 0x6d4   :  { %2201 = vmatprep.subr.bf16.mxu0 %v5343_v10  ;;  %2242 = vmatprep.subr.bf16.mxu1 %v5346_v60 }
 0x6d7   :  { %2202 = vmatpush1.bf16.msra.mxu0 %v5349_v59  ;;  %2243 = vmatpush1.bf16.msra.mxu1 %v5352_v1 }
 0x6d8   :  { %2203 = vmatprep.subr.bf16.mxu0 %v5355_v3  ;;  %2244 = vmatprep.subr.bf16.mxu1 %v5358_v12 }
 0x6db   :  { %2204 = vmatpush1.bf16.msra.mxu0 %v5361_v6  ;;  %2245 = vmatpush1.bf16.msra.mxu1 %v5364_v51 }
 0x6dc   :  { %2205 = vmatprep.subr.bf16.mxu0 %v5367_v54  ;;  %2246 = vmatprep.subr.bf16.mxu1 %v5370_v2 }
 0x6df   :  { %2206 = vmatpush1.bf16.msra.mxu0 %v5373_v21  ;;  %2247 = vmatpush1.bf16.msra.mxu1 %v5376_v58 }
 0x6e0   :  { %2207 = vmatprep.subr.bf16.mxu0 %v5379_v14  ;;  %2248 = vmatprep.subr.bf16.mxu1 %v5382_v13 }
 0x6e3   :  { %2208 = vmatpush1.bf16.msra.mxu0 %v5385_v48  ;;  %2249 = vmatpush1.bf16.msra.mxu1 %v5388_v15 }
 0x6e4   :  { %2209 = vmatprep.subr.bf16.mxu0 %v5391_v16  ;;  %2250 = vmatprep.subr.bf16.mxu1 %v5394_v17 }
 0x6e7   :  { %2210 = vmatpush1.bf16.msra.mxu0 %v5397_v18  ;;  %2251 = vmatpush1.bf16.msra.mxu1 %v5400_v19 }
 0x6e8   :  { %2211 = vmatprep.subr.bf16.mxu0 %v5403_v22  ;;  %2252 = vmatprep.subr.bf16.mxu1 %v5406_v23 }
 0x6eb   :  { %2212 = vmatpush1.bf16.msra.mxu0 %v5409_v24  ;;  %2253 = vmatpush1.bf16.msra.mxu1 %v5412_v25 }
 0x6ec   :  { %2317 = vmatprep.subr.bf16.mxu0 %v5309_v4  ;;  %2358 = vmatprep.subr.bf16.mxu1 %v5312_v0 }
 0x78e   :  { %v2111_v47 = vpop.f32.mrf.mxu0  ;;  %v2152_v31 = vpop.f32.mrf.mxu1 }
 0x78f   :  { %v2159_v41 = vadd.f32 %v2111_v47, %v2072_v37  ;;  %v2161_v38 = vadd.f32 %v2152_v31, %v2074_v36 }
 0x790   :  { %v2113_v53 = vpop.f32.mrf.mxu0  ;;  %v2154_v57 = vpop.f32.mrf.mxu1 }
 0x791   :  { %v4015_v11 = vmul.f32 -1.442695, %v2159_v41  ;;  %v2160_v61 = vadd.f32 %v2113_v53, %v2073_v8  ;;  %v2162_v35 = vadd.f32 %v2154_v57, %v2075_v32 }
 0x792   :  { %v2115_v9 = vpop.f32.mrf.mxu0  ;;  %v2156_v26 = vpop.f32.mrf.mxu1 }
 0x793   :  { %4401 = vpow2.f32 %v4015_v11  ;;  %v4016_v27 = vmul.f32 -1.442695, %v2160_v61  ;;  %v4017_v63 = vmul.f32 -1.442695, %v2162_v35 }
 0x794   :  { %v2116_v28 = vpop.f32.mrf.mxu0  ;;  %v2157_v29 = vpop.f32.mrf.mxu1 }
 0x795   :  { %4403 = vpow2.f32 %v4016_v27 }
 0x796   :  { %4405 = vtanh.f32 %v2161_v38 }
 0x797   :  { %4407 = vpow2.f32 %v4017_v63 }
 0x7a0   :  { %v4402_v7 = vpop.eup %4401 }
 0x7a1   :  { %v2166_v39 = vadd.f32 1.0, %v4402_v7 }
 0x7a2   :  { %v4404_v43 = vpop.eup %4403 }
 0x7a3   :  { %4409 = vrcp.f32 %v2166_v39  ;;  %v2172_v42 = vadd.f32 1.0, %v4404_v43  ;;  %v4406_v45 = vpop.eup %4405  ;;  %v6253_v43 = vld [vmem:[#allocation16_spill] sm:$0xff] }
 0x7a4   :  { %v4408_v46 = vpop.eup %4407 }
 0x7a5   :  { %4411 = vrcp.f32 %v2172_v42  ;;  %v2179_v47 = vadd.f32 1.0, %v4408_v46  ;;  %v2195_v42 = vunpack.c.h.bf16 %v6253_v43  ;;  %v2194_v46 = vunpack.c.l.bf16 %v6253_v43 }
 0x7a7   :  { %4413 = vrcp.f32 %v2179_v47 }
 0x7b0   :  { %v4410_v40 = vpop.eup %4409 }
 0x7b1   :  { %v2183_v34 = vmul.f32 %v4410_v40, %v4406_v45 }
 0x7b2   :  { %v4412_v37 = vpop.eup %4411 }
 0x7b3   :  { %v2182_v41 = vmul.f32 %v4412_v37, %v5468_v44  ;;  %v6252_v44 = vld [vmem:[#allocation15_spill] sm:$0xff] }
 0x7b4   :  { %v4414_v31 = vpop.eup %4413  ;;  %v2193_v28 = vunpack.c.h.bf16 %v6252_v44 }
 0x7b5   :  { %v5514_v8 = vadd.f32 %v2183_v34, %v2182_v41 }
 0x7b7   :  { %4415 = vtanh.f32 %v5514_v8 }
 0x7c4   :  { %v4416_v53 = vpop.eup %4415 }
 0x7c5   :  { %v2186_v57 = vmul.f32 %v4416_v53, %v4414_v31 }
 0x7c7   :  { %v5519_v11 = vsel %vm2187_vm4, %v2186_v57, %v5473_v30  ;;  %v2196_v61 = vpack.c.bf16 %v2186_v57, %v2186_v57  ;;  %v2192_v30 = vunpack.c.l.bf16 %v6252_v44 }
 0x7c9   :  { %2230 = vmatmul.mubr.bf16.vlgmr.msra.gmra.mxu0 %v2196_v61  ;;  %2271 = vmatmul.mubr.bf16.vlgmr.msra.gmra.mxu1 %v2196_v61 }
 0x7ca   :  { %2318 = vmatpush1.bf16.msra.mxu0 %v5273_v52  ;;  %2359 = vmatpush1.bf16.msra.mxu1 %v5328_v5 }
 0x7cb   :  { %2319 = vmatprep.subr.bf16.mxu0 %v5277_v56  ;;  %2360 = vmatprep.subr.bf16.mxu1 %v5332_v49 }
 0x7cc   :  { %2349 = vmatprep.mubr.bf16.mxu0 %v6245_v62  ;;  %2390 = vmatprep.mubr.bf16.mxu1 %v6245_v62 }
 0x7ce   :  { %2320 = vmatpush1.bf16.msra.mxu0 %v5337_v55  ;;  %2361 = vmatpush1.bf16.msra.mxu1 %v5340_v20 }
 0x7cf   :  { %2321 = vmatprep.subr.bf16.mxu0 %v5343_v10  ;;  %2362 = vmatprep.subr.bf16.mxu1 %v5346_v60 }
 0x7d2   :  { %2322 = vmatpush1.bf16.msra.mxu0 %v5349_v59  ;;  %2363 = vmatpush1.bf16.msra.mxu1 %v5352_v1 }
 0x7d3   :  { %2323 = vmatprep.subr.bf16.mxu0 %v5355_v3  ;;  %2364 = vmatprep.subr.bf16.mxu1 %v5358_v12 }
 0x7d6   :  { %2324 = vmatpush1.bf16.msra.mxu0 %v5361_v6  ;;  %2365 = vmatpush1.bf16.msra.mxu1 %v5364_v51 }
 0x7d7   :  { %2325 = vmatprep.subr.bf16.mxu0 %v5367_v54  ;;  %2366 = vmatprep.subr.bf16.mxu1 %v5370_v2 }
 0x7da   :  { %2326 = vmatpush1.bf16.msra.mxu0 %v5373_v21  ;;  %2367 = vmatpush1.bf16.msra.mxu1 %v5376_v58 }
 0x7db   :  { %2327 = vmatprep.subr.bf16.mxu0 %v5379_v14  ;;  %2368 = vmatprep.subr.bf16.mxu1 %v5382_v13 }
 0x7de   :  { %2328 = vmatpush1.bf16.msra.mxu0 %v5385_v48  ;;  %2369 = vmatpush1.bf16.msra.mxu1 %v5388_v15 }
 0x7df   :  { %2329 = vmatprep.subr.bf16.mxu0 %v5391_v16  ;;  %2370 = vmatprep.subr.bf16.mxu1 %v5394_v17 }
 0x7e2   :  { %2330 = vmatpush1.bf16.msra.mxu0 %v5397_v18  ;;  %2371 = vmatpush1.bf16.msra.mxu1 %v5400_v19 }
 0x7e3   :  { %2331 = vmatprep.subr.bf16.mxu0 %v5403_v22  ;;  %2372 = vmatprep.subr.bf16.mxu1 %v5406_v23 }
 0x7e6   :  { %2332 = vmatpush1.bf16.msra.mxu0 %v5409_v24  ;;  %2373 = vmatpush1.bf16.msra.mxu1 %v5412_v25 }
 0x7e7   :  { %2437 = vmatprep.subr.bf16.mxu0 %v5309_v4  ;;  %2478 = vmatprep.subr.bf16.mxu1 %v5312_v0 }
 0x889   :  { %v2231_v9 = vpop.f32.mrf.mxu0  ;;  %v2272_v26 = vpop.f32.mrf.mxu1 }
 0x88a   :  { %v2279_v27 = vadd.f32 %v2231_v9, %v2192_v30  ;;  %v2281_v40 = vadd.f32 %v2272_v26, %v2194_v46 }
 0x88b   :  { %v2233_v29 = vpop.f32.mrf.mxu0  ;;  %v2274_v33 = vpop.f32.mrf.mxu1 }
 0x88c   :  { %v4018_v32 = vmul.f32 -1.442695, %v2279_v27  ;;  %v2280_v35 = vadd.f32 %v2233_v29, %v2193_v28  ;;  %v2282_v45 = vadd.f32 %v2274_v33, %v2195_v42 }
 0x88d   :  { %v2235_v36 = vpop.f32.mrf.mxu0  ;;  %v2276_v38 = vpop.f32.mrf.mxu1 }
 0x88e   :  { %4417 = vpow2.f32 %v4018_v32  ;;  %v4019_v63 = vmul.f32 -1.442695, %v2280_v35  ;;  %v4020_v34 = vmul.f32 -1.442695, %v2282_v45 }
 0x88f   :  { %v2236_v7 = vpop.f32.mrf.mxu0  ;;  %v2277_v39 = vpop.f32.mrf.mxu1 }
 0x890   :  { %4419 = vpow2.f32 %v4019_v63 }
 0x891   :  { %4421 = vtanh.f32 %v2281_v40 }
 0x892   :  { %4423 = vpow2.f32 %v4020_v34 }
 0x89b   :  { %v4418_v37 = vpop.eup %4417 }
 0x89c   :  { %v2286_v47 = vadd.f32 1.0, %v4418_v37 }
 0x89d   :  { %v4420_v41 = vpop.eup %4419 }
 0x89e   :  { %4425 = vrcp.f32 %v2286_v47  ;;  %v2292_v31 = vadd.f32 1.0, %v4420_v41  ;;  %v4422_v53 = vpop.eup %4421  ;;  %v6255_v41 = vld [vmem:[#allocation18_spill] sm:$0xff] }
 0x89f   :  { %v4424_v57 = vpop.eup %4423 }
 0x8a0   :  { %4427 = vrcp.f32 %v2292_v31  ;;  %v2299_v9 = vadd.f32 1.0, %v4424_v57  ;;  %v2315_v31 = vunpack.c.h.bf16 %v6255_v41  ;;  %v2314_v57 = vunpack.c.l.bf16 %v6255_v41 }
 0x8a2   :  { %4429 = vrcp.f32 %v2299_v9 }
 0x8ab   :  { %v4426_v61 = vpop.eup %4425 }
 0x8ac   :  { %v2303_v44 = vmul.f32 %v4426_v61, %v4422_v53 }
 0x8ad   :  { %v4428_v30 = vpop.eup %4427 }
 0x8ae   :  { %v2302_v27 = vmul.f32 %v4428_v30, %v5514_v8  ;;  %v6254_v8 = vld [vmem:[#allocation17_spill] sm:$0xff] }
 0x8af   :  { %v4430_v26 = vpop.eup %4429  ;;  %v2313_v7 = vunpack.c.h.bf16 %v6254_v8 }
 0x8b0   :  { %v5560_v28 = vadd.f32 %v2303_v44, %v2302_v27 }
 0x8b2   :  { %4431 = vtanh.f32 %v5560_v28 }
 0x8bf   :  { %v4432_v29 = vpop.eup %4431 }
 0x8c0   :  { %v2306_v33 = vmul.f32 %v4432_v29, %v4430_v26 }
 0x8c2   :  { %v5565_v32 = vsel %vm2307_vm5, %v2306_v33, %v5519_v11  ;;  %v2316_v35 = vpack.c.bf16 %v2306_v33, %v2306_v33  ;;  %v2312_v11 = vunpack.c.l.bf16 %v6254_v8 }
 0x8c4   :  { %2350 = vmatmul.mubr.bf16.vlgmr.msra.gmra.mxu0 %v2316_v35  ;;  %2391 = vmatmul.mubr.bf16.vlgmr.msra.gmra.mxu1 %v2316_v35 }
 0x8c5   :  { %2438 = vmatpush1.bf16.msra.mxu0 %v5273_v52  ;;  %2479 = vmatpush1.bf16.msra.mxu1 %v5328_v5 }
 0x8c6   :  { %2439 = vmatprep.subr.bf16.mxu0 %v5277_v56  ;;  %2480 = vmatprep.subr.bf16.mxu1 %v5332_v49 }
 0x8c7   :  { %2469 = vmatprep.mubr.bf16.mxu0 %v6245_v62  ;;  %2510 = vmatprep.mubr.bf16.mxu1 %v6245_v62 }
 0x8c9   :  { %2440 = vmatpush1.bf16.msra.mxu0 %v5337_v55  ;;  %2481 = vmatpush1.bf16.msra.mxu1 %v5340_v20 }
 0x8ca   :  { %2441 = vmatprep.subr.bf16.mxu0 %v5343_v10  ;;  %2482 = vmatprep.subr.bf16.mxu1 %v5346_v60 }
 0x8cd   :  { %2442 = vmatpush1.bf16.msra.mxu0 %v5349_v59  ;;  %2483 = vmatpush1.bf16.msra.mxu1 %v5352_v1 }
 0x8ce   :  { %2443 = vmatprep.subr.bf16.mxu0 %v5355_v3  ;;  %2484 = vmatprep.subr.bf16.mxu1 %v5358_v12 }
 0x8d1   :  { %2444 = vmatpush1.bf16.msra.mxu0 %v5361_v6  ;;  %2485 = vmatpush1.bf16.msra.mxu1 %v5364_v51 }
 0x8d2   :  { %2445 = vmatprep.subr.bf16.mxu0 %v5367_v54  ;;  %2486 = vmatprep.subr.bf16.mxu1 %v5370_v2 }
 0x8d5   :  { %2446 = vmatpush1.bf16.msra.mxu0 %v5373_v21  ;;  %2487 = vmatpush1.bf16.msra.mxu1 %v5376_v58 }
 0x8d6   :  { %2447 = vmatprep.subr.bf16.mxu0 %v5379_v14  ;;  %2488 = vmatprep.subr.bf16.mxu1 %v5382_v13 }
 0x8d9   :  { %2448 = vmatpush1.bf16.msra.mxu0 %v5385_v48  ;;  %2489 = vmatpush1.bf16.msra.mxu1 %v5388_v15 }
 0x8da   :  { %2449 = vmatprep.subr.bf16.mxu0 %v5391_v16  ;;  %2490 = vmatprep.subr.bf16.mxu1 %v5394_v17 }
 0x8dd   :  { %2450 = vmatpush1.bf16.msra.mxu0 %v5397_v18  ;;  %2491 = vmatpush1.bf16.msra.mxu1 %v5400_v19 }
 0x8de   :  { %2451 = vmatprep.subr.bf16.mxu0 %v5403_v22  ;;  %2492 = vmatprep.subr.bf16.mxu1 %v5406_v23 }
 0x8e1   :  { %2452 = vmatpush1.bf16.msra.mxu0 %v5409_v24  ;;  %2493 = vmatpush1.bf16.msra.mxu1 %v5412_v25 }
 0x8e2   :  { %2557 = vmatprep.subr.bf16.mxu0 %v5309_v4  ;;  %2598 = vmatprep.subr.bf16.mxu1 %v5312_v0 }
 0x984   :  { %v2351_v36 = vpop.f32.mrf.mxu0  ;;  %v2392_v38 = vpop.f32.mrf.mxu1 }
 0x985   :  { %v2399_v63 = vadd.f32 %v2351_v36, %v2312_v11  ;;  %v2401_v61 = vadd.f32 %v2392_v38, %v2314_v57 }
 0x986   :  { %v2353_v39 = vpop.f32.mrf.mxu0  ;;  %v2394_v43 = vpop.f32.mrf.mxu1 }
 0x987   :  { %v4021_v42 = vmul.f32 -1.442695, %v2399_v63  ;;  %v2400_v45 = vadd.f32 %v2353_v39, %v2313_v7  ;;  %v2402_v53 = vadd.f32 %v2394_v43, %v2315_v31 }
 0x988   :  { %v2355_v46 = vpop.f32.mrf.mxu0  ;;  %v2396_v40 = vpop.f32.mrf.mxu1 }
 0x989   :  { %4433 = vpow2.f32 %v4021_v42  ;;  %v4022_v34 = vmul.f32 -1.442695, %v2400_v45  ;;  %v4023_v44 = vmul.f32 -1.442695, %v2402_v53 }
 0x98a   :  { %v2356_v37 = vpop.f32.mrf.mxu0  ;;  %v2397_v47 = vpop.f32.mrf.mxu1 }
 0x98b   :  { %4435 = vpow2.f32 %v4022_v34 }
 0x98c   :  { %4437 = vtanh.f32 %v2401_v61 }
 0x98d   :  { %4439 = vpow2.f32 %v4023_v44 }
 0x996   :  { %v4434_v30 = vpop.eup %4433 }
 0x997   :  { %v2406_v9 = vadd.f32 1.0, %v4434_v30 }
 0x998   :  { %v4436_v27 = vpop.eup %4435 }
 0x999   :  { %4441 = vrcp.f32 %v2406_v9  ;;  %v2412_v26 = vadd.f32 1.0, %v4436_v27  ;;  %v4438_v29 = vpop.eup %4437 }
 0x99a   :  { %v4440_v33 = vpop.eup %4439 }
 0x99b   :  { %4443 = vrcp.f32 %v2412_v26  ;;  %v2419_v36 = vadd.f32 1.0, %v4440_v33 }
 0x99d   :  { %4445 = vrcp.f32 %v2419_v36 }
 0x9a6   :  { %v4442_v35 = vpop.eup %4441 }
 0x9a7   :  { %v2423_v8 = vmul.f32 %v4442_v35, %v4438_v29 }
 0x9a8   :  { %v4444_v11 = vpop.eup %4443 }
 0x9a9   :  { %v2422_v63 = vmul.f32 %v4444_v11, %v5560_v28 }
 0x9aa   :  { %v4446_v38 = vpop.eup %4445 }
 0x9ab   :  { %v5606_v7 = vadd.f32 %v2423_v8, %v2422_v63 }
 0x9ad   :  { %4447 = vtanh.f32 %v5606_v7 }
 0x9ba   :  { %v4448_v39 = vpop.eup %4447 }
 0x9bb   :  { %v2426_v43 = vmul.f32 %v4448_v39, %v4446_v38 }
 0x9bd   :  { %v5611_v42 = vsel %vm2427_vm6, %v2426_v43, %v5565_v32  ;;  %v2436_v45 = vpack.c.bf16 %v2426_v43, %v2426_v43 }
 0x9bf   :  { %2470 = vmatmul.mubr.bf16.vlgmr.msra.gmra.mxu0 %v2436_v45  ;;  %2511 = vmatmul.mubr.bf16.vlgmr.msra.gmra.mxu1 %v2436_v45 }
 0x9c0   :  { %2558 = vmatpush1.bf16.msra.mxu0 %v5273_v52  ;;  %2599 = vmatpush1.bf16.msra.mxu1 %v5328_v5  ;;  %v6256_v52 = vld [vmem:[#allocation19_spill] sm:$0xff] }
 0x9c1   :  { %2559 = vmatprep.subr.bf16.mxu0 %v5277_v56  ;;  %2600 = vmatprep.subr.bf16.mxu1 %v5332_v49  ;;  %v2432_v56 = vunpack.c.l.bf16 %v6256_v52  ;;  %v2433_v40 = vunpack.c.h.bf16 %v6256_v52 }
 0x9c2   :  { %2589 = vmatprep.mubr.bf16.mxu0 %v6245_v62  ;;  %2630 = vmatprep.mubr.bf16.mxu1 %v6245_v62 }
 0x9c4   :  { %2560 = vmatpush1.bf16.msra.mxu0 %v5337_v55  ;;  %2601 = vmatpush1.bf16.msra.mxu1 %v5340_v20 }
 0x9c5   :  { %2561 = vmatprep.subr.bf16.mxu0 %v5343_v10  ;;  %2602 = vmatprep.subr.bf16.mxu1 %v5346_v60 }
 0x9c8   :  { %2562 = vmatpush1.bf16.msra.mxu0 %v5349_v59  ;;  %2603 = vmatpush1.bf16.msra.mxu1 %v5352_v1 }
 0x9c9   :  { %2563 = vmatprep.subr.bf16.mxu0 %v5355_v3  ;;  %2604 = vmatprep.subr.bf16.mxu1 %v5358_v12 }
 0x9cc   :  { %2564 = vmatpush1.bf16.msra.mxu0 %v5361_v6  ;;  %2605 = vmatpush1.bf16.msra.mxu1 %v5364_v51 }
 0x9cd   :  { %2565 = vmatprep.subr.bf16.mxu0 %v5367_v54  ;;  %2606 = vmatprep.subr.bf16.mxu1 %v5370_v2 }
 0x9d0   :  { %2566 = vmatpush1.bf16.msra.mxu0 %v5373_v21  ;;  %2607 = vmatpush1.bf16.msra.mxu1 %v5376_v58 }
 0x9d1   :  { %2567 = vmatprep.subr.bf16.mxu0 %v5379_v14  ;;  %2608 = vmatprep.subr.bf16.mxu1 %v5382_v13 }
 0x9d4   :  { %2568 = vmatpush1.bf16.msra.mxu0 %v5385_v48  ;;  %2609 = vmatpush1.bf16.msra.mxu1 %v5388_v15 }
 0x9d5   :  { %2569 = vmatprep.subr.bf16.mxu0 %v5391_v16  ;;  %2610 = vmatprep.subr.bf16.mxu1 %v5394_v17 }
 0x9d8   :  { %2570 = vmatpush1.bf16.msra.mxu0 %v5397_v18  ;;  %2611 = vmatpush1.bf16.msra.mxu1 %v5400_v19 }
 0x9d9   :  { %2571 = vmatprep.subr.bf16.mxu0 %v5403_v22  ;;  %2612 = vmatprep.subr.bf16.mxu1 %v5406_v23 }
 0x9dc   :  { %2572 = vmatpush1.bf16.msra.mxu0 %v5409_v24  ;;  %2613 = vmatpush1.bf16.msra.mxu1 %v5412_v25 }
 0x9dd   :  { %2677 = vmatprep.subr.bf16.mxu0 %v5309_v4  ;;  %2718 = vmatprep.subr.bf16.mxu1 %v5312_v0  ;;  %v6257_v4 = vld [vmem:[#allocation20_spill] sm:$0xff] }
 0x9de   :  { %v2435_v0 = vunpack.c.h.bf16 %v6257_v4  ;;  %v2434_v9 = vunpack.c.l.bf16 %v6257_v4 }
 0xa7f   :  { %v2471_v28 = vpop.f32.mrf.mxu0  ;;  %v2512_v32 = vpop.f32.mrf.mxu1 }
 0xa80   :  { %v2519_v46 = vadd.f32 %v2471_v28, %v2432_v56  ;;  %v2521_v27 = vadd.f32 %v2512_v32, %v2434_v9  ;;  %v5714_v9 = vld [vmem:[#allocation5 + $0xe8] ss:$16 sps:$4 sm:$0xff]  }
 0xa81   :  { %v2473_v34 = vpop.f32.mrf.mxu0  ;;  %v2514_v37 = vpop.f32.mrf.mxu1 }
 0xa82   :  { %v4024_v47 = vmul.f32 -1.442695, %v2519_v46  ;;  %v2520_v41 = vadd.f32 %v2473_v34, %v2433_v40  ;;  %v2522_v30 = vadd.f32 %v2514_v37, %v2435_v0  ;;  %v5659_v34 = vld [vmem:[#allocation5 + $0xe0] ss:$16 sps:$4 sm:$0xff]  }
 0xa83   :  { %v2475_v31 = vpop.f32.mrf.mxu0  ;;  %v2516_v53 = vpop.f32.mrf.mxu1 }
 0xa84   :  { %4449 = vpow2.f32 %v4024_v47  ;;  %v4025_v57 = vmul.f32 -1.442695, %v2520_v41  ;;  %v4026_v26 = vmul.f32 -1.442695, %v2522_v30 }
 0xa85   :  { %v2476_v61 = vpop.f32.mrf.mxu0  ;;  %v2517_v44 = vpop.f32.mrf.mxu1 }
 0xa86   :  { %4451 = vpow2.f32 %v4025_v57 }
 0xa87   :  { %4453 = vtanh.f32 %v2521_v27  ;;  %v5718_v27 = vld [vmem:[#allocation5 + $0xcc] ss:$16 sps:$4 sm:$0xff]  }
 0xa88   :  { %4455 = vpow2.f32 %v4026_v26  ;;  %v5723_v26 = vld [vmem:[#allocation5 + $0xc0] ss:$16 sps:$4 sm:$0xff]  }
 0xa91   :  { %v4450_v29 = vpop.eup %4449 }
 0xa92   :  { %v2526_v33 = vadd.f32 1.0, %v4450_v29  ;;  %v5726_v29 = vld [vmem:[#allocation5 + $0xc8] ss:$16 sps:$4 sm:$0xff]  }
 0xa93   :  { %v4452_v35 = vpop.eup %4451 }
 0xa94   :  { %4457 = vrcp.f32 %v2526_v33  ;;  %v2532_v8 = vadd.f32 1.0, %v4452_v35  ;;  %v4454_v11 = vpop.eup %4453  ;;  %v5729_v33 = vld [vmem:[#allocation5 + $0xa4] ss:$16 sps:$4 sm:$0xff]   ;;  %v5732_v35 = vld [vmem:[#allocation5 + $0xac] ss:$16 sps:$4 sm:$0xff]  }
 0xa95   :  { %v4456_v36 = vpop.eup %4455 }
 0xa96   :  { %4459 = vrcp.f32 %v2532_v8  ;;  %v2539_v43 = vadd.f32 1.0, %v4456_v36  ;;  %v5735_v8 = vld [vmem:[#allocation5 + $0xa0] ss:$16 sps:$4 sm:$0xff]   ;;  %v5741_v36 = vld [vmem:[#allocation5 + $0x84] ss:$16 sps:$4 sm:$0xff]  }
 0xa98   :  { %4461 = vrcp.f32 %v2539_v43  ;;  %v5753_v43 = vld [vmem:[#allocation5 + $0x64] ss:$16 sps:$4 sm:$0xff]  }
 0xaa1   :  { %v4458_v63 = vpop.eup %4457 }
 0xaa2   :  { %v2543_v38 = vmul.f32 %v4458_v63, %v4454_v11  ;;  %v5738_v11 = vld [vmem:[#allocation5 + $0xa8] ss:$16 sps:$4 sm:$0xff]   ;;  %v5744_v63 = vld [vmem:[#allocation5 + $0x8c] ss:$16 sps:$4 sm:$0xff]  }
 0xaa3   :  { %v4460_v39 = vpop.eup %4459 }
 0xaa4   :  { %v2542_v45 = vmul.f32 %v4460_v39, %v5606_v7  ;;  %v5663_v7 = vld [vmem:[#allocation5 + $0xc4] ss:$16 sps:$4 sm:$0xff]   ;;  %v5750_v39 = vld [vmem:[#allocation5 + $0x88] ss:$16 sps:$4 sm:$0xff]  }
 0xaa5   :  { %v4462_v56 = vpop.eup %4461 }
 0xaa6   :  { %v5652_v52 = vadd.f32 %v2543_v38, %v2542_v45  ;;  %v5747_v38 = vld [vmem:[#allocation5 + $0x80] ss:$16 sps:$4 sm:$0xff]   ;;  %v5756_v45 = vld [vmem:[#allocation5 + $0x6c] ss:$16 sps:$4 sm:$0xff]  }
 0xaa8   :  { %4463 = vtanh.f32 %v5652_v52 }
 0xab5   :  { %v4464_v28 = vpop.eup %4463 }
 0xab6   :  { %v2546_v32 = vmul.f32 %v4464_v28, %v4462_v56  ;;  %v5762_v56 = vld [vmem:[#allocation5 + $0x68] ss:$16 sps:$4 sm:$0xff]   ;;  %v5765_v28 = vld [vmem:[#allocation5 + $0x44] ss:$16 sps:$4 sm:$0xff]  }
 0xab8   :  { %v5657_v46 = vsel %vm2547_vm7, %v2546_v32, %v5611_v42  ;;  %v2556_v40 = vpack.c.bf16 %v2546_v32, %v2546_v32  ;;  %v5768_v32 = vld [vmem:[#allocation5 + $0x4c] ss:$16 sps:$4 sm:$0xff]  }
 0xaba   :  { %2590 = vmatmul.mubr.bf16.vlgmr.msra.gmra.mxu0 %v2556_v40  ;;  %2631 = vmatmul.mubr.bf16.vlgmr.msra.gmra.mxu1 %v2556_v40  ;;  %v5774_v40 = vld [vmem:[#allocation5 + $0x48] ss:$16 sps:$4 sm:$0xff]  }
 0xabb   :  { %2678 = vmatpush1.bf16.msra.mxu0 %v5659_v34  ;;  %2719 = vmatpush1.bf16.msra.mxu1 %v5328_v5  ;;  %v5695_v5 = vld [vmem:[#allocation5 + $0xe4] ss:$16 sps:$4 sm:$0xff]  }
 0xabc   :  { %2679 = vmatprep.subr.bf16.mxu0 %v5663_v7  ;;  %2720 = vmatprep.subr.bf16.mxu1 %v5332_v49  ;;  %v5698_v49 = vld [vmem:[#allocation5 + $0xec] ss:$16 sps:$4 sm:$0xff]  }
 0xabd   :  { %2709 = vmatprep.mubr.bf16.mxu0 %v6245_v62  ;;  %2750 = vmatprep.mubr.bf16.mxu1 %v6245_v62 }
 0xabf   :  { %2680 = vmatpush1.bf16.msra.mxu0 %v5337_v55  ;;  %2721 = vmatpush1.bf16.msra.mxu1 %v5340_v20  ;;  %v6258_v55 = vld [vmem:[#allocation21_spill] sm:$0xff] }
 0xac0   :  { %2681 = vmatprep.subr.bf16.mxu0 %v5343_v10  ;;  %2722 = vmatprep.subr.bf16.mxu1 %v5346_v60  ;;  %v2552_v20 = vunpack.c.l.bf16 %v6258_v55 }
 0xac3   :  { %2682 = vmatpush1.bf16.msra.mxu0 %v5349_v59  ;;  %2723 = vmatpush1.bf16.msra.mxu1 %v5352_v1  ;;  %v2553_v1 = vunpack.c.h.bf16 %v6258_v55  ;;  %v5777_v55 = vld [vmem:[#allocation5 + $0x24] ss:$16 sps:$4 sm:$0xff]  }
 0xac4   :  { %2683 = vmatprep.subr.bf16.mxu0 %v5355_v3  ;;  %2724 = vmatprep.subr.bf16.mxu1 %v5358_v12 }
 0xac7   :  { %2684 = vmatpush1.bf16.msra.mxu0 %v5361_v6  ;;  %2725 = vmatpush1.bf16.msra.mxu1 %v5364_v51 }
 0xac8   :  { %2685 = vmatprep.subr.bf16.mxu0 %v5367_v54  ;;  %2726 = vmatprep.subr.bf16.mxu1 %v5370_v2 }
 0xacb   :  { %2686 = vmatpush1.bf16.msra.mxu0 %v5373_v21  ;;  %2727 = vmatpush1.bf16.msra.mxu1 %v5376_v58 }
 0xacc   :  { %2687 = vmatprep.subr.bf16.mxu0 %v5379_v14  ;;  %2728 = vmatprep.subr.bf16.mxu1 %v5382_v13  ;;  %v6259_v13 = vld [vmem:[#allocation22_spill] sm:$0xff] }
 0xacf   :  { %2688 = vmatpush1.bf16.msra.mxu0 %v5385_v48  ;;  %2729 = vmatpush1.bf16.msra.mxu1 %v5388_v15  ;;  %v2555_v48 = vunpack.c.h.bf16 %v6259_v13 }
 0xad0   :  { %2689 = vmatprep.subr.bf16.mxu0 %v5391_v16  ;;  %2730 = vmatprep.subr.bf16.mxu1 %v5394_v17  ;;  %v2554_v16 = vunpack.c.l.bf16 %v6259_v13 }
 0xad3   :  { %2690 = vmatpush1.bf16.msra.mxu0 %v5397_v18  ;;  %2731 = vmatpush1.bf16.msra.mxu1 %v5400_v19 }
 0xad4   :  { %2691 = vmatprep.subr.bf16.mxu0 %v5403_v22  ;;  %2732 = vmatprep.subr.bf16.mxu1 %v5406_v23 }
 0xad7   :  { %2692 = vmatpush1.bf16.msra.mxu0 %v5409_v24  ;;  %2733 = vmatpush1.bf16.msra.mxu1 %v5412_v25 }
 0xad8   :  { %2797 = vmatprep.subr.bf16.mxu0 %v5695_v5  ;;  %2838 = vmatprep.subr.bf16.mxu1 %v5698_v49 }
 0xb7a   :  { %v2591_v10 = vpop.f32.mrf.mxu0  ;;  %v2632_v60 = vpop.f32.mrf.mxu1 }
 0xb7b   :  { %v2639_v59 = vadd.f32 %v2591_v10, %v2552_v20  ;;  %v2641_v17 = vadd.f32 %v2632_v60, %v2554_v16  ;;  %v5780_v20 = vld [vmem:[#allocation5 + $0x2c] ss:$16 sps:$4 sm:$0xff]   ;;  %v5783_v10 = vld [vmem:[#allocation5 + $0x20] ss:$16 sps:$4 sm:$0xff]   ;;  %v5786_v60 = vld [vmem:[#allocation5 + $0x28] ss:$16 sps:$4 sm:$0xff]  }
 0xb7c   :  { %v2593_v3 = vpop.f32.mrf.mxu0  ;;  %v2634_v12 = vpop.f32.mrf.mxu1 }
 0xb7d   :  { %v4027_v6 = vmul.f32 -1.442695, %v2639_v59  ;;  %v2640_v51 = vadd.f32 %v2593_v3, %v2553_v1  ;;  %v2642_v15 = vadd.f32 %v2634_v12, %v2555_v48  ;;  %v5789_v59 = vld [vmem:[#allocation5 + $0x4] ss:$16 sps:$4 sm:$0xff]   ;;  %v5792_v1 = vld [vmem:[#allocation5 + $0xc] ss:$16 sps:$4 sm:$0xff]  }
 0xb7e   :  { %v2595_v54 = vpop.f32.mrf.mxu0  ;;  %v2636_v2 = vpop.f32.mrf.mxu1  ;;  %v5795_v3 = vld [vmem:[#allocation5] ss:$16 sps:$4 sm:$0xff]   ;;  %v5798_v12 = vld [vmem:[#allocation5 + $0x8] ss:$16 sps:$4 sm:$0xff]  }
 0xb7f   :  { %4465 = vpow2.f32 %v4027_v6  ;;  %v4028_v21 = vmul.f32 -1.442695, %v2640_v51  ;;  %v4029_v18 = vmul.f32 -1.442695, %v2642_v15  ;;  %v6260_v6 = vld [vmem:[#allocation23_spill] sm:$0xff] }
 0xb80   :  { %v2596_v58 = vpop.f32.mrf.mxu0  ;;  %v2637_v14 = vpop.f32.mrf.mxu1  ;;  %v2672_v51 = vunpack.c.l.bf16 %v6260_v6 }
 0xb81   :  { %4467 = vpow2.f32 %v4028_v21  ;;  %v2673_v58 = vunpack.c.h.bf16 %v6260_v6 }
 0xb82   :  { %4469 = vtanh.f32 %v2641_v17 }
 0xb83   :  { %4471 = vpow2.f32 %v4029_v18 }
 0xb8c   :  { %v4466_v19 = vpop.eup %4465 }
 0xb8d   :  { %v2646_v22 = vadd.f32 1.0, %v4466_v19 }
 0xb8e   :  { %v4468_v23 = vpop.eup %4467 }
 0xb8f   :  { %4473 = vrcp.f32 %v2646_v22  ;;  %v2652_v24 = vadd.f32 1.0, %v4468_v23  ;;  %v4470_v25 = vpop.eup %4469  ;;  %v6261_v23 = vld [vmem:[#allocation24_spill] sm:$0xff] }
 0xb90   :  { %v4472_v42 = vpop.eup %4471 }
 0xb91   :  { %4475 = vrcp.f32 %v2652_v24  ;;  %v2659_v31 = vadd.f32 1.0, %v4472_v42  ;;  %v2675_v24 = vunpack.c.h.bf16 %v6261_v23  ;;  %v2674_v42 = vunpack.c.l.bf16 %v6261_v23 }
 0xb93   :  { %4477 = vrcp.f32 %v2659_v31 }
 0xb9c   :  { %v4474_v37 = vpop.eup %4473 }
 0xb9d   :  { %v2663_v47 = vmul.f32 %v4474_v37, %v4470_v25 }
 0xb9e   :  { %v4476_v41 = vpop.eup %4475 }
 0xb9f   :  { %v2662_v53 = vmul.f32 %v4476_v41, %v5652_v52  ;;  %v5759_v52 = vld [vmem:[#allocation5 + $0x60] ss:$16 sps:$4 sm:$0xff]  }
 0xba0   :  { %v4478_v61 = vpop.eup %4477 }
 0xba1   :  { %v5706_v57 = vadd.f32 %v2663_v47, %v2662_v53 }
 0xba3   :  { %4479 = vtanh.f32 %v5706_v57 }
 0xbb0   :  { %v4480_v44 = vpop.eup %4479 }
 0xbb1   :  { %v2666_v4 = vmul.f32 %v4480_v44, %v4478_v61 }
 0xbb3   :  { %v5711_v0 = vsel %vm2667_vm8, %v2666_v4, %v5657_v46  ;;  %v2676_v30 = vpack.c.bf16 %v2666_v4, %v2666_v4  ;;  %v5771_v46 = vld [vmem:[#allocation5 + $0x40] ss:$16 sps:$4 sm:$0xff]  }
 0xbb5   :  { %2710 = vmatmul.mubr.bf16.vlgmr.msra.gmra.mxu0 %v2676_v30  ;;  %2751 = vmatmul.mubr.bf16.vlgmr.msra.gmra.mxu1 %v2676_v30 }
 0xbb6   :  { %2798 = vmatpush1.bf16.msra.mxu0 %v5659_v34  ;;  %2839 = vmatpush1.bf16.msra.mxu1 %v5714_v9 }
 0xbb7   :  { %2799 = vmatprep.subr.bf16.mxu0 %v5663_v7  ;;  %2840 = vmatprep.subr.bf16.mxu1 %v5718_v27 }
 0xbb8   :  { %2829 = vmatprep.mubr.bf16.mxu0 %v6245_v62  ;;  %2870 = vmatprep.mubr.bf16.mxu1 %v6245_v62 }
 0xbba   :  { %2800 = vmatpush1.bf16.msra.mxu0 %v5723_v26  ;;  %2841 = vmatpush1.bf16.msra.mxu1 %v5726_v29 }
 0xbbb   :  { %2801 = vmatprep.subr.bf16.mxu0 %v5729_v33  ;;  %2842 = vmatprep.subr.bf16.mxu1 %v5732_v35 }
 0xbbe   :  { %2802 = vmatpush1.bf16.msra.mxu0 %v5735_v8  ;;  %2843 = vmatpush1.bf16.msra.mxu1 %v5738_v11 }
 0xbbf   :  { %2803 = vmatprep.subr.bf16.mxu0 %v5741_v36  ;;  %2844 = vmatprep.subr.bf16.mxu1 %v5744_v63 }
 0xbc2   :  { %2804 = vmatpush1.bf16.msra.mxu0 %v5747_v38  ;;  %2845 = vmatpush1.bf16.msra.mxu1 %v5750_v39 }
 0xbc3   :  { %2805 = vmatprep.subr.bf16.mxu0 %v5753_v43  ;;  %2846 = vmatprep.subr.bf16.mxu1 %v5756_v45 }
 0xbc6   :  { %2806 = vmatpush1.bf16.msra.mxu0 %v5759_v52  ;;  %2847 = vmatpush1.bf16.msra.mxu1 %v5762_v56 }
 0xbc7   :  { %2807 = vmatprep.subr.bf16.mxu0 %v5765_v28  ;;  %2848 = vmatprep.subr.bf16.mxu1 %v5768_v32 }
 0xbca   :  { %2808 = vmatpush1.bf16.msra.mxu0 %v5771_v46  ;;  %2849 = vmatpush1.bf16.msra.mxu1 %v5774_v40 }
 0xbcb   :  { %2809 = vmatprep.subr.bf16.mxu0 %v5777_v55  ;;  %2850 = vmatprep.subr.bf16.mxu1 %v5780_v20 }
 0xbce   :  { %2810 = vmatpush1.bf16.msra.mxu0 %v5783_v10  ;;  %2851 = vmatpush1.bf16.msra.mxu1 %v5786_v60 }
 0xbcf   :  { %2811 = vmatprep.subr.bf16.mxu0 %v5789_v59  ;;  %2852 = vmatprep.subr.bf16.mxu1 %v5792_v1 }
 0xbd2   :  { %2812 = vmatpush1.bf16.msra.mxu0 %v5795_v3  ;;  %2853 = vmatpush1.bf16.msra.mxu1 %v5798_v12 }
 0xbd3   :  { %2917 = vmatprep.subr.bf16.mxu0 %v5695_v5  ;;  %2958 = vmatprep.subr.bf16.mxu1 %v5698_v49 }
 0xc75   :  { %v2711_v54 = vpop.f32.mrf.mxu0  ;;  %v2752_v2 = vpop.f32.mrf.mxu1 }
 0xc76   :  { %v2759_v21 = vadd.f32 %v2711_v54, %v2672_v51  ;;  %v2761_v37 = vadd.f32 %v2752_v2, %v2674_v42 }
 0xc77   :  { %v2713_v14 = vpop.f32.mrf.mxu0  ;;  %v2754_v13 = vpop.f32.mrf.mxu1 }
 0xc78   :  { %v4030_v48 = vmul.f32 -1.442695, %v2759_v21  ;;  %v2760_v15 = vadd.f32 %v2713_v14, %v2673_v58  ;;  %v2762_v25 = vadd.f32 %v2754_v13, %v2675_v24 }
 0xc79   :  { %v2715_v16 = vpop.f32.mrf.mxu0  ;;  %v2756_v17 = vpop.f32.mrf.mxu1 }
 0xc7a   :  { %4481 = vpow2.f32 %v4030_v48  ;;  %v4031_v18 = vmul.f32 -1.442695, %v2760_v15  ;;  %v4032_v47 = vmul.f32 -1.442695, %v2762_v25 }
 0xc7b   :  { %v2716_v19 = vpop.f32.mrf.mxu0  ;;  %v2757_v22 = vpop.f32.mrf.mxu1 }
 0xc7c   :  { %4483 = vpow2.f32 %v4031_v18 }
 0xc7d   :  { %4485 = vtanh.f32 %v2761_v37 }
 0xc7e   :  { %4487 = vpow2.f32 %v4032_v47 }
 0xc87   :  { %v4482_v41 = vpop.eup %4481 }
 0xc88   :  { %v2766_v31 = vadd.f32 1.0, %v4482_v41 }
 0xc89   :  { %v4484_v53 = vpop.eup %4483 }
 0xc8a   :  { %4489 = vrcp.f32 %v2766_v31  ;;  %v2772_v61 = vadd.f32 1.0, %v4484_v53  ;;  %v4486_v44 = vpop.eup %4485  ;;  %v6263_v53 = vld [vmem:[#allocation26_spill] sm:$0xff] }
 0xc8b   :  { %v4488_v4 = vpop.eup %4487 }
 0xc8c   :  { %4491 = vrcp.f32 %v2772_v61  ;;  %v2779_v54 = vadd.f32 1.0, %v4488_v4  ;;  %v2795_v61 = vunpack.c.h.bf16 %v6263_v53  ;;  %v2794_v4 = vunpack.c.l.bf16 %v6263_v53 }
 0xc8e   :  { %4493 = vrcp.f32 %v2779_v54 }
 0xc97   :  { %v4490_v30 = vpop.eup %4489 }
 0xc98   :  { %v2783_v6 = vmul.f32 %v4490_v30, %v4486_v44 }
 0xc99   :  { %v4492_v51 = vpop.eup %4491 }
 0xc9a   :  { %v2782_v21 = vmul.f32 %v4492_v51, %v5706_v57  ;;  %v6262_v57 = vld [vmem:[#allocation25_spill] sm:$0xff] }
 0xc9b   :  { %v4494_v2 = vpop.eup %4493  ;;  %v2793_v19 = vunpack.c.h.bf16 %v6262_v57 }
 0xc9c   :  { %v5808_v58 = vadd.f32 %v2783_v6, %v2782_v21 }
 0xc9e   :  { %4495 = vtanh.f32 %v5808_v58 }
 0xcab   :  { %v4496_v14 = vpop.eup %4495 }
 0xcac   :  { %v2786_v13 = vmul.f32 %v4496_v14, %v4494_v2 }
 0xcae   :  { %v5813_v48 = vsel %vm2787_vm9, %v2786_v13, %v5711_v0  ;;  %v2796_v15 = vpack.c.bf16 %v2786_v13, %v2786_v13  ;;  %v2792_v0 = vunpack.c.l.bf16 %v6262_v57 }
 0xcb0   :  { %2830 = vmatmul.mubr.bf16.vlgmr.msra.gmra.mxu0 %v2796_v15  ;;  %2871 = vmatmul.mubr.bf16.vlgmr.msra.gmra.mxu1 %v2796_v15 }
 0xcb1   :  { %2918 = vmatpush1.bf16.msra.mxu0 %v5659_v34  ;;  %2959 = vmatpush1.bf16.msra.mxu1 %v5714_v9 }
 0xcb2   :  { %2919 = vmatprep.subr.bf16.mxu0 %v5663_v7  ;;  %2960 = vmatprep.subr.bf16.mxu1 %v5718_v27 }
 0xcb3   :  { %2949 = vmatprep.mubr.bf16.mxu0 %v6245_v62  ;;  %2990 = vmatprep.mubr.bf16.mxu1 %v6245_v62 }
 0xcb5   :  { %2920 = vmatpush1.bf16.msra.mxu0 %v5723_v26  ;;  %2961 = vmatpush1.bf16.msra.mxu1 %v5726_v29 }
 0xcb6   :  { %2921 = vmatprep.subr.bf16.mxu0 %v5729_v33  ;;  %2962 = vmatprep.subr.bf16.mxu1 %v5732_v35 }
 0xcb9   :  { %2922 = vmatpush1.bf16.msra.mxu0 %v5735_v8  ;;  %2963 = vmatpush1.bf16.msra.mxu1 %v5738_v11 }
 0xcba   :  { %2923 = vmatprep.subr.bf16.mxu0 %v5741_v36  ;;  %2964 = vmatprep.subr.bf16.mxu1 %v5744_v63 }
 0xcbd   :  { %2924 = vmatpush1.bf16.msra.mxu0 %v5747_v38  ;;  %2965 = vmatpush1.bf16.msra.mxu1 %v5750_v39 }
 0xcbe   :  { %2925 = vmatprep.subr.bf16.mxu0 %v5753_v43  ;;  %2966 = vmatprep.subr.bf16.mxu1 %v5756_v45 }
 0xcc1   :  { %2926 = vmatpush1.bf16.msra.mxu0 %v5759_v52  ;;  %2967 = vmatpush1.bf16.msra.mxu1 %v5762_v56 }
 0xcc2   :  { %2927 = vmatprep.subr.bf16.mxu0 %v5765_v28  ;;  %2968 = vmatprep.subr.bf16.mxu1 %v5768_v32 }
 0xcc5   :  { %2928 = vmatpush1.bf16.msra.mxu0 %v5771_v46  ;;  %2969 = vmatpush1.bf16.msra.mxu1 %v5774_v40 }
 0xcc6   :  { %2929 = vmatprep.subr.bf16.mxu0 %v5777_v55  ;;  %2970 = vmatprep.subr.bf16.mxu1 %v5780_v20 }
 0xcc9   :  { %2930 = vmatpush1.bf16.msra.mxu0 %v5783_v10  ;;  %2971 = vmatpush1.bf16.msra.mxu1 %v5786_v60 }
 0xcca   :  { %2931 = vmatprep.subr.bf16.mxu0 %v5789_v59  ;;  %2972 = vmatprep.subr.bf16.mxu1 %v5792_v1 }
 0xccd   :  { %2932 = vmatpush1.bf16.msra.mxu0 %v5795_v3  ;;  %2973 = vmatpush1.bf16.msra.mxu1 %v5798_v12 }
 0xcce   :  { %3037 = vmatprep.subr.bf16.mxu0 %v5695_v5  ;;  %3078 = vmatprep.subr.bf16.mxu1 %v5698_v49 }
 0xd70   :  { %v2831_v16 = vpop.f32.mrf.mxu0  ;;  %v2872_v17 = vpop.f32.mrf.mxu1 }
 0xd71   :  { %v2879_v18 = vadd.f32 %v2831_v16, %v2792_v0  ;;  %v2881_v30 = vadd.f32 %v2872_v17, %v2794_v4 }
 0xd72   :  { %v2833_v22 = vpop.f32.mrf.mxu0  ;;  %v2874_v23 = vpop.f32.mrf.mxu1 }
 0xd73   :  { %v4033_v24 = vmul.f32 -1.442695, %v2879_v18  ;;  %v2880_v25 = vadd.f32 %v2833_v22, %v2793_v19  ;;  %v2882_v44 = vadd.f32 %v2874_v23, %v2795_v61 }
 0xd74   :  { %v2835_v42 = vpop.f32.mrf.mxu0  ;;  %v2876_v37 = vpop.f32.mrf.mxu1 }
 0xd75   :  { %4497 = vpow2.f32 %v4033_v24  ;;  %v4034_v47 = vmul.f32 -1.442695, %v2880_v25  ;;  %v4035_v6 = vmul.f32 -1.442695, %v2882_v44 }
 0xd76   :  { %v2836_v41 = vpop.f32.mrf.mxu0  ;;  %v2877_v31 = vpop.f32.mrf.mxu1 }
 0xd77   :  { %4499 = vpow2.f32 %v4034_v47 }
 0xd78   :  { %4501 = vtanh.f32 %v2881_v30 }
 0xd79   :  { %4503 = vpow2.f32 %v4035_v6 }
 0xd82   :  { %v4498_v51 = vpop.eup %4497 }
 0xd83   :  { %v2886_v54 = vadd.f32 1.0, %v4498_v51 }
 0xd84   :  { %v4500_v21 = vpop.eup %4499 }
 0xd85   :  { %4505 = vrcp.f32 %v2886_v54  ;;  %v2892_v2 = vadd.f32 1.0, %v4500_v21  ;;  %v4502_v14 = vpop.eup %4501  ;;  %v6265_v21 = vld [vmem:[#allocation28_spill] sm:$0xff] }
 0xd86   :  { %v4504_v13 = vpop.eup %4503 }
 0xd87   :  { %4507 = vrcp.f32 %v2892_v2  ;;  %v2899_v16 = vadd.f32 1.0, %v4504_v13  ;;  %v2915_v2 = vunpack.c.h.bf16 %v6265_v21  ;;  %v2914_v13 = vunpack.c.l.bf16 %v6265_v21 }
 0xd89   :  { %4509 = vrcp.f32 %v2899_v16 }
 0xd92   :  { %v4506_v15 = vpop.eup %4505 }
 0xd93   :  { %v2903_v57 = vmul.f32 %v4506_v15, %v4502_v14 }
 0xd94   :  { %v4508_v0 = vpop.eup %4507 }
 0xd95   :  { %v2902_v18 = vmul.f32 %v4508_v0, %v5808_v58  ;;  %v6264_v58 = vld [vmem:[#allocation27_spill] sm:$0xff] }
 0xd96   :  { %v4510_v17 = vpop.eup %4509  ;;  %v2913_v41 = vunpack.c.h.bf16 %v6264_v58 }
 0xd97   :  { %v5854_v19 = vadd.f32 %v2903_v57, %v2902_v18 }
 0xd99   :  { %4511 = vtanh.f32 %v5854_v19 }
 0xda6   :  { %v4512_v22 = vpop.eup %4511 }
 0xda7   :  { %v2906_v23 = vmul.f32 %v4512_v22, %v4510_v17 }
 0xda9   :  { %v5859_v24 = vsel %vm2907_vm10, %v2906_v23, %v5813_v48  ;;  %v2916_v25 = vpack.c.bf16 %v2906_v23, %v2906_v23  ;;  %v2912_v48 = vunpack.c.l.bf16 %v6264_v58 }
 0xdab   :  { %2950 = vmatmul.mubr.bf16.vlgmr.msra.gmra.mxu0 %v2916_v25  ;;  %2991 = vmatmul.mubr.bf16.vlgmr.msra.gmra.mxu1 %v2916_v25 }
 0xdac   :  { %3038 = vmatpush1.bf16.msra.mxu0 %v5659_v34  ;;  %3079 = vmatpush1.bf16.msra.mxu1 %v5714_v9 }
 0xdad   :  { %3039 = vmatprep.subr.bf16.mxu0 %v5663_v7  ;;  %3080 = vmatprep.subr.bf16.mxu1 %v5718_v27 }
 0xdae   :  { %3069 = vmatprep.mubr.bf16.mxu0 %v6245_v62  ;;  %3110 = vmatprep.mubr.bf16.mxu1 %v6245_v62 }
 0xdb0   :  { %3040 = vmatpush1.bf16.msra.mxu0 %v5723_v26  ;;  %3081 = vmatpush1.bf16.msra.mxu1 %v5726_v29 }
 0xdb1   :  { %3041 = vmatprep.subr.bf16.mxu0 %v5729_v33  ;;  %3082 = vmatprep.subr.bf16.mxu1 %v5732_v35 }
 0xdb4   :  { %3042 = vmatpush1.bf16.msra.mxu0 %v5735_v8  ;;  %3083 = vmatpush1.bf16.msra.mxu1 %v5738_v11 }
 0xdb5   :  { %3043 = vmatprep.subr.bf16.mxu0 %v5741_v36  ;;  %3084 = vmatprep.subr.bf16.mxu1 %v5744_v63 }
 0xdb8   :  { %3044 = vmatpush1.bf16.msra.mxu0 %v5747_v38  ;;  %3085 = vmatpush1.bf16.msra.mxu1 %v5750_v39 }
 0xdb9   :  { %3045 = vmatprep.subr.bf16.mxu0 %v5753_v43  ;;  %3086 = vmatprep.subr.bf16.mxu1 %v5756_v45 }
 0xdbc   :  { %3046 = vmatpush1.bf16.msra.mxu0 %v5759_v52  ;;  %3087 = vmatpush1.bf16.msra.mxu1 %v5762_v56 }
 0xdbd   :  { %3047 = vmatprep.subr.bf16.mxu0 %v5765_v28  ;;  %3088 = vmatprep.subr.bf16.mxu1 %v5768_v32 }
 0xdc0   :  { %3048 = vmatpush1.bf16.msra.mxu0 %v5771_v46  ;;  %3089 = vmatpush1.bf16.msra.mxu1 %v5774_v40 }
 0xdc1   :  { %3049 = vmatprep.subr.bf16.mxu0 %v5777_v55  ;;  %3090 = vmatprep.subr.bf16.mxu1 %v5780_v20 }
 0xdc4   :  { %3050 = vmatpush1.bf16.msra.mxu0 %v5783_v10  ;;  %3091 = vmatpush1.bf16.msra.mxu1 %v5786_v60 }
 0xdc5   :  { %3051 = vmatprep.subr.bf16.mxu0 %v5789_v59  ;;  %3092 = vmatprep.subr.bf16.mxu1 %v5792_v1 }
 0xdc8   :  { %3052 = vmatpush1.bf16.msra.mxu0 %v5795_v3  ;;  %3093 = vmatpush1.bf16.msra.mxu1 %v5798_v12 }
 0xdc9   :  { %3157 = vmatprep.subr.bf16.mxu0 %v5695_v5  ;;  %3198 = vmatprep.subr.bf16.mxu1 %v5698_v49 }
 0xe6b   :  { %v2951_v42 = vpop.f32.mrf.mxu0  ;;  %v2992_v37 = vpop.f32.mrf.mxu1 }
 0xe6c   :  { %v2999_v47 = vadd.f32 %v2951_v42, %v2912_v48  ;;  %v3001_v15 = vadd.f32 %v2992_v37, %v2914_v13 }
 0xe6d   :  { %v2953_v31 = vpop.f32.mrf.mxu0  ;;  %v2994_v53 = vpop.f32.mrf.mxu1 }
 0xe6e   :  { %v4036_v61 = vmul.f32 -1.442695, %v2999_v47  ;;  %v3000_v44 = vadd.f32 %v2953_v31, %v2913_v41  ;;  %v3002_v14 = vadd.f32 %v2994_v53, %v2915_v2 }
 0xe6f   :  { %v2955_v4 = vpop.f32.mrf.mxu0  ;;  %v2996_v30 = vpop.f32.mrf.mxu1 }
 0xe70   :  { %4513 = vpow2.f32 %v4036_v61  ;;  %v4037_v6 = vmul.f32 -1.442695, %v3000_v44  ;;  %v4038_v57 = vmul.f32 -1.442695, %v3002_v14 }
 0xe71   :  { %v2956_v51 = vpop.f32.mrf.mxu0  ;;  %v2997_v54 = vpop.f32.mrf.mxu1 }
 0xe72   :  { %4515 = vpow2.f32 %v4037_v6 }
 0xe73   :  { %4517 = vtanh.f32 %v3001_v15 }
 0xe74   :  { %4519 = vpow2.f32 %v4038_v57 }
 0xe7d   :  { %v4514_v0 = vpop.eup %4513 }
 0xe7e   :  { %v3006_v16 = vadd.f32 1.0, %v4514_v0 }
 0xe7f   :  { %v4516_v18 = vpop.eup %4515 }
 0xe80   :  { %4521 = vrcp.f32 %v3006_v16  ;;  %v3012_v17 = vadd.f32 1.0, %v4516_v18  ;;  %v4518_v22 = vpop.eup %4517  ;;  %v6267_v18 = vld [vmem:[#allocation30_spill] sm:$0xff] }
 0xe81   :  { %v4520_v23 = vpop.eup %4519 }
 0xe82   :  { %4523 = vrcp.f32 %v3012_v17  ;;  %v3019_v42 = vadd.f32 1.0, %v4520_v23  ;;  %v3035_v17 = vunpack.c.h.bf16 %v6267_v18  ;;  %v3034_v23 = vunpack.c.l.bf16 %v6267_v18 }
 0xe84   :  { %4525 = vrcp.f32 %v3019_v42 }
 0xe8d   :  { %v4522_v25 = vpop.eup %4521 }
 0xe8e   :  { %v3023_v58 = vmul.f32 %v4522_v25, %v4518_v22 }
 0xe8f   :  { %v4524_v48 = vpop.eup %4523 }
 0xe90   :  { %v3022_v47 = vmul.f32 %v4524_v48, %v5854_v19  ;;  %v6266_v19 = vld [vmem:[#allocation29_spill] sm:$0xff] }
 0xe91   :  { %v4526_v37 = vpop.eup %4525  ;;  %v3033_v51 = vunpack.c.h.bf16 %v6266_v19 }
 0xe92   :  { %v5900_v41 = vadd.f32 %v3023_v58, %v3022_v47 }
 0xe94   :  { %4527 = vtanh.f32 %v5900_v41 }
 0xea1   :  { %v4528_v31 = vpop.eup %4527 }
 0xea2   :  { %v3026_v53 = vmul.f32 %v4528_v31, %v4526_v37 }
 0xea4   :  { %v5905_v61 = vsel %vm3027_vm11, %v3026_v53, %v5859_v24  ;;  %v3036_v44 = vpack.c.bf16 %v3026_v53, %v3026_v53  ;;  %v3032_v24 = vunpack.c.l.bf16 %v6266_v19 }
 0xea6   :  { %3070 = vmatmul.mubr.bf16.vlgmr.msra.gmra.mxu0 %v3036_v44  ;;  %3111 = vmatmul.mubr.bf16.vlgmr.msra.gmra.mxu1 %v3036_v44 }
 0xea7   :  { %3158 = vmatpush1.bf16.msra.mxu0 %v5659_v34  ;;  %3199 = vmatpush1.bf16.msra.mxu1 %v5714_v9 }
 0xea8   :  { %3159 = vmatprep.subr.bf16.mxu0 %v5663_v7  ;;  %3200 = vmatprep.subr.bf16.mxu1 %v5718_v27 }
 0xea9   :  { %3189 = vmatprep.mubr.bf16.mxu0 %v6245_v62  ;;  %3230 = vmatprep.mubr.bf16.mxu1 %v6245_v62 }
 0xeab   :  { %3160 = vmatpush1.bf16.msra.mxu0 %v5723_v26  ;;  %3201 = vmatpush1.bf16.msra.mxu1 %v5726_v29 }
 0xeac   :  { %3161 = vmatprep.subr.bf16.mxu0 %v5729_v33  ;;  %3202 = vmatprep.subr.bf16.mxu1 %v5732_v35 }
 0xeaf   :  { %3162 = vmatpush1.bf16.msra.mxu0 %v5735_v8  ;;  %3203 = vmatpush1.bf16.msra.mxu1 %v5738_v11 }
 0xeb0   :  { %3163 = vmatprep.subr.bf16.mxu0 %v5741_v36  ;;  %3204 = vmatprep.subr.bf16.mxu1 %v5744_v63 }
 0xeb3   :  { %3164 = vmatpush1.bf16.msra.mxu0 %v5747_v38  ;;  %3205 = vmatpush1.bf16.msra.mxu1 %v5750_v39 }
 0xeb4   :  { %3165 = vmatprep.subr.bf16.mxu0 %v5753_v43  ;;  %3206 = vmatprep.subr.bf16.mxu1 %v5756_v45 }
 0xeb7   :  { %3166 = vmatpush1.bf16.msra.mxu0 %v5759_v52  ;;  %3207 = vmatpush1.bf16.msra.mxu1 %v5762_v56 }
 0xeb8   :  { %3167 = vmatprep.subr.bf16.mxu0 %v5765_v28  ;;  %3208 = vmatprep.subr.bf16.mxu1 %v5768_v32 }
 0xebb   :  { %3168 = vmatpush1.bf16.msra.mxu0 %v5771_v46  ;;  %3209 = vmatpush1.bf16.msra.mxu1 %v5774_v40 }
 0xebc   :  { %3169 = vmatprep.subr.bf16.mxu0 %v5777_v55  ;;  %3210 = vmatprep.subr.bf16.mxu1 %v5780_v20 }
 0xebf   :  { %3170 = vmatpush1.bf16.msra.mxu0 %v5783_v10  ;;  %3211 = vmatpush1.bf16.msra.mxu1 %v5786_v60 }
 0xec0   :  { %3171 = vmatprep.subr.bf16.mxu0 %v5789_v59  ;;  %3212 = vmatprep.subr.bf16.mxu1 %v5792_v1 }
 0xec3   :  { %3172 = vmatpush1.bf16.msra.mxu0 %v5795_v3  ;;  %3213 = vmatpush1.bf16.msra.mxu1 %v5798_v12 }
 0xec4   :  { %3277 = vmatprep.subr.bf16.mxu0 %v5695_v5  ;;  %3318 = vmatprep.subr.bf16.mxu1 %v5698_v49 }
 0xf66   :  { %v3071_v4 = vpop.f32.mrf.mxu0  ;;  %v3112_v30 = vpop.f32.mrf.mxu1 }
 0xf67   :  { %v3119_v6 = vadd.f32 %v3071_v4, %v3032_v24  ;;  %v3121_v25 = vadd.f32 %v3112_v30, %v3034_v23 }
 0xf68   :  { %v3073_v54 = vpop.f32.mrf.mxu0  ;;  %v3114_v21 = vpop.f32.mrf.mxu1 }
 0xf69   :  { %v4039_v2 = vmul.f32 -1.442695, %v3119_v6  ;;  %v3120_v14 = vadd.f32 %v3073_v54, %v3033_v51  ;;  %v3122_v22 = vadd.f32 %v3114_v21, %v3035_v17 }
 0xf6a   :  { %v3075_v13 = vpop.f32.mrf.mxu0  ;;  %v3116_v15 = vpop.f32.mrf.mxu1 }
 0xf6b   :  { %4529 = vpow2.f32 %v4039_v2  ;;  %v4040_v57 = vmul.f32 -1.442695, %v3120_v14  ;;  %v4041_v58 = vmul.f32 -1.442695, %v3122_v22 }
 0xf6c   :  { %v3076_v0 = vpop.f32.mrf.mxu0  ;;  %v3117_v16 = vpop.f32.mrf.mxu1 }
 0xf6d   :  { %4531 = vpow2.f32 %v4040_v57 }
 0xf6e   :  { %4533 = vtanh.f32 %v3121_v25 }
 0xf6f   :  { %4535 = vpow2.f32 %v4041_v58 }
 0xf78   :  { %v4530_v48 = vpop.eup %4529 }
 0xf79   :  { %v3126_v42 = vadd.f32 1.0, %v4530_v48 }
 0xf7a   :  { %v4532_v47 = vpop.eup %4531 }
 0xf7b   :  { %4537 = vrcp.f32 %v3126_v42  ;;  %v3132_v37 = vadd.f32 1.0, %v4532_v47  ;;  %v4534_v31 = vpop.eup %4533  ;;  %v6269_v47 = vld [vmem:[#allocation32_spill] sm:$0xff] }
 0xf7c   :  { %v4536_v53 = vpop.eup %4535 }
 0xf7d   :  { %4539 = vrcp.f32 %v3132_v37  ;;  %v3139_v4 = vadd.f32 1.0, %v4536_v53  ;;  %v3155_v37 = vunpack.c.h.bf16 %v6269_v47  ;;  %v3154_v53 = vunpack.c.l.bf16 %v6269_v47 }
 0xf7f   :  { %4541 = vrcp.f32 %v3139_v4 }
 0xf88   :  { %v4538_v44 = vpop.eup %4537 }
 0xf89   :  { %v3143_v19 = vmul.f32 %v4538_v44, %v4534_v31 }
 0xf8a   :  { %v4540_v24 = vpop.eup %4539 }
 0xf8b   :  { %v3142_v6 = vmul.f32 %v4540_v24, %v5900_v41  ;;  %v6268_v41 = vld [vmem:[#allocation31_spill] sm:$0xff] }
 0xf8c   :  { %v4542_v30 = vpop.eup %4541  ;;  %v3153_v0 = vunpack.c.h.bf16 %v6268_v41 }
 0xf8d   :  { %v5946_v51 = vadd.f32 %v3143_v19, %v3142_v6 }
 0xf8f   :  { %4543 = vtanh.f32 %v5946_v51 }
 0xf9c   :  { %v4544_v54 = vpop.eup %4543 }
 0xf9d   :  { %v3146_v21 = vmul.f32 %v4544_v54, %v4542_v30 }
 0xf9f   :  { %v5951_v2 = vsel %vm3147_vm12, %v3146_v21, %v5905_v61  ;;  %v3156_v14 = vpack.c.bf16 %v3146_v21, %v3146_v21  ;;  %v3152_v61 = vunpack.c.l.bf16 %v6268_v41 }
 0xfa1   :  { %3190 = vmatmul.mubr.bf16.vlgmr.msra.gmra.mxu0 %v3156_v14  ;;  %3231 = vmatmul.mubr.bf16.vlgmr.msra.gmra.mxu1 %v3156_v14 }
 0xfa2   :  { %3278 = vmatpush1.bf16.msra.mxu0 %v5659_v34  ;;  %3319 = vmatpush1.bf16.msra.mxu1 %v5714_v9 }
 0xfa3   :  { %3279 = vmatprep.subr.bf16.mxu0 %v5663_v7  ;;  %3320 = vmatprep.subr.bf16.mxu1 %v5718_v27 }
 0xfa4   :  { %3309 = vmatprep.mubr.bf16.mxu0 %v6245_v62  ;;  %3350 = vmatprep.mubr.bf16.mxu1 %v6245_v62 }
 0xfa6   :  { %3280 = vmatpush1.bf16.msra.mxu0 %v5723_v26  ;;  %3321 = vmatpush1.bf16.msra.mxu1 %v5726_v29 }
 0xfa7   :  { %3281 = vmatprep.subr.bf16.mxu0 %v5729_v33  ;;  %3322 = vmatprep.subr.bf16.mxu1 %v5732_v35 }
 0xfaa   :  { %3282 = vmatpush1.bf16.msra.mxu0 %v5735_v8  ;;  %3323 = vmatpush1.bf16.msra.mxu1 %v5738_v11 }
 0xfab   :  { %3283 = vmatprep.subr.bf16.mxu0 %v5741_v36  ;;  %3324 = vmatprep.subr.bf16.mxu1 %v5744_v63 }
 0xfae   :  { %3284 = vmatpush1.bf16.msra.mxu0 %v5747_v38  ;;  %3325 = vmatpush1.bf16.msra.mxu1 %v5750_v39 }
 0xfaf   :  { %3285 = vmatprep.subr.bf16.mxu0 %v5753_v43  ;;  %3326 = vmatprep.subr.bf16.mxu1 %v5756_v45 }
 0xfb2   :  { %3286 = vmatpush1.bf16.msra.mxu0 %v5759_v52  ;;  %3327 = vmatpush1.bf16.msra.mxu1 %v5762_v56 }
 0xfb3   :  { %3287 = vmatprep.subr.bf16.mxu0 %v5765_v28  ;;  %3328 = vmatprep.subr.bf16.mxu1 %v5768_v32 }
 0xfb6   :  { %3288 = vmatpush1.bf16.msra.mxu0 %v5771_v46  ;;  %3329 = vmatpush1.bf16.msra.mxu1 %v5774_v40 }
 0xfb7   :  { %3289 = vmatprep.subr.bf16.mxu0 %v5777_v55  ;;  %3330 = vmatprep.subr.bf16.mxu1 %v5780_v20 }
 0xfba   :  { %3290 = vmatpush1.bf16.msra.mxu0 %v5783_v10  ;;  %3331 = vmatpush1.bf16.msra.mxu1 %v5786_v60 }
 0xfbb   :  { %3291 = vmatprep.subr.bf16.mxu0 %v5789_v59  ;;  %3332 = vmatprep.subr.bf16.mxu1 %v5792_v1 }
 0xfbe   :  { %3292 = vmatpush1.bf16.msra.mxu0 %v5795_v3  ;;  %3333 = vmatpush1.bf16.msra.mxu1 %v5798_v12 }
 0xfbf   :  { %3397 = vmatprep.subr.bf16.mxu0 %v5695_v5  ;;  %3438 = vmatprep.subr.bf16.mxu1 %v5698_v49 }
0x1061   :  { %v3191_v13 = vpop.f32.mrf.mxu0  ;;  %v3232_v15 = vpop.f32.mrf.mxu1 }
0x1062   :  { %v3239_v57 = vadd.f32 %v3191_v13, %v3152_v61  ;;  %v3241_v44 = vadd.f32 %v3232_v15, %v3154_v53 }
0x1063   :  { %v3193_v16 = vpop.f32.mrf.mxu0  ;;  %v3234_v18 = vpop.f32.mrf.mxu1 }
0x1064   :  { %v4042_v17 = vmul.f32 -1.442695, %v3239_v57  ;;  %v3240_v22 = vadd.f32 %v3193_v16, %v3153_v0  ;;  %v3242_v31 = vadd.f32 %v3234_v18, %v3155_v37 }
0x1065   :  { %v3195_v23 = vpop.f32.mrf.mxu0  ;;  %v3236_v25 = vpop.f32.mrf.mxu1 }
0x1066   :  { %4545 = vpow2.f32 %v4042_v17  ;;  %v4043_v58 = vmul.f32 -1.442695, %v3240_v22  ;;  %v4044_v19 = vmul.f32 -1.442695, %v3242_v31 }
0x1067   :  { %v3196_v48 = vpop.f32.mrf.mxu0  ;;  %v3237_v42 = vpop.f32.mrf.mxu1 }
0x1068   :  { %4547 = vpow2.f32 %v4043_v58 }
0x1069   :  { %4549 = vtanh.f32 %v3241_v44 }
0x106a   :  { %4551 = vpow2.f32 %v4044_v19 }
0x1073   :  { %v4546_v24 = vpop.eup %4545 }
0x1074   :  { %v3246_v4 = vadd.f32 1.0, %v4546_v24 }
0x1075   :  { %v4548_v6 = vpop.eup %4547 }
0x1076   :  { %4553 = vrcp.f32 %v3246_v4  ;;  %v3252_v30 = vadd.f32 1.0, %v4548_v6  ;;  %v4550_v54 = vpop.eup %4549 }
0x1077   :  { %v4552_v21 = vpop.eup %4551 }
0x1078   :  { %4555 = vrcp.f32 %v3252_v30  ;;  %v3259_v13 = vadd.f32 1.0, %v4552_v21 }
0x107a   :  { %4557 = vrcp.f32 %v3259_v13 }
0x1083   :  { %v4554_v14 = vpop.eup %4553 }
0x1084   :  { %v3263_v41 = vmul.f32 %v4554_v14, %v4550_v54 }
0x1085   :  { %v4556_v61 = vpop.eup %4555 }
0x1086   :  { %v3262_v57 = vmul.f32 %v4556_v61, %v5946_v51 }
0x1087   :  { %v4558_v15 = vpop.eup %4557 }
0x1088   :  { %v5992_v0 = vadd.f32 %v3263_v41, %v3262_v57 }
0x108a   :  { %4559 = vtanh.f32 %v5992_v0 }
0x1097   :  { %v4560_v16 = vpop.eup %4559 }
0x1098   :  { %v3266_v18 = vmul.f32 %v4560_v16, %v4558_v15 }
0x109a   :  { %v5997_v17 = vsel %vm3267_vm13, %v3266_v18, %v5951_v2  ;;  %v3276_v22 = vpack.c.bf16 %v3266_v18, %v3266_v18 }
0x109c   :  { %3310 = vmatmul.mubr.bf16.vlgmr.msra.gmra.mxu0 %v3276_v22  ;;  %3351 = vmatmul.mubr.bf16.vlgmr.msra.gmra.mxu1 %v3276_v22 }
0x109d   :  { %3398 = vmatpush1.bf16.msra.mxu0 %v5659_v34  ;;  %3439 = vmatpush1.bf16.msra.mxu1 %v5714_v9  ;;  %v6270_v34 = vld [vmem:[#allocation33_spill] sm:$0xff] }
0x109e   :  { %3399 = vmatprep.subr.bf16.mxu0 %v5663_v7  ;;  %3440 = vmatprep.subr.bf16.mxu1 %v5718_v27  ;;  %v3272_v7 = vunpack.c.l.bf16 %v6270_v34  ;;  %v3273_v25 = vunpack.c.h.bf16 %v6270_v34 }
0x109f   :  { %3429 = vmatprep.mubr.bf16.mxu0 %v6245_v62  ;;  %3470 = vmatprep.mubr.bf16.mxu1 %v6245_v62 }
0x10a1   :  { %3400 = vmatpush1.bf16.msra.mxu0 %v5723_v26  ;;  %3441 = vmatpush1.bf16.msra.mxu1 %v5726_v29 }
0x10a2   :  { %3401 = vmatprep.subr.bf16.mxu0 %v5729_v33  ;;  %3442 = vmatprep.subr.bf16.mxu1 %v5732_v35 }
0x10a5   :  { %3402 = vmatpush1.bf16.msra.mxu0 %v5735_v8  ;;  %3443 = vmatpush1.bf16.msra.mxu1 %v5738_v11 }
0x10a6   :  { %3403 = vmatprep.subr.bf16.mxu0 %v5741_v36  ;;  %3444 = vmatprep.subr.bf16.mxu1 %v5744_v63 }
0x10a9   :  { %3404 = vmatpush1.bf16.msra.mxu0 %v5747_v38  ;;  %3445 = vmatpush1.bf16.msra.mxu1 %v5750_v39 }
0x10aa   :  { %3405 = vmatprep.subr.bf16.mxu0 %v5753_v43  ;;  %3446 = vmatprep.subr.bf16.mxu1 %v5756_v45 }
0x10ad   :  { %3406 = vmatpush1.bf16.msra.mxu0 %v5759_v52  ;;  %3447 = vmatpush1.bf16.msra.mxu1 %v5762_v56 }
0x10ae   :  { %3407 = vmatprep.subr.bf16.mxu0 %v5765_v28  ;;  %3448 = vmatprep.subr.bf16.mxu1 %v5768_v32 }
0x10b1   :  { %3408 = vmatpush1.bf16.msra.mxu0 %v5771_v46  ;;  %3449 = vmatpush1.bf16.msra.mxu1 %v5774_v40 }
0x10b2   :  { %3409 = vmatprep.subr.bf16.mxu0 %v5777_v55  ;;  %3450 = vmatprep.subr.bf16.mxu1 %v5780_v20 }
0x10b5   :  { %3410 = vmatpush1.bf16.msra.mxu0 %v5783_v10  ;;  %3451 = vmatpush1.bf16.msra.mxu1 %v5786_v60 }
0x10b6   :  { %3411 = vmatprep.subr.bf16.mxu0 %v5789_v59  ;;  %3452 = vmatprep.subr.bf16.mxu1 %v5792_v1 }
0x10b9   :  { %3412 = vmatpush1.bf16.msra.mxu0 %v5795_v3  ;;  %3453 = vmatpush1.bf16.msra.mxu1 %v5798_v12 }
0x10ba   :  { %3517 = vmatprep.subr.bf16.mxu0 %v5695_v5  ;;  %3558 = vmatprep.subr.bf16.mxu1 %v5698_v49  ;;  %v6271_v5 = vld [vmem:[#allocation34_spill] sm:$0xff] }
0x10bb   :  { %v3275_v49 = vunpack.c.h.bf16 %v6271_v5  ;;  %v3274_v4 = vunpack.c.l.bf16 %v6271_v5 }
0x115c   :  { %v3311_v51 = vpop.f32.mrf.mxu0  ;;  %v3352_v2 = vpop.f32.mrf.mxu1 }
0x115d   :  { %v3359_v23 = vadd.f32 %v3311_v51, %v3272_v7  ;;  %v3361_v6 = vadd.f32 %v3352_v2, %v3274_v4  ;;  %v4697_v4 = vld [vmem:[#allocation5 + $0xe8] ss:$16 sps:$4 sm:$0xff]  }
0x115e   :  { %v3313_v58 = vpop.f32.mrf.mxu0  ;;  %v3354_v48 = vpop.f32.mrf.mxu1 }
0x115f   :  { %v4045_v42 = vmul.f32 -1.442695, %v3359_v23  ;;  %v3360_v47 = vadd.f32 %v3313_v58, %v3273_v25  ;;  %v3362_v24 = vadd.f32 %v3354_v48, %v3275_v49  ;;  %v6045_v58 = vld [vmem:[#allocation5 + $0xe0] ss:$16 sps:$4 sm:$0xff]  }
0x1160   :  { %v3315_v37 = vpop.f32.mrf.mxu0  ;;  %v3356_v31 = vpop.f32.mrf.mxu1 }
0x1161   :  { %4561 = vpow2.f32 %v4045_v42  ;;  %v4046_v53 = vmul.f32 -1.442695, %v3360_v47  ;;  %v4047_v30 = vmul.f32 -1.442695, %v3362_v24 }
0x1162   :  { %v3316_v44 = vpop.f32.mrf.mxu0  ;;  %v3357_v19 = vpop.f32.mrf.mxu1 }
0x1163   :  { %4563 = vpow2.f32 %v4046_v53 }
0x1164   :  { %4565 = vtanh.f32 %v3361_v6  ;;  %v4698_v6 = vld [vmem:[#allocation5 + $0xcc] ss:$16 sps:$4 sm:$0xff]  }
0x1165   :  { %4567 = vpow2.f32 %v4047_v30  ;;  %v4699_v30 = vld [vmem:[#allocation5 + $0xc0] ss:$16 sps:$4 sm:$0xff]  }
0x116e   :  { %v4562_v54 = vpop.eup %4561 }
0x116f   :  { %v3366_v21 = vadd.f32 1.0, %v4562_v54  ;;  %v4700_v54 = vld [vmem:[#allocation5 + $0xc8] ss:$16 sps:$4 sm:$0xff]  }
0x1170   :  { %v4564_v14 = vpop.eup %4563 }
0x1171   :  { %4569 = vrcp.f32 %v3366_v21  ;;  %v3372_v41 = vadd.f32 1.0, %v4564_v14  ;;  %v4566_v61 = vpop.eup %4565  ;;  %v4701_v21 = vld [vmem:[#allocation5 + $0xa4] ss:$16 sps:$4 sm:$0xff]   ;;  %v4702_v14 = vld [vmem:[#allocation5 + $0xac] ss:$16 sps:$4 sm:$0xff]  }
0x1172   :  { %v4568_v13 = vpop.eup %4567 }
0x1173   :  { %4571 = vrcp.f32 %v3372_v41  ;;  %v3379_v18 = vadd.f32 1.0, %v4568_v13  ;;  %v4703_v41 = vld [vmem:[#allocation5 + $0xa0] ss:$16 sps:$4 sm:$0xff]   ;;  %v4705_v13 = vld [vmem:[#allocation5 + $0x84] ss:$16 sps:$4 sm:$0xff]  }
0x1175   :  { %4573 = vrcp.f32 %v3379_v18  ;;  %v4710_v18 = vld [vmem:[#allocation5 + $0x6c] ss:$16 sps:$4 sm:$0xff]  }
0x117e   :  { %v4570_v57 = vpop.eup %4569 }
0x117f   :  { %v3383_v15 = vmul.f32 %v4570_v57, %v4566_v61  ;;  %v4704_v61 = vld [vmem:[#allocation5 + $0xa8] ss:$16 sps:$4 sm:$0xff]   ;;  %v4706_v57 = vld [vmem:[#allocation5 + $0x8c] ss:$16 sps:$4 sm:$0xff]  }
0x1180   :  { %v4572_v16 = vpop.eup %4571 }
0x1181   :  { %v3382_v22 = vmul.f32 %v4572_v16, %v5992_v0  ;;  %v6049_v0 = vld [vmem:[#allocation5 + $0xc4] ss:$16 sps:$4 sm:$0xff]   ;;  %v4708_v16 = vld [vmem:[#allocation5 + $0x88] ss:$16 sps:$4 sm:$0xff]  }
0x1182   :  { %v4574_v7 = vpop.eup %4573 }
0x1183   :  { %v6038_v34 = vadd.f32 %v3383_v15, %v3382_v22  ;;  %v4707_v15 = vld [vmem:[#allocation5 + $0x80] ss:$16 sps:$4 sm:$0xff]  }
0x1184   :  { %v4711_v22 = vld [vmem:[#allocation5 + $0x60] ss:$16 sps:$4 sm:$0xff]  }
0x1185   :  { %4575 = vtanh.f32 %v6038_v34 }
0x1192   :  { %v4576_v51 = vpop.eup %4575 }
0x1193   :  { %v3386_v2 = vmul.f32 %v4576_v51, %v4574_v7  ;;  %v4713_v7 = vld [vmem:[#allocation5 + $0x44] ss:$16 sps:$4 sm:$0xff]   ;;  %v4714_v51 = vld [vmem:[#allocation5 + $0x4c] ss:$16 sps:$4 sm:$0xff]  }
0x1195   :  { %v3396_v23 = vpack.c.bf16 %v3386_v2, %v3386_v2  ;;  %v6043_v25 = vsel %vm3387_vm14, %v3386_v2, %v5997_v17  ;;  %v4715_v2 = vld [vmem:[#allocation5 + $0x40] ss:$16 sps:$4 sm:$0xff]  }
0x1197   :  { %3430 = vmatmul.mubr.bf16.vlgmr.msra.gmra.mxu0 %v3396_v23  ;;  %3471 = vmatmul.mubr.bf16.vlgmr.msra.gmra.mxu1 %v3396_v23  ;;  %v4716_v23 = vld [vmem:[#allocation5 + $0x48] ss:$16 sps:$4 sm:$0xff]  }
0x1198   :  { %3518 = vmatpush1.bf16.msra.mxu0 %v6045_v58  ;;  %3559 = vmatpush1.bf16.msra.mxu1 %v5714_v9  ;;  %v4695_v9 = vld [vmem:[#allocation5 + $0xe4] ss:$16 sps:$4 sm:$0xff]  }
0x1199   :  { %3519 = vmatprep.subr.bf16.mxu0 %v6049_v0  ;;  %3560 = vmatprep.subr.bf16.mxu1 %v5718_v27  ;;  %v4696_v27 = vld [vmem:[#allocation5 + $0xec] ss:$16 sps:$4 sm:$0xff]  }
0x119a   :  { %3549 = vmatprep.mubr.bf16.mxu0 %v6245_v62  ;;  %3590 = vmatprep.mubr.bf16.mxu1 %v6245_v62 }
0x119c   :  { %3520 = vmatpush1.bf16.msra.mxu0 %v5723_v26  ;;  %3561 = vmatpush1.bf16.msra.mxu1 %v5726_v29  ;;  %v6272_v26 = vld [vmem:[#allocation35_spill] sm:$0xff] }
0x119d   :  { %3521 = vmatprep.subr.bf16.mxu0 %v5729_v33  ;;  %3562 = vmatprep.subr.bf16.mxu1 %v5732_v35  ;;  %v3392_v29 = vunpack.c.l.bf16 %v6272_v26 }
0x11a0   :  { %3522 = vmatpush1.bf16.msra.mxu0 %v5735_v8  ;;  %3563 = vmatpush1.bf16.msra.mxu1 %v5738_v11  ;;  %v3393_v11 = vunpack.c.h.bf16 %v6272_v26  ;;  %v4722_v26 = vld [vmem:[#allocation5 + $0xc] ss:$16 sps:$4 sm:$0xff]  }
0x11a1   :  { %3523 = vmatprep.subr.bf16.mxu0 %v5741_v36  ;;  %3564 = vmatprep.subr.bf16.mxu1 %v5744_v63 }
0x11a4   :  { %3524 = vmatpush1.bf16.msra.mxu0 %v5747_v38  ;;  %3565 = vmatpush1.bf16.msra.mxu1 %v5750_v39 }
0x11a5   :  { %3525 = vmatprep.subr.bf16.mxu0 %v5753_v43  ;;  %3566 = vmatprep.subr.bf16.mxu1 %v5756_v45 }
0x11a8   :  { %3526 = vmatpush1.bf16.msra.mxu0 %v5759_v52  ;;  %3567 = vmatpush1.bf16.msra.mxu1 %v5762_v56 }
0x11a9   :  { %3527 = vmatprep.subr.bf16.mxu0 %v5765_v28  ;;  %3568 = vmatprep.subr.bf16.mxu1 %v5768_v32  ;;  %v6273_v32 = vld [vmem:[#allocation36_spill] sm:$0xff] }
0x11ac   :  { %3528 = vmatpush1.bf16.msra.mxu0 %v5771_v46  ;;  %3569 = vmatpush1.bf16.msra.mxu1 %v5774_v40  ;;  %v3395_v46 = vunpack.c.h.bf16 %v6273_v32 }
0x11ad   :  { %3529 = vmatprep.subr.bf16.mxu0 %v5777_v55  ;;  %3570 = vmatprep.subr.bf16.mxu1 %v5780_v20  ;;  %v3394_v55 = vunpack.c.l.bf16 %v6273_v32 }
0x11b0   :  { %3530 = vmatpush1.bf16.msra.mxu0 %v5783_v10  ;;  %3571 = vmatpush1.bf16.msra.mxu1 %v5786_v60 }
0x11b1   :  { %3531 = vmatprep.subr.bf16.mxu0 %v5789_v59  ;;  %3572 = vmatprep.subr.bf16.mxu1 %v5792_v1 }
0x11b4   :  { %3532 = vmatpush1.bf16.msra.mxu0 %v5795_v3  ;;  %3573 = vmatpush1.bf16.msra.mxu1 %v5798_v12 }
0x11b5   :  { %3637 = vmatprep.subr.bf16.mxu0 %v4695_v9  ;;  %3678 = vmatprep.subr.bf16.mxu1 %v4696_v27  ;;  %v4720_v9 = vld [vmem:[#allocation5 + $0x28] ss:$16 sps:$4 sm:$0xff]   ;;  %v4721_v27 = vld [vmem:[#allocation5 + $0x4] ss:$16 sps:$4 sm:$0xff]  }
0x1257   :  { %v3431_v33 = vpop.f32.mrf.mxu0  ;;  %v3472_v35 = vpop.f32.mrf.mxu1 }
0x1258   :  { %v3479_v8 = vadd.f32 %v3431_v33, %v3392_v29  ;;  %v3481_v20 = vadd.f32 %v3472_v35, %v3394_v55  ;;  %v4723_v29 = vld [vmem:[#allocation5] ss:$16 sps:$4 sm:$0xff]   ;;  %v4724_v33 = vld [vmem:[#allocation5 + $0x8] ss:$16 sps:$4 sm:$0xff]  }
0x1259   :  { %v3433_v36 = vpop.f32.mrf.mxu0  ;;  %v3474_v63 = vpop.f32.mrf.mxu1  ;;  %v6274_v35 = vld [vmem:[#allocation37_spill] sm:$0xff]  ;;  %v6275_v55 = vld [vmem:[#allocation38_spill] sm:$0xff] }
0x125a   :  { %v4048_v38 = vmul.f32 -1.442695, %v3479_v8  ;;  %v3480_v39 = vadd.f32 %v3433_v36, %v3393_v11  ;;  %v3482_v40 = vadd.f32 %v3474_v63, %v3395_v46  ;;  %v3512_v8 = vunpack.c.l.bf16 %v6274_v35 }
0x125b   :  { %v3435_v43 = vpop.f32.mrf.mxu0  ;;  %v3476_v45 = vpop.f32.mrf.mxu1 }
0x125c   :  { %4577 = vpow2.f32 %v4048_v38  ;;  %v4049_v52 = vmul.f32 -1.442695, %v3480_v39  ;;  %v4050_v10 = vmul.f32 -1.442695, %v3482_v40  ;;  %v3513_v38 = vunpack.c.h.bf16 %v6274_v35 }
0x125d   :  { %v3436_v56 = vpop.f32.mrf.mxu0  ;;  %v3477_v28 = vpop.f32.mrf.mxu1 }
0x125e   :  { %4579 = vpow2.f32 %v4049_v52 }
0x125f   :  { %4581 = vtanh.f32 %v3481_v20  ;;  %v3515_v20 = vunpack.c.h.bf16 %v6275_v55 }
0x1260   :  { %4583 = vpow2.f32 %v4050_v10 }
0x1269   :  { %v4578_v60 = vpop.eup %4577 }
0x126a   :  { %v3486_v59 = vadd.f32 1.0, %v4578_v60  ;;  %v3514_v60 = vunpack.c.l.bf16 %v6275_v55 }
0x126b   :  { %v4580_v1 = vpop.eup %4579 }
0x126c   :  { %4585 = vrcp.f32 %v3486_v59  ;;  %v3492_v3 = vadd.f32 1.0, %v4580_v1  ;;  %v4582_v12 = vpop.eup %4581 }
0x126d   :  { %v4584_v17 = vpop.eup %4583 }
0x126e   :  { %4587 = vrcp.f32 %v3492_v3  ;;  %v3499_v37 = vadd.f32 1.0, %v4584_v17 }
0x1270   :  { %4589 = vrcp.f32 %v3499_v37 }
0x1279   :  { %v4586_v48 = vpop.eup %4585 }
0x127a   :  { %v3503_v42 = vmul.f32 %v4586_v48, %v4582_v12 }
0x127b   :  { %v4588_v47 = vpop.eup %4587 }
0x127c   :  { %v3502_v31 = vmul.f32 %v4588_v47, %v6038_v34  ;;  %v4712_v34 = vld [vmem:[#allocation5 + $0x68] ss:$16 sps:$4 sm:$0xff]  }
0x127d   :  { %v4590_v44 = vpop.eup %4589 }
0x127e   :  { %v6086_v53 = vadd.f32 %v3503_v42, %v3502_v31 }
0x1280   :  { %4591 = vtanh.f32 %v6086_v53 }
0x128d   :  { %v4592_v19 = vpop.eup %4591 }
0x128e   :  { %v3506_v5 = vmul.f32 %v4592_v19, %v4590_v44 }
0x1290   :  { %v3516_v49 = vpack.c.bf16 %v3506_v5, %v3506_v5  ;;  %v6091_v24 = vsel %vm3507_vm15, %v3506_v5, %v6043_v25  ;;  %v4717_v25 = vld [vmem:[#allocation5 + $0x24] ss:$16 sps:$4 sm:$0xff]  }
0x1292   :  { %3550 = vmatmul.mubr.bf16.vlgmr.msra.gmra.mxu0 %v3516_v49  ;;  %3591 = vmatmul.mubr.bf16.vlgmr.msra.gmra.mxu1 %v3516_v49 }
0x1293   :  { %3638 = vmatpush1.bf16.msra.mxu0 %v6045_v58  ;;  %3679 = vmatpush1.bf16.msra.mxu1 %v4697_v4  ;;  %v4718_v58 = vld [vmem:[#allocation5 + $0x2c] ss:$16 sps:$4 sm:$0xff]  }
0x1294   :  { %3639 = vmatprep.subr.bf16.mxu0 %v6049_v0  ;;  %3680 = vmatprep.subr.bf16.mxu1 %v4698_v6  ;;  %v4719_v0 = vld [vmem:[#allocation5 + $0x20] ss:$16 sps:$4 sm:$0xff]  }
0x1295   :  { %3669 = vmatprep.mubr.bf16.mxu0 %v6245_v62  ;;  %3710 = vmatprep.mubr.bf16.mxu1 %v6245_v62  ;;  %v4709_v62 = vld [vmem:[#allocation5 + $0x64] ss:$16 sps:$4 sm:$0xff]  }
0x1297   :  { %3640 = vmatpush1.bf16.msra.mxu0 %v4699_v30  ;;  %3681 = vmatpush1.bf16.msra.mxu1 %v4700_v54 }
0x1298   :  { %3641 = vmatprep.subr.bf16.mxu0 %v4701_v21  ;;  %3682 = vmatprep.subr.bf16.mxu1 %v4702_v14  ;;  %v4775_v14 = vmov 0.0  }
0x129b   :  { %3642 = vmatpush1.bf16.msra.mxu0 %v4703_v41  ;;  %3683 = vmatpush1.bf16.msra.mxu1 %v4704_v61  ;;  %v3763_v41 = vld [vmem:[%s6177_s4 + $0x70] sm:$0xff]  ;;  %v3761_v61 = vld [vmem:[%s6177_s4 + $0x60] sm:$0xff] }
0x129c   :  { %3643 = vmatprep.subr.bf16.mxu0 %v4705_v13  ;;  %3684 = vmatprep.subr.bf16.mxu1 %v4706_v57  ;;  %v3760_v13 = vld [vmem:[%s6177_s4 + $0x58] sm:$0xff]  ;;  %v3759_v57 = vld [vmem:[%s6177_s4 + $0x50] sm:$0xff] }
0x129f   :  { %3644 = vmatpush1.bf16.msra.mxu0 %v4707_v15  ;;  %3685 = vmatpush1.bf16.msra.mxu1 %v4708_v16  ;;  %v3758_v15 = vld [vmem:[%s6177_s4 + $0x48] sm:$0xff]  ;;  %v3757_v16 = vld [vmem:[%s6177_s4 + $0x40] sm:$0xff] }
0x12a0   :  { %3645 = vmatprep.subr.bf16.mxu0 %v4709_v62  ;;  %3686 = vmatprep.subr.bf16.mxu1 %v4710_v18  ;;  %v3756_v62 = vld [vmem:[%s6177_s4 + $0x38] sm:$0xff]  ;;  %v3755_v18 = vld [vmem:[%s6177_s4 + $0x30] sm:$0xff] }
0x12a3   :  { %3646 = vmatpush1.bf16.msra.mxu0 %v4711_v22  ;;  %3687 = vmatpush1.bf16.msra.mxu1 %v4712_v34  ;;  %v3754_v22 = vld [vmem:[%s6177_s4 + $0x28] sm:$0xff]  ;;  %v3753_v34 = vld [vmem:[%s6177_s4 + $0x20] sm:$0xff] }
0x12a4   :  { %3647 = vmatprep.subr.bf16.mxu0 %v4713_v7  ;;  %3688 = vmatprep.subr.bf16.mxu1 %v4714_v51  ;;  %v3752_v7 = vld [vmem:[%s6177_s4 + $0x18] sm:$0xff]  ;;  %v3751_v51 = vld [vmem:[%s6177_s4 + $0x10] sm:$0xff] }
0x12a7   :  { %3648 = vmatpush1.bf16.msra.mxu0 %v4715_v2  ;;  %3689 = vmatpush1.bf16.msra.mxu1 %v4716_v23  ;;  %v3750_v2 = vld [vmem:[%s6177_s4 + $0x8] sm:$0xff]  ;;  %v3749_v23 = vld [vmem:[%s6177_s4] sm:$0xff] }
0x12a8   :  { %3649 = vmatprep.subr.bf16.mxu0 %v4717_v25  ;;  %3690 = vmatprep.subr.bf16.mxu1 %v4718_v58  ;;  %v6276_v25 = vld [vmem:[#allocation39_spill] sm:$0xff] }
0x12a9   :  { %v3632_v58 = vunpack.c.l.bf16 %v6276_v25 }
0x12ab   :  { %3650 = vmatpush1.bf16.msra.mxu0 %v4719_v0  ;;  %3691 = vmatpush1.bf16.msra.mxu1 %v4720_v9 }
0x12ac   :  { %3651 = vmatprep.subr.bf16.mxu0 %v4721_v27  ;;  %3692 = vmatprep.subr.bf16.mxu1 %v4722_v26  ;;  %v3633_v26 = vunpack.c.h.bf16 %v6276_v25 }
0x12af   :  { %3652 = vmatpush1.bf16.msra.mxu0 %v4723_v29  ;;  %3693 = vmatpush1.bf16.msra.mxu1 %v4724_v33 }
0x12b0   :  { %4165 = vmatprep.subr.mxu0 %v4775_v14 }
0x1352   :  { %v3551_v11 = vpop.f32.mrf.mxu0  ;;  %v3592_v36 = vpop.f32.mrf.mxu1 }
0x1353   :  { %v3599_v63 = vadd.f32 %v3551_v11, %v3512_v8  ;;  %v3601_v59 = vadd.f32 %v3592_v36, %v3514_v60 }
0x1354   :  { %v3553_v39 = vpop.f32.mrf.mxu0  ;;  %v3594_v43 = vpop.f32.mrf.mxu1 }
0x1355   :  { %v4051_v45 = vmul.f32 -1.442695, %v3599_v63  ;;  %v3600_v52 = vadd.f32 %v3553_v39, %v3513_v38  ;;  %v3602_v10 = vadd.f32 %v3594_v43, %v3515_v20  ;;  %v6277_v43 = vld [vmem:[#allocation40_spill] sm:$0xff] }
0x1356   :  { %v3555_v56 = vpop.f32.mrf.mxu0  ;;  %v3596_v28 = vpop.f32.mrf.mxu1 }
0x1357   :  { %4593 = vpow2.f32 %v4051_v45  ;;  %v4052_v32 = vmul.f32 -1.442695, %v3600_v52  ;;  %v4053_v1 = vmul.f32 -1.442695, %v3602_v10  ;;  %v3635_v45 = vunpack.c.h.bf16 %v6277_v43 }
0x1358   :  { %v3556_v46 = vpop.f32.mrf.mxu0  ;;  %v3597_v40 = vpop.f32.mrf.mxu1  ;;  %v3634_v56 = vunpack.c.l.bf16 %v6277_v43 }
0x1359   :  { %4595 = vpow2.f32 %v4052_v32 }
0x135a   :  { %4597 = vtanh.f32 %v3601_v59 }
0x135b   :  { %4599 = vpow2.f32 %v4053_v1 }
0x1364   :  { %v4594_v3 = vpop.eup %4593 }
0x1365   :  { %v3606_v12 = vadd.f32 1.0, %v4594_v3 }
0x1366   :  { %v4596_v17 = vpop.eup %4595 }
0x1367   :  { %4601 = vrcp.f32 %v3606_v12  ;;  %v3612_v48 = vadd.f32 1.0, %v4596_v17  ;;  %v4598_v42 = vpop.eup %4597 }
0x1368   :  { %v4600_v47 = vpop.eup %4599 }
0x1369   :  { %4603 = vrcp.f32 %v3612_v48  ;;  %v3619_v19 = vadd.f32 1.0, %v4600_v47 }
0x136b   :  { %4605 = vrcp.f32 %v3619_v19 }
0x1374   :  { %v4602_v37 = vpop.eup %4601 }
0x1375   :  { %v3623_v31 = vmul.f32 %v4602_v37, %v4598_v42 }
0x1376   :  { %v4604_v44 = vpop.eup %4603 }
0x1377   :  { %v3622_v5 = vmul.f32 %v4604_v44, %v6086_v53  ;;  %v3764_v53 = vld [vmem:[%s6177_s4 + $0x78] sm:$0xff]  ;;  %v4057_v44 = vld [vmem:[%s6178_s5] ss:$0 sm:$0xff] }
0x1378   :  { %v4606_v4 = vpop.eup %4605 }
0x1379   :  { %v6102_v49 = vadd.f32 %v3623_v31, %v3622_v5 }
0x137b   :  { %4607 = vtanh.f32 %v6102_v49 }
0x1388   :  { %v4608_v6 = vpop.eup %4607 }
0x1389   :  { %v3626_v30 = vmul.f32 %v4608_v6, %v4606_v4 }
0x138b   :  { %v3636_v54 = vpack.c.bf16 %v3626_v30, %v3626_v30  ;;  %v6107_v21 = vsel %vm3627_vm0, %v3626_v30, %v6091_v24  ;;  %v3762_v24 = vld [vmem:[%s6177_s4 + $0x68] sm:$0xff] }
0x138d   :  { %3670 = vmatmul.mubr.bf16.vlgmr.msra.gmra.mxu0 %v3636_v54  ;;  %3711 = vmatmul.mubr.bf16.vlgmr.msra.gmra.mxu1 %v3636_v54 }
0x138e   :  { %4166 = vmatpush3.msra.mxu0 %v3764_v53  ;;  %4197 = vmatprep.mubr.msk.f32.mxu0 %vm4776_vm1, %v4775_v14 }
0x138f   :  { %4167 = vmatprep.subr.mxu0 %v4775_v14 }
0x1390   :  { %4168 = vmatpush3.msra.mxu0 %v3763_v41 }
0x1391   :  { %4169 = vmatprep.subr.mxu0 %v4775_v14 }
0x1392   :  { %4170 = vmatpush3.msra.mxu0 %v3762_v24 }
0x1393   :  { %4171 = vmatprep.subr.mxu0 %v4775_v14 }
0x1394   :  { %4172 = vmatpush3.msra.mxu0 %v3761_v61 }
0x1395   :  { %4173 = vmatprep.subr.mxu0 %v4775_v14 }
0x1396   :  { %4174 = vmatpush3.msra.mxu0 %v3760_v13 }
0x1397   :  { %4175 = vmatprep.subr.mxu0 %v4775_v14 }
0x1398   :  { %4176 = vmatpush3.msra.mxu0 %v3759_v57 }
0x1399   :  { %4177 = vmatprep.subr.mxu0 %v4775_v14 }
0x139a   :  { %4178 = vmatpush3.msra.mxu0 %v3758_v15 }
0x139b   :  { %4179 = vmatprep.subr.mxu0 %v4775_v14 }
0x139c   :  { %4180 = vmatpush3.msra.mxu0 %v3757_v16 }
0x139d   :  { %4181 = vmatprep.subr.mxu0 %v4775_v14 }
0x139e   :  { %4182 = vmatpush3.msra.mxu0 %v3756_v62 }
0x139f   :  { %4183 = vmatprep.subr.mxu0 %v4775_v14 }
0x13a0   :  { %4184 = vmatpush3.msra.mxu0 %v3755_v18 }
0x13a1   :  { %4185 = vmatprep.subr.mxu0 %v4775_v14 }
0x13a2   :  { %4186 = vmatpush3.msra.mxu0 %v3754_v22 }
0x13a3   :  { %4187 = vmatprep.subr.mxu0 %v4775_v14 }
0x13a4   :  { %4188 = vmatpush3.msra.mxu0 %v3753_v34 }
0x13a5   :  { %4189 = vmatprep.subr.mxu0 %v4775_v14 }
0x13a6   :  { %4190 = vmatpush3.msra.mxu0 %v3752_v7 }
0x13a7   :  { %4191 = vmatprep.subr.mxu0 %v4775_v14 }
0x13a8   :  { %4192 = vmatpush3.msra.mxu0 %v3751_v51 }
0x13a9   :  { %4193 = vmatprep.subr.mxu0 %v4775_v14 }
0x13aa   :  { %4194 = vmatpush3.msra.mxu0 %v3750_v2 }
0x13ab   :  { %4195 = vmatprep.subr.mxu0 %v4775_v14 }
0x13ac   :  { %4196 = vmatpush3.msra.mxu0 %v3749_v23 }
0x144d   :  { %v3671_v0 = vpop.f32.mrf.mxu0  ;;  %v3712_v9 = vpop.f32.mrf.mxu1 }
0x144e   :  { %v3719_v27 = vadd.f32 %v3671_v0, %v3632_v58  ;;  %v3721_v28 = vadd.f32 %v3712_v9, %v3634_v56 }
0x144f   :  { %v3673_v29 = vpop.f32.mrf.mxu0  ;;  %v3714_v33 = vpop.f32.mrf.mxu1 }
0x1450   :  { %v4054_v35 = vmul.f32 -1.442695, %v3719_v27  ;;  %v3720_v8 = vadd.f32 %v3673_v29, %v3633_v26  ;;  %v3722_v52 = vadd.f32 %v3714_v33, %v3635_v45 }
0x1451   :  { %v3675_v11 = vpop.f32.mrf.mxu0  ;;  %v3716_v36 = vpop.f32.mrf.mxu1 }
0x1452   :  { %4609 = vpow2.f32 %v4054_v35  ;;  %v4055_v63 = vmul.f32 -1.442695, %v3720_v8  ;;  %v4056_v32 = vmul.f32 -1.442695, %v3722_v52 }
0x1453   :  { %v3676_v38 = vpop.f32.mrf.mxu0  ;;  %v3717_v39 = vpop.f32.mrf.mxu1 }
0x1454   :  { %4611 = vpow2.f32 %v4055_v63 }
0x1455   :  { %4613 = vtanh.f32 %v3721_v28 }
0x1456   :  { %4615 = vpow2.f32 %v4056_v32 }
0x145f   :  { %v4610_v46 = vpop.eup %4609 }
0x1460   :  { %v3726_v40 = vadd.f32 1.0, %v4610_v46 }
0x1461   :  { %v4612_v55 = vpop.eup %4611 }
0x1462   :  { %4617 = vrcp.f32 %v3726_v40  ;;  %v3732_v20 = vadd.f32 1.0, %v4612_v55  ;;  %v4614_v10 = vpop.eup %4613 }
0x1463   :  { %v4616_v60 = vpop.eup %4615 }
0x1464   :  { %4619 = vrcp.f32 %v3732_v20  ;;  %v3739_v12 = vadd.f32 1.0, %v4616_v60 }
0x1466   :  { %4621 = vrcp.f32 %v3739_v12 }
0x146f   :  { %v4618_v59 = vpop.eup %4617 }
0x1470   :  { %v3743_v1 = vmul.f32 %v4618_v59, %v4614_v10 }
0x1471   :  { %v4620_v3 = vpop.eup %4619 }
0x1472   :  { %v3742_v17 = vmul.f32 %v4620_v3, %v6102_v49 }
0x1473   :  { %v4622_v42 = vpop.eup %4621 }
0x1474   :  { %v3744_v48 = vadd.f32 %v3743_v1, %v3742_v17 }
0x1476   :  { %4623 = vtanh.f32 %v3744_v48 }
0x1483   :  { %v4624_v47 = vpop.eup %4623 }
0x1484   :  { %v3746_v37 = vmul.f32 %v4624_v47, %v4622_v42 }
0x1486   :  { %v3748_v31 = vsel %vm3747_vm2, %v3746_v37, %v6107_v21 }
0x1487   :  { %4198 = vmatmul.mubr.f32.vlgmr.msra.gmra.mxu0 %v3748_v31 }
0x1547   :  { %v3838_v19 = vpop.f32.mrf.mxu0 }
0x1548   :  { %v3839_v5 = vadd.f32 %v4057_v44, %v3838_v19 }
0x1549   :  { %v4199_v4 = vpop.f32.mrf.mxu0 }
0x154a   :  { %v3843_v49 = vsel %vm3842_vm3, %v3839_v5, -inf }
0x154b   :  { %3844 = vmax.xlane.f32.xlu1 %v3843_v49 }
0x15d4   :  { %v3845_v6 = vpop.xlane.xlu1 %3844 }
0x15d5   :  { %v3846_v30 = vsub.f32 %v3839_v5, %v3845_v6 }
0x15d7   :  { %v3847_v54 = vmul.f32 1.442695, %v3846_v30 }
0x15d9   :  { %4625 = vpow2.f32 %v3847_v54 }
0x15e6   :  { %v4626_v14 = vpop.eup %4625 }
0x15e7   :  { %v3849_v50 = vsel %vm3842_vm3, %v4626_v14, 0.0 }
0x15e8   :  { %3850 = vadd.xlane.f32.xlu0 %v3849_v50 }
0x1671   :  { %v3851_v21 = vpop.xlane.xlu0 %3850 }
0x1672   :  { %4627 = vlog2.f32 %v3851_v21 }
0x167f   :  { %v4628_v53 = vpop.eup %4627 }
0x1680   :  { %v3853_v41 = vmul.f32 0.6931472, %v4628_v53 }
0x1682   :  { %v3854_v24 = vadd.f32 %v3853_v41, %v3845_v6 }
0x1684   :  { %v3855_v61 = vsub.f32 %v3839_v5, %v3854_v24 }
0x1686   :  { %3856 = vst.msk [vmem:[%s6179_s6] sm:$0xff] %vm3842_vm3, %v3855_v61 }
0x1687   :  { %3861 = vsyncpa [#allocation4], 1 }
0x1688   :  { %3862 = vsyncpa [#allocation6], 1 }

</bundles_post_ra>
